<compile_context>
chip_gen: v6e
topology: v6e:2x2x1
jax: 0.10.0
libtpu: 0.0.40
codegen_flags: <defaults>
</compile_context>

<pallas_src>
import functools

import jax
import jax.numpy as jnp
from jax.experimental import pallas as pl
from jax.experimental.pallas import tpu as pltpu


def _round_up(x: int, n: int) -> int:
    return (x + n - 1) // n * n


# ---------------------------------------------------------------------------
# Fused per-layer kernel: input projection + recurrence (+ optional head)
# ---------------------------------------------------------------------------
def _lstm_layer_kernel(x_ref, wih_ref, b_ref, whh_ref, *rest, Tc, mp, Hp, project):
    """One time-chunk of one LSTM layer.  Grid = (time_chunks,).

    x_ref  : (Tc*mp, D)   time-major input rows for this chunk
    wih_ref: (D, 4Hp)     input->gates weights (pre-transposed)
    b_ref  : (1, 4Hp)     combined bias b_ih + b_hh
    whh_ref: (Hp, 4Hp)    hidden->gates weights (pre-transposed)
    if project (last layer, fused Linear head):
        wout_ref: (Hp, Op), bout_ref: (1, Op), out_ref: (Tc*mp, Op)
        scratch : gx_scr (Tc*mp, 4Hp), h_scr (mp, Hp), c_scr (mp, Hp),
                  h_slab (Tc*mp, Hp)
    else:
        out_ref : (Tc*mp, Hp)
        scratch : gx_scr, h_scr, c_scr
    """
    if project:
        wout_ref, bout_ref, out_ref, gx_scr, h_scr, c_scr, h_slab = rest
    else:
        out_ref, gx_scr, h_scr, c_scr = rest
        h_slab = out_ref

    # Zero the carried state at the first time chunk (PyTorch default h0=c0=0).
    @pl.when(pl.program_id(0) == 0)
    def _():
        h_scr[...] = jnp.zeros_like(h_scr)
        c_scr[...] = jnp.zeros_like(c_scr)

    # Hoisted input projection for the whole chunk: one big, MXU-friendly GEMM.
    gx_scr[...] = (
        jnp.dot(x_ref[...], wih_ref[...], preferred_element_type=jnp.float32)
        + b_ref[...]
    )

    def step(t, carry):
        row = pl.multiple_of(t * mp, mp)  # sublane-aligned (mp % 8 == 0)
        gates = gx_scr[pl.ds(row, mp), :] + jnp.dot(
            h_scr[...], whh_ref[...], preferred_element_type=jnp.float32)
        i_g = jax.nn.sigmoid(gates[:, 0 * Hp:1 * Hp])
        f_g = jax.nn.sigmoid(gates[:, 1 * Hp:2 * Hp])
        g_g = jnp.tanh(gates[:, 2 * Hp:3 * Hp])
        o_g = jax.nn.sigmoid(gates[:, 3 * Hp:4 * Hp])
        c_new = f_g * c_scr[...] + i_g * g_g
        h_new = o_g * jnp.tanh(c_new)
        c_scr[...] = c_new
        h_scr[...] = h_new
        h_slab[pl.ds(row, mp), :] = h_new
        return carry

    jax.lax.fori_loop(0, Tc, step, 0, unroll=(Tc <= 8))

    if project:
        # Fused Linear head over the whole chunk: one GEMM on the VMEM h slab.
        out_ref[...] = (
            jnp.dot(h_slab[...], wout_ref[...], preferred_element_type=jnp.float32)
            + bout_ref[...]
        )


def lstm_layer(x2d, w_ih, b, w_hh, *, Tc, mp, Hp, w_out=None, b_out=None):
    """x2d: (Kp*mp, D) time-major rows -> (Kp*mp, Hp) or (Kp*mp, Op) if projecting."""
    N, D = x2d.shape
    G4 = 4 * Hp
    project = w_out is not None
    Oout = w_out.shape[1] if project else Hp
    n_chunks = N // (Tc * mp)

    kernel = functools.partial(
        _lstm_layer_kernel, Tc=Tc, mp=mp, Hp=Hp, project=project)

    in_specs = [
        pl.BlockSpec((Tc * mp, D), lambda c: (c, 0)),   # x chunk
        pl.BlockSpec((D, G4), lambda c: (0, 0)),        # W_ih (resident)
        pl.BlockSpec((1, G4), lambda c: (0, 0)),        # bias (resident)
        pl.BlockSpec((Hp, G4), lambda c: (0, 0)),       # W_hh (resident)
    ]
    args = [x2d, w_ih, b, w_hh]
    if project:
        in_specs += [
            pl.BlockSpec((Hp, Oout), lambda c: (0, 0)),  # W_out (resident)
            pl.BlockSpec((1, Oout), lambda c: (0, 0)),   # b_out (resident)
        ]
        args += [w_out, b_out]

    scratch = [
        pltpu.VMEM((Tc * mp, G4), jnp.float32),  # gate pre-activations (chunk)
        pltpu.VMEM((mp, Hp), jnp.float32),       # hidden state carry
        pltpu.VMEM((mp, Hp), jnp.float32),       # cell state carry
    ]
    if project:
        scratch.append(pltpu.VMEM((Tc * mp, Hp), jnp.float32))  # h slab (chunk)

    return pl.pallas_call(
        kernel,
        out_shape=jax.ShapeDtypeStruct((N, Oout), jnp.float32),
        grid_spec=pltpu.PrefetchScalarGridSpec(
            num_scalar_prefetch=0,
            grid=(n_chunks,),
            in_specs=in_specs,
            out_specs=pl.BlockSpec((Tc * mp, Oout), lambda c: (c, 0)),
            scratch_shapes=scratch,
        ),
        compiler_params=pltpu.CompilerParams(
            # time chunks carry recurrent state -> must run in order
            dimension_semantics=("arbitrary",)),
    )(*args)


# ---------------------------------------------------------------------------
# Parameter init (canonical, unpadded; transposed relative to PyTorch layout)
# ---------------------------------------------------------------------------
def init_params(key, input_dim, hidden_dim, output_dim, num_layers):
    params = {"layers": []}
    scale = 1.0 / jnp.sqrt(hidden_dim)
    for layer in range(num_layers):
        d_in = input_dim if layer == 0 else hidden_dim
        key, k1, k2, k3, k4 = jax.random.split(key, 5)
        w_ih = jax.random.uniform(k1, (d_in, 4 * hidden_dim), jnp.float32,
                                  -scale, scale)
        w_hh = jax.random.uniform(k2, (hidden_dim, 4 * hidden_dim), jnp.float32,
                                  -scale, scale)
        b_ih = jax.random.uniform(k3, (4 * hidden_dim,), jnp.float32, -scale, scale)
        b_hh = jax.random.uniform(k4, (4 * hidden_dim,), jnp.float32, -scale, scale)
        params["layers"].append((w_ih, w_hh, (b_ih + b_hh)[None, :]))
    key, k5, k6 = jax.random.split(key, 3)
    lscale = 1.0 / jnp.sqrt(hidden_dim)
    params["w_out"] = jax.random.uniform(k5, (hidden_dim, output_dim), jnp.float32,
                                         -lscale, lscale)
    params["b_out"] = jax.random.uniform(k6, (1, output_dim), jnp.float32,
                                         -lscale, lscale)
    return params


# ---------------------------------------------------------------------------
# Model wrapper (padding / layout glue in plain JAX, all compute in Pallas)
# ---------------------------------------------------------------------------
def _pad_gate_cols(w, H, Hp):
    """Pad each of the 4 gate blocks along the last dim from H to Hp with zeros."""
    if Hp == H:
        return w
    parts = jnp.split(w, 4, axis=-1)
    pad_width = [(0, 0)] * (w.ndim - 1) + [(0, Hp - H)]
    return jnp.concatenate([jnp.pad(p, pad_width) for p in parts], axis=-1)


@jax.jit
def lstm_model(x, params):
    """x: (m, K, input_dim) -> (m, K, output_dim)  (batch_first, like PyTorch)."""
    m, K, in_dim = x.shape
    H = params["layers"][0][1].shape[0]
    O = params["w_out"].shape[1]
    n_layers = len(params["layers"])

    mp = _round_up(m, 8)        # sublane-friendly batch
    Hp = _round_up(H, 128)      # lane-dense hidden
    Op = _round_up(O, 128)      # lane-dense head output

    # Time-chunk size: keep the (Tc*mp, 4Hp) f32 gate slab around ~2 MiB.
    bytes_per_step = mp * 4 * Hp * 4
    Tc = max(1, min(K, (2 * 1024 * 1024) // max(bytes_per_step, 1)))
    Tc = min(Tc, 64)
    Kp = _round_up(K, Tc)

    # Time-major, padded, flattened to 2-D rows (row index = t*mp + batch).
    h = jnp.transpose(x, (1, 0, 2)).astype(jnp.float32)          # (K, m, D)
    h = jnp.pad(h, ((0, Kp - K), (0, mp - m), (0, 0)))           # (Kp, mp, D)
    h = h.reshape(Kp * mp, in_dim)                               # (Kp*mp, D)

    for idx, (w_ih, w_hh, b) in enumerate(params["layers"]):
        last = idx == n_layers - 1

        # Zero-pad weights so padded hidden units stay exactly 0 (math unchanged).
        w_ih_p = _pad_gate_cols(w_ih, H, Hp)                     # (d_in, 4Hp)
        if idx > 0 and Hp != H:
            w_ih_p = jnp.pad(w_ih_p, ((0, Hp - H), (0, 0)))      # prev-hidden pad rows
        w_hh_p = _pad_gate_cols(w_hh, H, Hp)
        if Hp != H:
            w_hh_p = jnp.pad(w_hh_p, ((0, Hp - H), (0, 0)))      # (Hp, 4Hp)
        b_p = _pad_gate_cols(b, H, Hp)                           # (1, 4Hp)

        if last:
            w_out_p, b_out_p = params["w_out"], params["b_out"]
            if Hp != H:
                w_out_p = jnp.pad(w_out_p, ((0, Hp - H), (0, 0)))
            if Op != O:
                w_out_p = jnp.pad(w_out_p, ((0, 0), (0, Op - O)))
                b_out_p = jnp.pad(b_out_p, ((0, 0), (0, Op - O)))
            h = lstm_layer(h, w_ih_p, b_p, w_hh_p, Tc=Tc, mp=mp, Hp=Hp,
                           w_out=w_out_p, b_out=b_out_p)         # (Kp*mp, Op)
        else:
            h = lstm_layer(h, w_ih_p, b_p, w_hh_p, Tc=Tc, mp=mp, Hp=Hp)

    out = h.reshape(Kp, mp, Op)[:K, :m, :O]                      # strip padding
    return jnp.transpose(out, (1, 0, 2))                         # (m, K, O)


# ---------------------------------------------------------------------------
# Pure-JAX reference (correctness check only)
# ---------------------------------------------------------------------------
def lstm_model_ref(x, params):
    h = x
    for (w_ih, w_hh, b) in params["layers"]:
        Hh = w_hh.shape[0]
        m = h.shape[0]

        def step(carry, x_t, w_ih=w_ih, w_hh=w_hh, b=b, Hh=Hh):
            hprev, cprev = carry
            gates = x_t @ w_ih + hprev @ w_hh + b
            i = jax.nn.sigmoid(gates[:, :Hh])
            f = jax.nn.sigmoid(gates[:, Hh:2 * Hh])
            g = jnp.tanh(gates[:, 2 * Hh:3 * Hh])
            o = jax.nn.sigmoid(gates[:, 3 * Hh:])
            c = f * cprev + i * g
            hn = o * jnp.tanh(c)
            return (hn, c), hn

        init = (jnp.zeros((m, Hh), jnp.float32), jnp.zeros((m, Hh), jnp.float32))
        _, ys = jax.lax.scan(step, init, jnp.transpose(h, (1, 0, 2)))
        h = jnp.transpose(ys, (1, 0, 2))
    return h @ params["w_out"] + params["b_out"]


if __name__ == "__main__":
    batch, seq = 2, 8
    input_dim, hidden_dim, output_dim, num_layers = 16, 32, 8, 2

    key = jax.random.PRNGKey(0)
    key, kx, kp = jax.random.split(key, 3)
    x = jax.random.normal(kx, (batch, seq, input_dim), jnp.float32)
    params = init_params(kp, input_dim, hidden_dim, output_dim, num_layers)

    out = lstm_model(x, params)
    out = jax.block_until_ready(out)

    ref = lstm_model_ref(x, params)
    assert out.shape == (batch, seq, output_dim)
    err = float(jnp.max(jnp.abs(out - ref)))
    assert err < 1e-3, f"mismatch vs reference: max abs err = {err}"

    print("KERNEL_OK")
</pallas_src>

<mosaic_0001>
module attributes {stable_mosaic.version = 11 : i64} {
  func.func @_lstm_layer_kernel(%arg0: i32, %arg1: memref<64x16xf32, #tpu.memory_space<vmem>>, %arg2: memref<16x512xf32, #tpu.memory_space<vmem>>, %arg3: memref<1x512xf32, #tpu.memory_space<vmem>>, %arg4: memref<128x512xf32, #tpu.memory_space<vmem>>, %arg5: memref<64x128xf32, #tpu.memory_space<vmem>>, %arg6: memref<64x512xf32, #tpu.memory_space<vmem>>, %arg7: memref<8x128xf32, #tpu.memory_space<vmem>>, %arg8: memref<8x128xf32, #tpu.memory_space<vmem>>) attributes {dimension_semantics = [#tpu.dimension_semantics<arbitrary>], iteration_bounds = array<i64: 1>, scalar_prefetch = 0 : i64, scratch_operands = 3 : i64, tpu.core_type = #tpu.core_type<tc>, window_params = [{transform_indices = @transform_0, window_bounds = array<i64: 64, 16>}, {pipeline_mode = #tpu.pipeline_mode<synchronous>, transform_indices = @transform_1, window_bounds = array<i64: 16, 512>}, {pipeline_mode = #tpu.pipeline_mode<synchronous>, transform_indices = @transform_2, window_bounds = array<i64: 1, 512>}, {pipeline_mode = #tpu.pipeline_mode<synchronous>, transform_indices = @transform_3, window_bounds = array<i64: 128, 512>}, {transform_indices = @transform_4, window_bounds = array<i64: 64, 128>}]} {
    %c0_i32 = arith.constant 0 : i32
    %0 = arith.cmpi eq, %arg0, %c0_i32 : i32
    %1 = arith.extui %0 : i1 to i32
    %c0_i32_0 = arith.constant 0 : i32
    %2 = arith.cmpi ne, %1, %c0_i32_0 : i32
    scf.if %2 {
      %cst_145 = arith.constant 0.000000e+00 : f32
      %314 = vector.broadcast %cst_145 : f32 to vector<8x128xf32>
      %c0_146 = arith.constant 0 : index
      %c0_147 = arith.constant 0 : index
      %315 = vector.load %arg7[%c0_146, %c0_147] : memref<8x128xf32, #tpu.memory_space<vmem>>, vector<8x128xf32>
      tpu.vector_store %arg7[%c0_146, %c0_147], %314 {strides = array<i32>} : memref<8x128xf32, #tpu.memory_space<vmem>>, vector<8x128xf32>,
      %cst_148 = arith.constant 0.000000e+00 : f32
      %316 = vector.broadcast %cst_148 : f32 to vector<8x128xf32>
      %c0_149 = arith.constant 0 : index
      %c0_150 = arith.constant 0 : index
      %317 = vector.load %arg8[%c0_149, %c0_150] : memref<8x128xf32, #tpu.memory_space<vmem>>, vector<8x128xf32>
      tpu.vector_store %arg8[%c0_149, %c0_150], %316 {strides = array<i32>} : memref<8x128xf32, #tpu.memory_space<vmem>>, vector<8x128xf32>,
    } else {
    }
    %c0 = arith.constant 0 : index
    %c0_1 = arith.constant 0 : index
    %3 = vector.load %arg1[%c0, %c0_1] : memref<64x16xf32, #tpu.memory_space<vmem>>, vector<64x16xf32>
    %c0_2 = arith.constant 0 : index
    %c0_3 = arith.constant 0 : index
    %4 = vector.load %arg2[%c0_2, %c0_3] : memref<16x512xf32, #tpu.memory_space<vmem>>, vector<16x512xf32>
    %cst = arith.constant dense<0.000000e+00> : vector<64x512xf32>
    %5 = tpu.matmul %3, %4, %cst {dimension_numbers = #tpu.dot_dimension_numbers<[1], [0], [0], [1], [0, 0, 1, 1], [], []>} : vector<64x16xf32>, vector<16x512xf32>, vector<64x512xf32> -> vector<64x512xf32>
    %c0_4 = arith.constant 0 : index
    %c0_5 = arith.constant 0 : index
    %6 = vector.load %arg3[%c0_4, %c0_5] : memref<1x512xf32, #tpu.memory_space<vmem>>, vector<1x512xf32>
    %7 = vector.broadcast %6 : vector<1x512xf32> to vector<64x512xf32>
    %8 = arith.addf %5, %7 : vector<64x512xf32>
    %c0_6 = arith.constant 0 : index
    %c0_7 = arith.constant 0 : index
    %9 = vector.load %arg6[%c0_6, %c0_7] : memref<64x512xf32, #tpu.memory_space<vmem>>, vector<64x512xf32>
    tpu.vector_store %arg6[%c0_6, %c0_7], %8 {strides = array<i32>} : memref<64x512xf32, #tpu.memory_space<vmem>>, vector<64x512xf32>,
    %c0_i32_8 = arith.constant 0 : i32
    %c8_i32 = arith.constant 8 : i32
    %10 = arith.muli %c0_i32_8, %c8_i32 : i32
    %11 = tpu.assume_multiple %10, 8 : i32
    %12 = arith.index_cast %11 : i32 to index
    %c0_9 = arith.constant 0 : index
    %13 = vector.load %arg6[%12, %c0_9] : memref<64x512xf32, #tpu.memory_space<vmem>>, vector<8x512xf32>
    %c0_10 = arith.constant 0 : index
    %c0_11 = arith.constant 0 : index
    %14 = vector.load %arg7[%c0_10, %c0_11] : memref<8x128xf32, #tpu.memory_space<vmem>>, vector<8x128xf32>
    %c0_12 = arith.constant 0 : index
    %c0_13 = arith.constant 0 : index
    %15 = vector.load %arg4[%c0_12, %c0_13] : memref<128x512xf32, #tpu.memory_space<vmem>>, vector<128x512xf32>
    %cst_14 = arith.constant dense<0.000000e+00> : vector<8x512xf32>
    %16 = tpu.matmul %14, %15, %cst_14 {dimension_numbers = #tpu.dot_dimension_numbers<[1], [0], [0], [1], [0, 0, 1, 1], [], []>} : vector<8x128xf32>, vector<128x512xf32>, vector<8x512xf32> -> vector<8x512xf32>
    %17 = arith.addf %13, %16 : vector<8x512xf32>
    %18 = vector.extract_strided_slice %17 {offsets = [0, 0], sizes = [8, 128], strides = [1, 1]} : vector<8x512xf32> to vector<8x128xf32>
    %19 = arith.negf %18 : vector<8x128xf32>
    %20 = math.exp %19 : vector<8x128xf32>
    %cst_15 = arith.constant 1.000000e+00 : f32
    %21 = vector.broadcast %cst_15 : f32 to vector<8x128xf32>
    %22 = arith.addf %21, %20 : vector<8x128xf32>
    %23 = arith.divf %21, %22 : vector<8x128xf32>
    %24 = vector.extract_strided_slice %17 {offsets = [0, 128], sizes = [8, 128], strides = [1, 1]} : vector<8x512xf32> to vector<8x128xf32>
    %25 = arith.negf %24 : vector<8x128xf32>
    %26 = math.exp %25 : vector<8x128xf32>
    %cst_16 = arith.constant 1.000000e+00 : f32
    %27 = vector.broadcast %cst_16 : f32 to vector<8x128xf32>
    %28 = arith.addf %27, %26 : vector<8x128xf32>
    %29 = arith.divf %27, %28 : vector<8x128xf32>
    %30 = vector.extract_strided_slice %17 {offsets = [0, 256], sizes = [8, 128], strides = [1, 1]} : vector<8x512xf32> to vector<8x128xf32>
    %31 = math.tanh %30 : vector<8x128xf32>
    %32 = vector.extract_strided_slice %17 {offsets = [0, 384], sizes = [8, 128], strides = [1, 1]} : vector<8x512xf32> to vector<8x128xf32>
    %33 = arith.negf %32 : vector<8x128xf32>
    %34 = math.exp %33 : vector<8x128xf32>
    %cst_17 = arith.constant 1.000000e+00 : f32
    %35 = vector.broadcast %cst_17 : f32 to vector<8x128xf32>
    %36 = arith.addf %35, %34 : vector<8x128xf32>
    %37 = arith.divf %35, %36 : vector<8x128xf32>
    %c0_18 = arith.constant 0 : index
    %c0_19 = arith.constant 0 : index
    %38 = vector.load %arg8[%c0_18, %c0_19] : memref<8x128xf32, #tpu.memory_space<vmem>>, vector<8x128xf32>
    %39 = arith.mulf %29, %38 : vector<8x128xf32>
    %40 = arith.mulf %23, %31 : vector<8x128xf32>
    %41 = arith.addf %39, %40 : vector<8x128xf32>
    %42 = math.tanh %41 : vector<8x128xf32>
    %43 = arith.mulf %37, %42 : vector<8x128xf32>
    %c0_20 = arith.constant 0 : index
    %c0_21 = arith.constant 0 : index
    %44 = vector.load %arg8[%c0_20, %c0_21] : memref<8x128xf32, #tpu.memory_space<vmem>>, vector<8x128xf32>
    tpu.vector_store %arg8[%c0_20, %c0_21], %41 {strides = array<i32>} : memref<8x128xf32, #tpu.memory_space<vmem>>, vector<8x128xf32>,
    %c0_22 = arith.constant 0 : index
    %c0_23 = arith.constant 0 : index
    %45 = vector.load %arg7[%c0_22, %c0_23] : memref<8x128xf32, #tpu.memory_space<vmem>>, vector<8x128xf32>
    tpu.vector_store %arg7[%c0_22, %c0_23], %43 {strides = array<i32>} : memref<8x128xf32, #tpu.memory_space<vmem>>, vector<8x128xf32>,
    %46 = arith.index_cast %11 : i32 to index
    %c0_24 = arith.constant 0 : index
    %47 = vector.load %arg5[%46, %c0_24] : memref<64x128xf32, #tpu.memory_space<vmem>>, vector<8x128xf32>
    tpu.vector_store %arg5[%46, %c0_24], %43 {strides = array<i32>} : memref<64x128xf32, #tpu.memory_space<vmem>>, vector<8x128xf32>,
    %c1_i32 = arith.constant 1 : i32
    %c8_i32_25 = arith.constant 8 : i32
    %48 = arith.muli %c1_i32, %c8_i32_25 : i32
    %49 = tpu.assume_multiple %48, 8 : i32
    %50 = arith.index_cast %49 : i32 to index
    %c0_26 = arith.constant 0 : index
    %51 = vector.load %arg6[%50, %c0_26] : memref<64x512xf32, #tpu.memory_space<vmem>>, vector<8x512xf32>
    %c0_27 = arith.constant 0 : index
    %c0_28 = arith.constant 0 : index
    %52 = vector.load %arg7[%c0_27, %c0_28] : memref<8x128xf32, #tpu.memory_space<vmem>>, vector<8x128xf32>
    %c0_29 = arith.constant 0 : index
    %c0_30 = arith.constant 0 : index
    %53 = vector.load %arg4[%c0_29, %c0_30] : memref<128x512xf32, #tpu.memory_space<vmem>>, vector<128x512xf32>
    %cst_31 = arith.constant dense<0.000000e+00> : vector<8x512xf32>
    %54 = tpu.matmul %52, %53, %cst_31 {dimension_numbers = #tpu.dot_dimension_numbers<[1], [0], [0], [1], [0, 0, 1, 1], [], []>} : vector<8x128xf32>, vector<128x512xf32>, vector<8x512xf32> -> vector<8x512xf32>
    %55 = arith.addf %51, %54 : vector<8x512xf32>
    %56 = vector.extract_strided_slice %55 {offsets = [0, 0], sizes = [8, 128], strides = [1, 1]} : vector<8x512xf32> to vector<8x128xf32>
    %57 = arith.negf %56 : vector<8x128xf32>
    %58 = math.exp %57 : vector<8x128xf32>
    %cst_32 = arith.constant 1.000000e+00 : f32
    %59 = vector.broadcast %cst_32 : f32 to vector<8x128xf32>
    %60 = arith.addf %59, %58 : vector<8x128xf32>
    %61 = arith.divf %59, %60 : vector<8x128xf32>
    %62 = vector.extract_strided_slice %55 {offsets = [0, 128], sizes = [8, 128], strides = [1, 1]} : vector<8x512xf32> to vector<8x128xf32>
    %63 = arith.negf %62 : vector<8x128xf32>
    %64 = math.exp %63 : vector<8x128xf32>
    %cst_33 = arith.constant 1.000000e+00 : f32
    %65 = vector.broadcast %cst_33 : f32 to vector<8x128xf32>
    %66 = arith.addf %65, %64 : vector<8x128xf32>
    %67 = arith.divf %65, %66 : vector<8x128xf32>
    %68 = vector.extract_strided_slice %55 {offsets = [0, 256], sizes = [8, 128], strides = [1, 1]} : vector<8x512xf32> to vector<8x128xf32>
    %69 = math.tanh %68 : vector<8x128xf32>
    %70 = vector.extract_strided_slice %55 {offsets = [0, 384], sizes = [8, 128], strides = [1, 1]} : vector<8x512xf32> to vector<8x128xf32>
    %71 = arith.negf %70 : vector<8x128xf32>
    %72 = math.exp %71 : vector<8x128xf32>
    %cst_34 = arith.constant 1.000000e+00 : f32
    %73 = vector.broadcast %cst_34 : f32 to vector<8x128xf32>
    %74 = arith.addf %73, %72 : vector<8x128xf32>
    %75 = arith.divf %73, %74 : vector<8x128xf32>
    %c0_35 = arith.constant 0 : index
    %c0_36 = arith.constant 0 : index
    %76 = vector.load %arg8[%c0_35, %c0_36] : memref<8x128xf32, #tpu.memory_space<vmem>>, vector<8x128xf32>
    %77 = arith.mulf %67, %76 : vector<8x128xf32>
    %78 = arith.mulf %61, %69 : vector<8x128xf32>
    %79 = arith.addf %77, %78 : vector<8x128xf32>
    %80 = math.tanh %79 : vector<8x128xf32>
    %81 = arith.mulf %75, %80 : vector<8x128xf32>
    %c0_37 = arith.constant 0 : index
    %c0_38 = arith.constant 0 : index
    %82 = vector.load %arg8[%c0_37, %c0_38] : memref<8x128xf32, #tpu.memory_space<vmem>>, vector<8x128xf32>
    tpu.vector_store %arg8[%c0_37, %c0_38], %79 {strides = array<i32>} : memref<8x128xf32, #tpu.memory_space<vmem>>, vector<8x128xf32>,
    %c0_39 = arith.constant 0 : index
    %c0_40 = arith.constant 0 : index
    %83 = vector.load %arg7[%c0_39, %c0_40] : memref<8x128xf32, #tpu.memory_space<vmem>>, vector<8x128xf32>
    tpu.vector_store %arg7[%c0_39, %c0_40], %81 {strides = array<i32>} : memref<8x128xf32, #tpu.memory_space<vmem>>, vector<8x128xf32>,
    %84 = arith.index_cast %49 : i32 to index
    %c0_41 = arith.constant 0 : index
    %85 = vector.load %arg5[%84, %c0_41] : memref<64x128xf32, #tpu.memory_space<vmem>>, vector<8x128xf32>
    tpu.vector_store %arg5[%84, %c0_41], %81 {strides = array<i32>} : memref<64x128xf32, #tpu.memory_space<vmem>>, vector<8x128xf32>,
    %c2_i32 = arith.constant 2 : i32
    %c8_i32_42 = arith.constant 8 : i32
    %86 = arith.muli %c2_i32, %c8_i32_42 : i32
    %87 = tpu.assume_multiple %86, 8 : i32
    %88 = arith.index_cast %87 : i32 to index
    %c0_43 = arith.constant 0 : index
    %89 = vector.load %arg6[%88, %c0_43] : memref<64x512xf32, #tpu.memory_space<vmem>>, vector<8x512xf32>
    %c0_44 = arith.constant 0 : index
    %c0_45 = arith.constant 0 : index
    %90 = vector.load %arg7[%c0_44, %c0_45] : memref<8x128xf32, #tpu.memory_space<vmem>>, vector<8x128xf32>
    %c0_46 = arith.constant 0 : index
    %c0_47 = arith.constant 0 : index
    %91 = vector.load %arg4[%c0_46, %c0_47] : memref<128x512xf32, #tpu.memory_space<vmem>>, vector<128x512xf32>
    %cst_48 = arith.constant dense<0.000000e+00> : vector<8x512xf32>
    %92 = tpu.matmul %90, %91, %cst_48 {dimension_numbers = #tpu.dot_dimension_numbers<[1], [0], [0], [1], [0, 0, 1, 1], [], []>} : vector<8x128xf32>, vector<128x512xf32>, vector<8x512xf32> -> vector<8x512xf32>
    %93 = arith.addf %89, %92 : vector<8x512xf32>
    %94 = vector.extract_strided_slice %93 {offsets = [0, 0], sizes = [8, 128], strides = [1, 1]} : vector<8x512xf32> to vector<8x128xf32>
    %95 = arith.negf %94 : vector<8x128xf32>
    %96 = math.exp %95 : vector<8x128xf32>
    %cst_49 = arith.constant 1.000000e+00 : f32
    %97 = vector.broadcast %cst_49 : f32 to vector<8x128xf32>
    %98 = arith.addf %97, %96 : vector<8x128xf32>
    %99 = arith.divf %97, %98 : vector<8x128xf32>
    %100 = vector.extract_strided_slice %93 {offsets = [0, 128], sizes = [8, 128], strides = [1, 1]} : vector<8x512xf32> to vector<8x128xf32>
    %101 = arith.negf %100 : vector<8x128xf32>
    %102 = math.exp %101 : vector<8x128xf32>
    %cst_50 = arith.constant 1.000000e+00 : f32
    %103 = vector.broadcast %cst_50 : f32 to vector<8x128xf32>
    %104 = arith.addf %103, %102 : vector<8x128xf32>
    %105 = arith.divf %103, %104 : vector<8x128xf32>
    %106 = vector.extract_strided_slice %93 {offsets = [0, 256], sizes = [8, 128], strides = [1, 1]} : vector<8x512xf32> to vector<8x128xf32>
    %107 = math.tanh %106 : vector<8x128xf32>
    %108 = vector.extract_strided_slice %93 {offsets = [0, 384], sizes = [8, 128], strides = [1, 1]} : vector<8x512xf32> to vector<8x128xf32>
    %109 = arith.negf %108 : vector<8x128xf32>
    %110 = math.exp %109 : vector<8x128xf32>
    %cst_51 = arith.constant 1.000000e+00 : f32
    %111 = vector.broadcast %cst_51 : f32 to vector<8x128xf32>
    %112 = arith.addf %111, %110 : vector<8x128xf32>
    %113 = arith.divf %111, %112 : vector<8x128xf32>
    %c0_52 = arith.constant 0 : index
    %c0_53 = arith.constant 0 : index
    %114 = vector.load %arg8[%c0_52, %c0_53] : memref<8x128xf32, #tpu.memory_space<vmem>>, vector<8x128xf32>
    %115 = arith.mulf %105, %114 : vector<8x128xf32>
    %116 = arith.mulf %99, %107 : vector<8x128xf32>
    %117 = arith.addf %115, %116 : vector<8x128xf32>
    %118 = math.tanh %117 : vector<8x128xf32>
    %119 = arith.mulf %113, %118 : vector<8x128xf32>
    %c0_54 = arith.constant 0 : index
    %c0_55 = arith.constant 0 : index
    %120 = vector.load %arg8[%c0_54, %c0_55] : memref<8x128xf32, #tpu.memory_space<vmem>>, vector<8x128xf32>
    tpu.vector_store %arg8[%c0_54, %c0_55], %117 {strides = array<i32>} : memref<8x128xf32, #tpu.memory_space<vmem>>, vector<8x128xf32>,
    %c0_56 = arith.constant 0 : index
    %c0_57 = arith.constant 0 : index
    %121 = vector.load %arg7[%c0_56, %c0_57] : memref<8x128xf32, #tpu.memory_space<vmem>>, vector<8x128xf32>
    tpu.vector_store %arg7[%c0_56, %c0_57], %119 {strides = array<i32>} : memref<8x128xf32, #tpu.memory_space<vmem>>, vector<8x128xf32>,
    %122 = arith.index_cast %87 : i32 to index
    %c0_58 = arith.constant 0 : index
    %123 = vector.load %arg5[%122, %c0_58] : memref<64x128xf32, #tpu.memory_space<vmem>>, vector<8x128xf32>
    tpu.vector_store %arg5[%122, %c0_58], %119 {strides = array<i32>} : memref<64x128xf32, #tpu.memory_space<vmem>>, vector<8x128xf32>,
    %c3_i32 = arith.constant 3 : i32
    %c8_i32_59 = arith.constant 8 : i32
    %124 = arith.muli %c3_i32, %c8_i32_59 : i32
    %125 = tpu.assume_multiple %124, 8 : i32
    %126 = arith.index_cast %125 : i32 to index
    %c0_60 = arith.constant 0 : index
    %127 = vector.load %arg6[%126, %c0_60] : memref<64x512xf32, #tpu.memory_space<vmem>>, vector<8x512xf32>
    %c0_61 = arith.constant 0 : index
    %c0_62 = arith.constant 0 : index
    %128 = vector.load %arg7[%c0_61, %c0_62] : memref<8x128xf32, #tpu.memory_space<vmem>>, vector<8x128xf32>
    %c0_63 = arith.constant 0 : index
    %c0_64 = arith.constant 0 : index
    %129 = vector.load %arg4[%c0_63, %c0_64] : memref<128x512xf32, #tpu.memory_space<vmem>>, vector<128x512xf32>
    %cst_65 = arith.constant dense<0.000000e+00> : vector<8x512xf32>
    %130 = tpu.matmul %128, %129, %cst_65 {dimension_numbers = #tpu.dot_dimension_numbers<[1], [0], [0], [1], [0, 0, 1, 1], [], []>} : vector<8x128xf32>, vector<128x512xf32>, vector<8x512xf32> -> vector<8x512xf32>
    %131 = arith.addf %127, %130 : vector<8x512xf32>
    %132 = vector.extract_strided_slice %131 {offsets = [0, 0], sizes = [8, 128], strides = [1, 1]} : vector<8x512xf32> to vector<8x128xf32>
    %133 = arith.negf %132 : vector<8x128xf32>
    %134 = math.exp %133 : vector<8x128xf32>
    %cst_66 = arith.constant 1.000000e+00 : f32
    %135 = vector.broadcast %cst_66 : f32 to vector<8x128xf32>
    %136 = arith.addf %135, %134 : vector<8x128xf32>
    %137 = arith.divf %135, %136 : vector<8x128xf32>
    %138 = vector.extract_strided_slice %131 {offsets = [0, 128], sizes = [8, 128], strides = [1, 1]} : vector<8x512xf32> to vector<8x128xf32>
    %139 = arith.negf %138 : vector<8x128xf32>
    %140 = math.exp %139 : vector<8x128xf32>
    %cst_67 = arith.constant 1.000000e+00 : f32
    %141 = vector.broadcast %cst_67 : f32 to vector<8x128xf32>
    %142 = arith.addf %141, %140 : vector<8x128xf32>
    %143 = arith.divf %141, %142 : vector<8x128xf32>
    %144 = vector.extract_strided_slice %131 {offsets = [0, 256], sizes = [8, 128], strides = [1, 1]} : vector<8x512xf32> to vector<8x128xf32>
    %145 = math.tanh %144 : vector<8x128xf32>
    %146 = vector.extract_strided_slice %131 {offsets = [0, 384], sizes = [8, 128], strides = [1, 1]} : vector<8x512xf32> to vector<8x128xf32>
    %147 = arith.negf %146 : vector<8x128xf32>
    %148 = math.exp %147 : vector<8x128xf32>
    %cst_68 = arith.constant 1.000000e+00 : f32
    %149 = vector.broadcast %cst_68 : f32 to vector<8x128xf32>
    %150 = arith.addf %149, %148 : vector<8x128xf32>
    %151 = arith.divf %149, %150 : vector<8x128xf32>
    %c0_69 = arith.constant 0 : index
    %c0_70 = arith.constant 0 : index
    %152 = vector.load %arg8[%c0_69, %c0_70] : memref<8x128xf32, #tpu.memory_space<vmem>>, vector<8x128xf32>
    %153 = arith.mulf %143, %152 : vector<8x128xf32>
    %154 = arith.mulf %137, %145 : vector<8x128xf32>
    %155 = arith.addf %153, %154 : vector<8x128xf32>
    %156 = math.tanh %155 : vector<8x128xf32>
    %157 = arith.mulf %151, %156 : vector<8x128xf32>
    %c0_71 = arith.constant 0 : index
    %c0_72 = arith.constant 0 : index
    %158 = vector.load %arg8[%c0_71, %c0_72] : memref<8x128xf32, #tpu.memory_space<vmem>>, vector<8x128xf32>
    tpu.vector_store %arg8[%c0_71, %c0_72], %155 {strides = array<i32>} : memref<8x128xf32, #tpu.memory_space<vmem>>, vector<8x128xf32>,
    %c0_73 = arith.constant 0 : index
    %c0_74 = arith.constant 0 : index
    %159 = vector.load %arg7[%c0_73, %c0_74] : memref<8x128xf32, #tpu.memory_space<vmem>>, vector<8x128xf32>
    tpu.vector_store %arg7[%c0_73, %c0_74], %157 {strides = array<i32>} : memref<8x128xf32, #tpu.memory_space<vmem>>, vector<8x128xf32>,
    %160 = arith.index_cast %125 : i32 to index
    %c0_75 = arith.constant 0 : index
    %161 = vector.load %arg5[%160, %c0_75] : memref<64x128xf32, #tpu.memory_space<vmem>>, vector<8x128xf32>
    tpu.vector_store %arg5[%160, %c0_75], %157 {strides = array<i32>} : memref<64x128xf32, #tpu.memory_space<vmem>>, vector<8x128xf32>,
    %c4_i32 = arith.constant 4 : i32
    %c8_i32_76 = arith.constant 8 : i32
    %162 = arith.muli %c4_i32, %c8_i32_76 : i32
    %163 = tpu.assume_multiple %162, 8 : i32
    %164 = arith.index_cast %163 : i32 to index
    %c0_77 = arith.constant 0 : index
    %165 = vector.load %arg6[%164, %c0_77] : memref<64x512xf32, #tpu.memory_space<vmem>>, vector<8x512xf32>
    %c0_78 = arith.constant 0 : index
    %c0_79 = arith.constant 0 : index
    %166 = vector.load %arg7[%c0_78, %c0_79] : memref<8x128xf32, #tpu.memory_space<vmem>>, vector<8x128xf32>
    %c0_80 = arith.constant 0 : index
    %c0_81 = arith.constant 0 : index
    %167 = vector.load %arg4[%c0_80, %c0_81] : memref<128x512xf32, #tpu.memory_space<vmem>>, vector<128x512xf32>
    %cst_82 = arith.constant dense<0.000000e+00> : vector<8x512xf32>
    %168 = tpu.matmul %166, %167, %cst_82 {dimension_numbers = #tpu.dot_dimension_numbers<[1], [0], [0], [1], [0, 0, 1, 1], [], []>} : vector<8x128xf32>, vector<128x512xf32>, vector<8x512xf32> -> vector<8x512xf32>
    %169 = arith.addf %165, %168 : vector<8x512xf32>
    %170 = vector.extract_strided_slice %169 {offsets = [0, 0], sizes = [8, 128], strides = [1, 1]} : vector<8x512xf32> to vector<8x128xf32>
    %171 = arith.negf %170 : vector<8x128xf32>
    %172 = math.exp %171 : vector<8x128xf32>
    %cst_83 = arith.constant 1.000000e+00 : f32
    %173 = vector.broadcast %cst_83 : f32 to vector<8x128xf32>
    %174 = arith.addf %173, %172 : vector<8x128xf32>
    %175 = arith.divf %173, %174 : vector<8x128xf32>
    %176 = vector.extract_strided_slice %169 {offsets = [0, 128], sizes = [8, 128], strides = [1, 1]} : vector<8x512xf32> to vector<8x128xf32>
    %177 = arith.negf %176 : vector<8x128xf32>
    %178 = math.exp %177 : vector<8x128xf32>
    %cst_84 = arith.constant 1.000000e+00 : f32
    %179 = vector.broadcast %cst_84 : f32 to vector<8x128xf32>
    %180 = arith.addf %179, %178 : vector<8x128xf32>
    %181 = arith.divf %179, %180 : vector<8x128xf32>
    %182 = vector.extract_strided_slice %169 {offsets = [0, 256], sizes = [8, 128], strides = [1, 1]} : vector<8x512xf32> to vector<8x128xf32>
    %183 = math.tanh %182 : vector<8x128xf32>
    %184 = vector.extract_strided_slice %169 {offsets = [0, 384], sizes = [8, 128], strides = [1, 1]} : vector<8x512xf32> to vector<8x128xf32>
    %185 = arith.negf %184 : vector<8x128xf32>
    %186 = math.exp %185 : vector<8x128xf32>
    %cst_85 = arith.constant 1.000000e+00 : f32
    %187 = vector.broadcast %cst_85 : f32 to vector<8x128xf32>
    %188 = arith.addf %187, %186 : vector<8x128xf32>
    %189 = arith.divf %187, %188 : vector<8x128xf32>
    %c0_86 = arith.constant 0 : index
    %c0_87 = arith.constant 0 : index
    %190 = vector.load %arg8[%c0_86, %c0_87] : memref<8x128xf32, #tpu.memory_space<vmem>>, vector<8x128xf32>
    %191 = arith.mulf %181, %190 : vector<8x128xf32>
    %192 = arith.mulf %175, %183 : vector<8x128xf32>
    %193 = arith.addf %191, %192 : vector<8x128xf32>
    %194 = math.tanh %193 : vector<8x128xf32>
    %195 = arith.mulf %189, %194 : vector<8x128xf32>
    %c0_88 = arith.constant 0 : index
    %c0_89 = arith.constant 0 : index
    %196 = vector.load %arg8[%c0_88, %c0_89] : memref<8x128xf32, #tpu.memory_space<vmem>>, vector<8x128xf32>
    tpu.vector_store %arg8[%c0_88, %c0_89], %193 {strides = array<i32>} : memref<8x128xf32, #tpu.memory_space<vmem>>, vector<8x128xf32>,
    %c0_90 = arith.constant 0 : index
    %c0_91 = arith.constant 0 : index
    %197 = vector.load %arg7[%c0_90, %c0_91] : memref<8x128xf32, #tpu.memory_space<vmem>>, vector<8x128xf32>
    tpu.vector_store %arg7[%c0_90, %c0_91], %195 {strides = array<i32>} : memref<8x128xf32, #tpu.memory_space<vmem>>, vector<8x128xf32>,
    %198 = arith.index_cast %163 : i32 to index
    %c0_92 = arith.constant 0 : index
    %199 = vector.load %arg5[%198, %c0_92] : memref<64x128xf32, #tpu.memory_space<vmem>>, vector<8x128xf32>
    tpu.vector_store %arg5[%198, %c0_92], %195 {strides = array<i32>} : memref<64x128xf32, #tpu.memory_space<vmem>>, vector<8x128xf32>,
    %c5_i32 = arith.constant 5 : i32
    %c8_i32_93 = arith.constant 8 : i32
    %200 = arith.muli %c5_i32, %c8_i32_93 : i32
    %201 = tpu.assume_multiple %200, 8 : i32
    %202 = arith.index_cast %201 : i32 to index
    %c0_94 = arith.constant 0 : index
    %203 = vector.load %arg6[%202, %c0_94] : memref<64x512xf32, #tpu.memory_space<vmem>>, vector<8x512xf32>
    %c0_95 = arith.constant 0 : index
    %c0_96 = arith.constant 0 : index
    %204 = vector.load %arg7[%c0_95, %c0_96] : memref<8x128xf32, #tpu.memory_space<vmem>>, vector<8x128xf32>
    %c0_97 = arith.constant 0 : index
    %c0_98 = arith.constant 0 : index
    %205 = vector.load %arg4[%c0_97, %c0_98] : memref<128x512xf32, #tpu.memory_space<vmem>>, vector<128x512xf32>
    %cst_99 = arith.constant dense<0.000000e+00> : vector<8x512xf32>
    %206 = tpu.matmul %204, %205, %cst_99 {dimension_numbers = #tpu.dot_dimension_numbers<[1], [0], [0], [1], [0, 0, 1, 1], [], []>} : vector<8x128xf32>, vector<128x512xf32>, vector<8x512xf32> -> vector<8x512xf32>
    %207 = arith.addf %203, %206 : vector<8x512xf32>
    %208 = vector.extract_strided_slice %207 {offsets = [0, 0], sizes = [8, 128], strides = [1, 1]} : vector<8x512xf32> to vector<8x128xf32>
    %209 = arith.negf %208 : vector<8x128xf32>
    %210 = math.exp %209 : vector<8x128xf32>
    %cst_100 = arith.constant 1.000000e+00 : f32
    %211 = vector.broadcast %cst_100 : f32 to vector<8x128xf32>
    %212 = arith.addf %211, %210 : vector<8x128xf32>
    %213 = arith.divf %211, %212 : vector<8x128xf32>
    %214 = vector.extract_strided_slice %207 {offsets = [0, 128], sizes = [8, 128], strides = [1, 1]} : vector<8x512xf32> to vector<8x128xf32>
    %215 = arith.negf %214 : vector<8x128xf32>
    %216 = math.exp %215 : vector<8x128xf32>
    %cst_101 = arith.constant 1.000000e+00 : f32
    %217 = vector.broadcast %cst_101 : f32 to vector<8x128xf32>
    %218 = arith.addf %217, %216 : vector<8x128xf32>
    %219 = arith.divf %217, %218 : vector<8x128xf32>
    %220 = vector.extract_strided_slice %207 {offsets = [0, 256], sizes = [8, 128], strides = [1, 1]} : vector<8x512xf32> to vector<8x128xf32>
    %221 = math.tanh %220 : vector<8x128xf32>
    %222 = vector.extract_strided_slice %207 {offsets = [0, 384], sizes = [8, 128], strides = [1, 1]} : vector<8x512xf32> to vector<8x128xf32>
    %223 = arith.negf %222 : vector<8x128xf32>
    %224 = math.exp %223 : vector<8x128xf32>
    %cst_102 = arith.constant 1.000000e+00 : f32
    %225 = vector.broadcast %cst_102 : f32 to vector<8x128xf32>
    %226 = arith.addf %225, %224 : vector<8x128xf32>
    %227 = arith.divf %225, %226 : vector<8x128xf32>
    %c0_103 = arith.constant 0 : index
    %c0_104 = arith.constant 0 : index
    %228 = vector.load %arg8[%c0_103, %c0_104] : memref<8x128xf32, #tpu.memory_space<vmem>>, vector<8x128xf32>
    %229 = arith.mulf %219, %228 : vector<8x128xf32>
    %230 = arith.mulf %213, %221 : vector<8x128xf32>
    %231 = arith.addf %229, %230 : vector<8x128xf32>
    %232 = math.tanh %231 : vector<8x128xf32>
    %233 = arith.mulf %227, %232 : vector<8x128xf32>
    %c0_105 = arith.constant 0 : index
    %c0_106 = arith.constant 0 : index
    %234 = vector.load %arg8[%c0_105, %c0_106] : memref<8x128xf32, #tpu.memory_space<vmem>>, vector<8x128xf32>
    tpu.vector_store %arg8[%c0_105, %c0_106], %231 {strides = array<i32>} : memref<8x128xf32, #tpu.memory_space<vmem>>, vector<8x128xf32>,
    %c0_107 = arith.constant 0 : index
    %c0_108 = arith.constant 0 : index
    %235 = vector.load %arg7[%c0_107, %c0_108] : memref<8x128xf32, #tpu.memory_space<vmem>>, vector<8x128xf32>
    tpu.vector_store %arg7[%c0_107, %c0_108], %233 {strides = array<i32>} : memref<8x128xf32, #tpu.memory_space<vmem>>, vector<8x128xf32>,
    %236 = arith.index_cast %201 : i32 to index
    %c0_109 = arith.constant 0 : index
    %237 = vector.load %arg5[%236, %c0_109] : memref<64x128xf32, #tpu.memory_space<vmem>>, vector<8x128xf32>
    tpu.vector_store %arg5[%236, %c0_109], %233 {strides = array<i32>} : memref<64x128xf32, #tpu.memory_space<vmem>>, vector<8x128xf32>,
    %c6_i32 = arith.constant 6 : i32
    %c8_i32_110 = arith.constant 8 : i32
    %238 = arith.muli %c6_i32, %c8_i32_110 : i32
    %239 = tpu.assume_multiple %238, 8 : i32
    %240 = arith.index_cast %239 : i32 to index
    %c0_111 = arith.constant 0 : index
    %241 = vector.load %arg6[%240, %c0_111] : memref<64x512xf32, #tpu.memory_space<vmem>>, vector<8x512xf32>
    %c0_112 = arith.constant 0 : index
    %c0_113 = arith.constant 0 : index
    %242 = vector.load %arg7[%c0_112, %c0_113] : memref<8x128xf32, #tpu.memory_space<vmem>>, vector<8x128xf32>
    %c0_114 = arith.constant 0 : index
    %c0_115 = arith.constant 0 : index
    %243 = vector.load %arg4[%c0_114, %c0_115] : memref<128x512xf32, #tpu.memory_space<vmem>>, vector<128x512xf32>
    %cst_116 = arith.constant dense<0.000000e+00> : vector<8x512xf32>
    %244 = tpu.matmul %242, %243, %cst_116 {dimension_numbers = #tpu.dot_dimension_numbers<[1], [0], [0], [1], [0, 0, 1, 1], [], []>} : vector<8x128xf32>, vector<128x512xf32>, vector<8x512xf32> -> vector<8x512xf32>
    %245 = arith.addf %241, %244 : vector<8x512xf32>
    %246 = vector.extract_strided_slice %245 {offsets = [0, 0], sizes = [8, 128], strides = [1, 1]} : vector<8x512xf32> to vector<8x128xf32>
    %247 = arith.negf %246 : vector<8x128xf32>
    %248 = math.exp %247 : vector<8x128xf32>
    %cst_117 = arith.constant 1.000000e+00 : f32
    %249 = vector.broadcast %cst_117 : f32 to vector<8x128xf32>
    %250 = arith.addf %249, %248 : vector<8x128xf32>
    %251 = arith.divf %249, %250 : vector<8x128xf32>
    %252 = vector.extract_strided_slice %245 {offsets = [0, 128], sizes = [8, 128], strides = [1, 1]} : vector<8x512xf32> to vector<8x128xf32>
    %253 = arith.negf %252 : vector<8x128xf32>
    %254 = math.exp %253 : vector<8x128xf32>
    %cst_118 = arith.constant 1.000000e+00 : f32
    %255 = vector.broadcast %cst_118 : f32 to vector<8x128xf32>
    %256 = arith.addf %255, %254 : vector<8x128xf32>
    %257 = arith.divf %255, %256 : vector<8x128xf32>
    %258 = vector.extract_strided_slice %245 {offsets = [0, 256], sizes = [8, 128], strides = [1, 1]} : vector<8x512xf32> to vector<8x128xf32>
    %259 = math.tanh %258 : vector<8x128xf32>
    %260 = vector.extract_strided_slice %245 {offsets = [0, 384], sizes = [8, 128], strides = [1, 1]} : vector<8x512xf32> to vector<8x128xf32>
    %261 = arith.negf %260 : vector<8x128xf32>
    %262 = math.exp %261 : vector<8x128xf32>
    %cst_119 = arith.constant 1.000000e+00 : f32
    %263 = vector.broadcast %cst_119 : f32 to vector<8x128xf32>
    %264 = arith.addf %263, %262 : vector<8x128xf32>
    %265 = arith.divf %263, %264 : vector<8x128xf32>
    %c0_120 = arith.constant 0 : index
    %c0_121 = arith.constant 0 : index
    %266 = vector.load %arg8[%c0_120, %c0_121] : memref<8x128xf32, #tpu.memory_space<vmem>>, vector<8x128xf32>
    %267 = arith.mulf %257, %266 : vector<8x128xf32>
    %268 = arith.mulf %251, %259 : vector<8x128xf32>
    %269 = arith.addf %267, %268 : vector<8x128xf32>
    %270 = math.tanh %269 : vector<8x128xf32>
    %271 = arith.mulf %265, %270 : vector<8x128xf32>
    %c0_122 = arith.constant 0 : index
    %c0_123 = arith.constant 0 : index
    %272 = vector.load %arg8[%c0_122, %c0_123] : memref<8x128xf32, #tpu.memory_space<vmem>>, vector<8x128xf32>
    tpu.vector_store %arg8[%c0_122, %c0_123], %269 {strides = array<i32>} : memref<8x128xf32, #tpu.memory_space<vmem>>, vector<8x128xf32>,
    %c0_124 = arith.constant 0 : index
    %c0_125 = arith.constant 0 : index
    %273 = vector.load %arg7[%c0_124, %c0_125] : memref<8x128xf32, #tpu.memory_space<vmem>>, vector<8x128xf32>
    tpu.vector_store %arg7[%c0_124, %c0_125], %271 {strides = array<i32>} : memref<8x128xf32, #tpu.memory_space<vmem>>, vector<8x128xf32>,
    %274 = arith.index_cast %239 : i32 to index
    %c0_126 = arith.constant 0 : index
    %275 = vector.load %arg5[%274, %c0_126] : memref<64x128xf32, #tpu.memory_space<vmem>>, vector<8x128xf32>
    tpu.vector_store %arg5[%274, %c0_126], %271 {strides = array<i32>} : memref<64x128xf32, #tpu.memory_space<vmem>>, vector<8x128xf32>,
    %c7_i32 = arith.constant 7 : i32
    %c8_i32_127 = arith.constant 8 : i32
    %276 = arith.muli %c7_i32, %c8_i32_127 : i32
    %277 = tpu.assume_multiple %276, 8 : i32
    %278 = arith.index_cast %277 : i32 to index
    %c0_128 = arith.constant 0 : index
    %279 = vector.load %arg6[%278, %c0_128] : memref<64x512xf32, #tpu.memory_space<vmem>>, vector<8x512xf32>
    %c0_129 = arith.constant 0 : index
    %c0_130 = arith.constant 0 : index
    %280 = vector.load %arg7[%c0_129, %c0_130] : memref<8x128xf32, #tpu.memory_space<vmem>>, vector<8x128xf32>
    %c0_131 = arith.constant 0 : index
    %c0_132 = arith.constant 0 : index
    %281 = vector.load %arg4[%c0_131, %c0_132] : memref<128x512xf32, #tpu.memory_space<vmem>>, vector<128x512xf32>
    %cst_133 = arith.constant dense<0.000000e+00> : vector<8x512xf32>
    %282 = tpu.matmul %280, %281, %cst_133 {dimension_numbers = #tpu.dot_dimension_numbers<[1], [0], [0], [1], [0, 0, 1, 1], [], []>} : vector<8x128xf32>, vector<128x512xf32>, vector<8x512xf32> -> vector<8x512xf32>
    %283 = arith.addf %279, %282 : vector<8x512xf32>
    %284 = vector.extract_strided_slice %283 {offsets = [0, 0], sizes = [8, 128], strides = [1, 1]} : vector<8x512xf32> to vector<8x128xf32>
    %285 = arith.negf %284 : vector<8x128xf32>
    %286 = math.exp %285 : vector<8x128xf32>
    %cst_134 = arith.constant 1.000000e+00 : f32
    %287 = vector.broadcast %cst_134 : f32 to vector<8x128xf32>
    %288 = arith.addf %287, %286 : vector<8x128xf32>
    %289 = arith.divf %287, %288 : vector<8x128xf32>
    %290 = vector.extract_strided_slice %283 {offsets = [0, 128], sizes = [8, 128], strides = [1, 1]} : vector<8x512xf32> to vector<8x128xf32>
    %291 = arith.negf %290 : vector<8x128xf32>
    %292 = math.exp %291 : vector<8x128xf32>
    %cst_135 = arith.constant 1.000000e+00 : f32
    %293 = vector.broadcast %cst_135 : f32 to vector<8x128xf32>
    %294 = arith.addf %293, %292 : vector<8x128xf32>
    %295 = arith.divf %293, %294 : vector<8x128xf32>
    %296 = vector.extract_strided_slice %283 {offsets = [0, 256], sizes = [8, 128], strides = [1, 1]} : vector<8x512xf32> to vector<8x128xf32>
    %297 = math.tanh %296 : vector<8x128xf32>
    %298 = vector.extract_strided_slice %283 {offsets = [0, 384], sizes = [8, 128], strides = [1, 1]} : vector<8x512xf32> to vector<8x128xf32>
    %299 = arith.negf %298 : vector<8x128xf32>
    %300 = math.exp %299 : vector<8x128xf32>
    %cst_136 = arith.constant 1.000000e+00 : f32
    %301 = vector.broadcast %cst_136 : f32 to vector<8x128xf32>
    %302 = arith.addf %301, %300 : vector<8x128xf32>
    %303 = arith.divf %301, %302 : vector<8x128xf32>
    %c0_137 = arith.constant 0 : index
    %c0_138 = arith.constant 0 : index
    %304 = vector.load %arg8[%c0_137, %c0_138] : memref<8x128xf32, #tpu.memory_space<vmem>>, vector<8x128xf32>
    %305 = arith.mulf %295, %304 : vector<8x128xf32>
    %306 = arith.mulf %289, %297 : vector<8x128xf32>
    %307 = arith.addf %305, %306 : vector<8x128xf32>
    %308 = math.tanh %307 : vector<8x128xf32>
    %309 = arith.mulf %303, %308 : vector<8x128xf32>
    %c0_139 = arith.constant 0 : index
    %c0_140 = arith.constant 0 : index
    %310 = vector.load %arg8[%c0_139, %c0_140] : memref<8x128xf32, #tpu.memory_space<vmem>>, vector<8x128xf32>
    tpu.vector_store %arg8[%c0_139, %c0_140], %307 {strides = array<i32>} : memref<8x128xf32, #tpu.memory_space<vmem>>, vector<8x128xf32>,
    %c0_141 = arith.constant 0 : index
    %c0_142 = arith.constant 0 : index
    %311 = vector.load %arg7[%c0_141, %c0_142] : memref<8x128xf32, #tpu.memory_space<vmem>>, vector<8x128xf32>
    tpu.vector_store %arg7[%c0_141, %c0_142], %309 {strides = array<i32>} : memref<8x128xf32, #tpu.memory_space<vmem>>, vector<8x128xf32>,
    %312 = arith.index_cast %277 : i32 to index
    %c0_143 = arith.constant 0 : index
    %313 = vector.load %arg5[%312, %c0_143] : memref<64x128xf32, #tpu.memory_space<vmem>>, vector<8x128xf32>
    tpu.vector_store %arg5[%312, %c0_143], %309 {strides = array<i32>} : memref<64x128xf32, #tpu.memory_space<vmem>>, vector<8x128xf32>,
    %c8_i32_144 = arith.constant 8 : i32
    return
  }
  func.func @transform_0(%arg0: i32) -> (i32, i32) {
    %c0_i32 = arith.constant 0 : i32
    %c0_i32_0 = arith.constant 0 : i32
    return %arg0, %c0_i32 : i32, i32
  }
  func.func @transform_1(%arg0: i32) -> (i32, i32) {
    %c0_i32 = arith.constant 0 : i32
    %c0_i32_0 = arith.constant 0 : i32
    %c0_i32_1 = arith.constant 0 : i32
    return %c0_i32, %c0_i32_0 : i32, i32
  }
  func.func @transform_2(%arg0: i32) -> (i32, i32) {
    %c0_i32 = arith.constant 0 : i32
    %c0_i32_0 = arith.constant 0 : i32
    %c0_i32_1 = arith.constant 0 : i32
    return %c0_i32, %c0_i32_0 : i32, i32
  }
  func.func @transform_3(%arg0: i32) -> (i32, i32) {
    %c0_i32 = arith.constant 0 : i32
    %c0_i32_0 = arith.constant 0 : i32
    %c0_i32_1 = arith.constant 0 : i32
    return %c0_i32, %c0_i32_0 : i32, i32
  }
  func.func @transform_4(%arg0: i32) -> (i32, i32) {
    %c0_i32 = arith.constant 0 : i32
    %c0_i32_0 = arith.constant 0 : i32
    return %arg0, %c0_i32 : i32, i32
  }
}

module attributes {stable_mosaic.version = 11 : i64} {
  func.func @_lstm_layer_kernel(%arg0: i32, %arg1: memref<64x128xf32, #tpu.memory_space<vmem>>, %arg2: memref<128x512xf32, #tpu.memory_space<vmem>>, %arg3: memref<1x512xf32, #tpu.memory_space<vmem>>, %arg4: memref<128x512xf32, #tpu.memory_space<vmem>>, %arg5: memref<128x128xf32, #tpu.memory_space<vmem>>, %arg6: memref<1x128xf32, #tpu.memory_space<vmem>>, %arg7: memref<64x128xf32, #tpu.memory_space<vmem>>, %arg8: memref<64x512xf32, #tpu.memory_space<vmem>>, %arg9: memref<8x128xf32, #tpu.memory_space<vmem>>, %arg10: memref<8x128xf32, #tpu.memory_space<vmem>>, %arg11: memref<64x128xf32, #tpu.memory_space<vmem>>) attributes {dimension_semantics = [#tpu.dimension_semantics<arbitrary>], iteration_bounds = array<i64: 1>, scalar_prefetch = 0 : i64, scratch_operands = 4 : i64, tpu.core_type = #tpu.core_type<tc>, window_params = [{transform_indices = @transform_0, window_bounds = array<i64: 64, 128>}, {pipeline_mode = #tpu.pipeline_mode<synchronous>, transform_indices = @transform_1, window_bounds = array<i64: 128, 512>}, {pipeline_mode = #tpu.pipeline_mode<synchronous>, transform_indices = @transform_2, window_bounds = array<i64: 1, 512>}, {pipeline_mode = #tpu.pipeline_mode<synchronous>, transform_indices = @transform_3, window_bounds = array<i64: 128, 512>}, {pipeline_mode = #tpu.pipeline_mode<synchronous>, transform_indices = @transform_4, window_bounds = array<i64: 128, 128>}, {pipeline_mode = #tpu.pipeline_mode<synchronous>, transform_indices = @transform_5, window_bounds = array<i64: 1, 128>}, {transform_indices = @transform_6, window_bounds = array<i64: 64, 128>}]} {
    %c0_i32 = arith.constant 0 : i32
    %0 = arith.cmpi eq, %arg0, %c0_i32 : i32
    %1 = arith.extui %0 : i1 to i32
    %c0_i32_0 = arith.constant 0 : i32
    %2 = arith.cmpi ne, %1, %c0_i32_0 : i32
    scf.if %2 {
      %cst_154 = arith.constant 0.000000e+00 : f32
      %321 = vector.broadcast %cst_154 : f32 to vector<8x128xf32>
      %c0_155 = arith.constant 0 : index
      %c0_156 = arith.constant 0 : index
      %322 = vector.load %arg9[%c0_155, %c0_156] : memref<8x128xf32, #tpu.memory_space<vmem>>, vector<8x128xf32>
      tpu.vector_store %arg9[%c0_155, %c0_156], %321 {strides = array<i32>} : memref<8x128xf32, #tpu.memory_space<vmem>>, vector<8x128xf32>,
      %cst_157 = arith.constant 0.000000e+00 : f32
      %323 = vector.broadcast %cst_157 : f32 to vector<8x128xf32>
      %c0_158 = arith.constant 0 : index
      %c0_159 = arith.constant 0 : index
      %324 = vector.load %arg10[%c0_158, %c0_159] : memref<8x128xf32, #tpu.memory_space<vmem>>, vector<8x128xf32>
      tpu.vector_store %arg10[%c0_158, %c0_159], %323 {strides = array<i32>} : memref<8x128xf32, #tpu.memory_space<vmem>>, vector<8x128xf32>,
    } else {
    }
    %c0 = arith.constant 0 : index
    %c0_1 = arith.constant 0 : index
    %3 = vector.load %arg1[%c0, %c0_1] : memref<64x128xf32, #tpu.memory_space<vmem>>, vector<64x128xf32>
    %c0_2 = arith.constant 0 : index
    %c0_3 = arith.constant 0 : index
    %4 = vector.load %arg2[%c0_2, %c0_3] : memref<128x512xf32, #tpu.memory_space<vmem>>, vector<128x512xf32>
    %cst = arith.constant dense<0.000000e+00> : vector<64x512xf32>
    %5 = tpu.matmul %3, %4, %cst {dimension_numbers = #tpu.dot_dimension_numbers<[1], [0], [0], [1], [0, 0, 1, 1], [], []>} : vector<64x128xf32>, vector<128x512xf32>, vector<64x512xf32> -> vector<64x512xf32>
    %c0_4 = arith.constant 0 : index
    %c0_5 = arith.constant 0 : index
    %6 = vector.load %arg3[%c0_4, %c0_5] : memref<1x512xf32, #tpu.memory_space<vmem>>, vector<1x512xf32>
    %7 = vector.broadcast %6 : vector<1x512xf32> to vector<64x512xf32>
    %8 = arith.addf %5, %7 : vector<64x512xf32>
    %c0_6 = arith.constant 0 : index
    %c0_7 = arith.constant 0 : index
    %9 = vector.load %arg8[%c0_6, %c0_7] : memref<64x512xf32, #tpu.memory_space<vmem>>, vector<64x512xf32>
    tpu.vector_store %arg8[%c0_6, %c0_7], %8 {strides = array<i32>} : memref<64x512xf32, #tpu.memory_space<vmem>>, vector<64x512xf32>,
    %c0_i32_8 = arith.constant 0 : i32
    %c8_i32 = arith.constant 8 : i32
    %10 = arith.muli %c0_i32_8, %c8_i32 : i32
    %11 = tpu.assume_multiple %10, 8 : i32
    %12 = arith.index_cast %11 : i32 to index
    %c0_9 = arith.constant 0 : index
    %13 = vector.load %arg8[%12, %c0_9] : memref<64x512xf32, #tpu.memory_space<vmem>>, vector<8x512xf32>
    %c0_10 = arith.constant 0 : index
    %c0_11 = arith.constant 0 : index
    %14 = vector.load %arg9[%c0_10, %c0_11] : memref<8x128xf32, #tpu.memory_space<vmem>>, vector<8x128xf32>
    %c0_12 = arith.constant 0 : index
    %c0_13 = arith.constant 0 : index
    %15 = vector.load %arg4[%c0_12, %c0_13] : memref<128x512xf32, #tpu.memory_space<vmem>>, vector<128x512xf32>
    %cst_14 = arith.constant dense<0.000000e+00> : vector<8x512xf32>
    %16 = tpu.matmul %14, %15, %cst_14 {dimension_numbers = #tpu.dot_dimension_numbers<[1], [0], [0], [1], [0, 0, 1, 1], [], []>} : vector<8x128xf32>, vector<128x512xf32>, vector<8x512xf32> -> vector<8x512xf32>
    %17 = arith.addf %13, %16 : vector<8x512xf32>
    %18 = vector.extract_strided_slice %17 {offsets = [0, 0], sizes = [8, 128], strides = [1, 1]} : vector<8x512xf32> to vector<8x128xf32>
    %19 = arith.negf %18 : vector<8x128xf32>
    %20 = math.exp %19 : vector<8x128xf32>
    %cst_15 = arith.constant 1.000000e+00 : f32
    %21 = vector.broadcast %cst_15 : f32 to vector<8x128xf32>
    %22 = arith.addf %21, %20 : vector<8x128xf32>
    %23 = arith.divf %21, %22 : vector<8x128xf32>
    %24 = vector.extract_strided_slice %17 {offsets = [0, 128], sizes = [8, 128], strides = [1, 1]} : vector<8x512xf32> to vector<8x128xf32>
    %25 = arith.negf %24 : vector<8x128xf32>
    %26 = math.exp %25 : vector<8x128xf32>
    %cst_16 = arith.constant 1.000000e+00 : f32
    %27 = vector.broadcast %cst_16 : f32 to vector<8x128xf32>
    %28 = arith.addf %27, %26 : vector<8x128xf32>
    %29 = arith.divf %27, %28 : vector<8x128xf32>
    %30 = vector.extract_strided_slice %17 {offsets = [0, 256], sizes = [8, 128], strides = [1, 1]} : vector<8x512xf32> to vector<8x128xf32>
    %31 = math.tanh %30 : vector<8x128xf32>
    %32 = vector.extract_strided_slice %17 {offsets = [0, 384], sizes = [8, 128], strides = [1, 1]} : vector<8x512xf32> to vector<8x128xf32>
    %33 = arith.negf %32 : vector<8x128xf32>
    %34 = math.exp %33 : vector<8x128xf32>
    %cst_17 = arith.constant 1.000000e+00 : f32
    %35 = vector.broadcast %cst_17 : f32 to vector<8x128xf32>
    %36 = arith.addf %35, %34 : vector<8x128xf32>
    %37 = arith.divf %35, %36 : vector<8x128xf32>
    %c0_18 = arith.constant 0 : index
    %c0_19 = arith.constant 0 : index
    %38 = vector.load %arg10[%c0_18, %c0_19] : memref<8x128xf32, #tpu.memory_space<vmem>>, vector<8x128xf32>
    %39 = arith.mulf %29, %38 : vector<8x128xf32>
    %40 = arith.mulf %23, %31 : vector<8x128xf32>
    %41 = arith.addf %39, %40 : vector<8x128xf32>
    %42 = math.tanh %41 : vector<8x128xf32>
    %43 = arith.mulf %37, %42 : vector<8x128xf32>
    %c0_20 = arith.constant 0 : index
    %c0_21 = arith.constant 0 : index
    %44 = vector.load %arg10[%c0_20, %c0_21] : memref<8x128xf32, #tpu.memory_space<vmem>>, vector<8x128xf32>
    tpu.vector_store %arg10[%c0_20, %c0_21], %41 {strides = array<i32>} : memref<8x128xf32, #tpu.memory_space<vmem>>, vector<8x128xf32>,
    %c0_22 = arith.constant 0 : index
    %c0_23 = arith.constant 0 : index
    %45 = vector.load %arg9[%c0_22, %c0_23] : memref<8x128xf32, #tpu.memory_space<vmem>>, vector<8x128xf32>
    tpu.vector_store %arg9[%c0_22, %c0_23], %43 {strides = array<i32>} : memref<8x128xf32, #tpu.memory_space<vmem>>, vector<8x128xf32>,
    %46 = arith.index_cast %11 : i32 to index
    %c0_24 = arith.constant 0 : index
    %47 = vector.load %arg11[%46, %c0_24] : memref<64x128xf32, #tpu.memory_space<vmem>>, vector<8x128xf32>
    tpu.vector_store %arg11[%46, %c0_24], %43 {strides = array<i32>} : memref<64x128xf32, #tpu.memory_space<vmem>>, vector<8x128xf32>,
    %c1_i32 = arith.constant 1 : i32
    %c8_i32_25 = arith.constant 8 : i32
    %48 = arith.muli %c1_i32, %c8_i32_25 : i32
    %49 = tpu.assume_multiple %48, 8 : i32
    %50 = arith.index_cast %49 : i32 to index
    %c0_26 = arith.constant 0 : index
    %51 = vector.load %arg8[%50, %c0_26] : memref<64x512xf32, #tpu.memory_space<vmem>>, vector<8x512xf32>
    %c0_27 = arith.constant 0 : index
    %c0_28 = arith.constant 0 : index
    %52 = vector.load %arg9[%c0_27, %c0_28] : memref<8x128xf32, #tpu.memory_space<vmem>>, vector<8x128xf32>
    %c0_29 = arith.constant 0 : index
    %c0_30 = arith.constant 0 : index
    %53 = vector.load %arg4[%c0_29, %c0_30] : memref<128x512xf32, #tpu.memory_space<vmem>>, vector<128x512xf32>
    %cst_31 = arith.constant dense<0.000000e+00> : vector<8x512xf32>
    %54 = tpu.matmul %52, %53, %cst_31 {dimension_numbers = #tpu.dot_dimension_numbers<[1], [0], [0], [1], [0, 0, 1, 1], [], []>} : vector<8x128xf32>, vector<128x512xf32>, vector<8x512xf32> -> vector<8x512xf32>
    %55 = arith.addf %51, %54 : vector<8x512xf32>
    %56 = vector.extract_strided_slice %55 {offsets = [0, 0], sizes = [8, 128], strides = [1, 1]} : vector<8x512xf32> to vector<8x128xf32>
    %57 = arith.negf %56 : vector<8x128xf32>
    %58 = math.exp %57 : vector<8x128xf32>
    %cst_32 = arith.constant 1.000000e+00 : f32
    %59 = vector.broadcast %cst_32 : f32 to vector<8x128xf32>
    %60 = arith.addf %59, %58 : vector<8x128xf32>
    %61 = arith.divf %59, %60 : vector<8x128xf32>
    %62 = vector.extract_strided_slice %55 {offsets = [0, 128], sizes = [8, 128], strides = [1, 1]} : vector<8x512xf32> to vector<8x128xf32>
    %63 = arith.negf %62 : vector<8x128xf32>
    %64 = math.exp %63 : vector<8x128xf32>
    %cst_33 = arith.constant 1.000000e+00 : f32
    %65 = vector.broadcast %cst_33 : f32 to vector<8x128xf32>
    %66 = arith.addf %65, %64 : vector<8x128xf32>
    %67 = arith.divf %65, %66 : vector<8x128xf32>
    %68 = vector.extract_strided_slice %55 {offsets = [0, 256], sizes = [8, 128], strides = [1, 1]} : vector<8x512xf32> to vector<8x128xf32>
    %69 = math.tanh %68 : vector<8x128xf32>
    %70 = vector.extract_strided_slice %55 {offsets = [0, 384], sizes = [8, 128], strides = [1, 1]} : vector<8x512xf32> to vector<8x128xf32>
    %71 = arith.negf %70 : vector<8x128xf32>
    %72 = math.exp %71 : vector<8x128xf32>
    %cst_34 = arith.constant 1.000000e+00 : f32
    %73 = vector.broadcast %cst_34 : f32 to vector<8x128xf32>
    %74 = arith.addf %73, %72 : vector<8x128xf32>
    %75 = arith.divf %73, %74 : vector<8x128xf32>
    %c0_35 = arith.constant 0 : index
    %c0_36 = arith.constant 0 : index
    %76 = vector.load %arg10[%c0_35, %c0_36] : memref<8x128xf32, #tpu.memory_space<vmem>>, vector<8x128xf32>
    %77 = arith.mulf %67, %76 : vector<8x128xf32>
    %78 = arith.mulf %61, %69 : vector<8x128xf32>
    %79 = arith.addf %77, %78 : vector<8x128xf32>
    %80 = math.tanh %79 : vector<8x128xf32>
    %81 = arith.mulf %75, %80 : vector<8x128xf32>
    %c0_37 = arith.constant 0 : index
    %c0_38 = arith.constant 0 : index
    %82 = vector.load %arg10[%c0_37, %c0_38] : memref<8x128xf32, #tpu.memory_space<vmem>>, vector<8x128xf32>
    tpu.vector_store %arg10[%c0_37, %c0_38], %79 {strides = array<i32>} : memref<8x128xf32, #tpu.memory_space<vmem>>, vector<8x128xf32>,
    %c0_39 = arith.constant 0 : index
    %c0_40 = arith.constant 0 : index
    %83 = vector.load %arg9[%c0_39, %c0_40] : memref<8x128xf32, #tpu.memory_space<vmem>>, vector<8x128xf32>
    tpu.vector_store %arg9[%c0_39, %c0_40], %81 {strides = array<i32>} : memref<8x128xf32, #tpu.memory_space<vmem>>, vector<8x128xf32>,
    %84 = arith.index_cast %49 : i32 to index
    %c0_41 = arith.constant 0 : index
    %85 = vector.load %arg11[%84, %c0_41] : memref<64x128xf32, #tpu.memory_space<vmem>>, vector<8x128xf32>
    tpu.vector_store %arg11[%84, %c0_41], %81 {strides = array<i32>} : memref<64x128xf32, #tpu.memory_space<vmem>>, vector<8x128xf32>,
    %c2_i32 = arith.constant 2 : i32
    %c8_i32_42 = arith.constant 8 : i32
    %86 = arith.muli %c2_i32, %c8_i32_42 : i32
    %87 = tpu.assume_multiple %86, 8 : i32
    %88 = arith.index_cast %87 : i32 to index
    %c0_43 = arith.constant 0 : index
    %89 = vector.load %arg8[%88, %c0_43] : memref<64x512xf32, #tpu.memory_space<vmem>>, vector<8x512xf32>
    %c0_44 = arith.constant 0 : index
    %c0_45 = arith.constant 0 : index
    %90 = vector.load %arg9[%c0_44, %c0_45] : memref<8x128xf32, #tpu.memory_space<vmem>>, vector<8x128xf32>
    %c0_46 = arith.constant 0 : index
    %c0_47 = arith.constant 0 : index
    %91 = vector.load %arg4[%c0_46, %c0_47] : memref<128x512xf32, #tpu.memory_space<vmem>>, vector<128x512xf32>
    %cst_48 = arith.constant dense<0.000000e+00> : vector<8x512xf32>
    %92 = tpu.matmul %90, %91, %cst_48 {dimension_numbers = #tpu.dot_dimension_numbers<[1], [0], [0], [1], [0, 0, 1, 1], [], []>} : vector<8x128xf32>, vector<128x512xf32>, vector<8x512xf32> -> vector<8x512xf32>
    %93 = arith.addf %89, %92 : vector<8x512xf32>
    %94 = vector.extract_strided_slice %93 {offsets = [0, 0], sizes = [8, 128], strides = [1, 1]} : vector<8x512xf32> to vector<8x128xf32>
    %95 = arith.negf %94 : vector<8x128xf32>
    %96 = math.exp %95 : vector<8x128xf32>
    %cst_49 = arith.constant 1.000000e+00 : f32
    %97 = vector.broadcast %cst_49 : f32 to vector<8x128xf32>
    %98 = arith.addf %97, %96 : vector<8x128xf32>
    %99 = arith.divf %97, %98 : vector<8x128xf32>
    %100 = vector.extract_strided_slice %93 {offsets = [0, 128], sizes = [8, 128], strides = [1, 1]} : vector<8x512xf32> to vector<8x128xf32>
    %101 = arith.negf %100 : vector<8x128xf32>
    %102 = math.exp %101 : vector<8x128xf32>
    %cst_50 = arith.constant 1.000000e+00 : f32
    %103 = vector.broadcast %cst_50 : f32 to vector<8x128xf32>
    %104 = arith.addf %103, %102 : vector<8x128xf32>
    %105 = arith.divf %103, %104 : vector<8x128xf32>
    %106 = vector.extract_strided_slice %93 {offsets = [0, 256], sizes = [8, 128], strides = [1, 1]} : vector<8x512xf32> to vector<8x128xf32>
    %107 = math.tanh %106 : vector<8x128xf32>
    %108 = vector.extract_strided_slice %93 {offsets = [0, 384], sizes = [8, 128], strides = [1, 1]} : vector<8x512xf32> to vector<8x128xf32>
    %109 = arith.negf %108 : vector<8x128xf32>
    %110 = math.exp %109 : vector<8x128xf32>
    %cst_51 = arith.constant 1.000000e+00 : f32
    %111 = vector.broadcast %cst_51 : f32 to vector<8x128xf32>
    %112 = arith.addf %111, %110 : vector<8x128xf32>
    %113 = arith.divf %111, %112 : vector<8x128xf32>
    %c0_52 = arith.constant 0 : index
    %c0_53 = arith.constant 0 : index
    %114 = vector.load %arg10[%c0_52, %c0_53] : memref<8x128xf32, #tpu.memory_space<vmem>>, vector<8x128xf32>
    %115 = arith.mulf %105, %114 : vector<8x128xf32>
    %116 = arith.mulf %99, %107 : vector<8x128xf32>
    %117 = arith.addf %115, %116 : vector<8x128xf32>
    %118 = math.tanh %117 : vector<8x128xf32>
    %119 = arith.mulf %113, %118 : vector<8x128xf32>
    %c0_54 = arith.constant 0 : index
    %c0_55 = arith.constant 0 : index
    %120 = vector.load %arg10[%c0_54, %c0_55] : memref<8x128xf32, #tpu.memory_space<vmem>>, vector<8x128xf32>
    tpu.vector_store %arg10[%c0_54, %c0_55], %117 {strides = array<i32>} : memref<8x128xf32, #tpu.memory_space<vmem>>, vector<8x128xf32>,
    %c0_56 = arith.constant 0 : index
    %c0_57 = arith.constant 0 : index
    %121 = vector.load %arg9[%c0_56, %c0_57] : memref<8x128xf32, #tpu.memory_space<vmem>>, vector<8x128xf32>
    tpu.vector_store %arg9[%c0_56, %c0_57], %119 {strides = array<i32>} : memref<8x128xf32, #tpu.memory_space<vmem>>, vector<8x128xf32>,
    %122 = arith.index_cast %87 : i32 to index
    %c0_58 = arith.constant 0 : index
    %123 = vector.load %arg11[%122, %c0_58] : memref<64x128xf32, #tpu.memory_space<vmem>>, vector<8x128xf32>
    tpu.vector_store %arg11[%122, %c0_58], %119 {strides = array<i32>} : memref<64x128xf32, #tpu.memory_space<vmem>>, vector<8x128xf32>,
    %c3_i32 = arith.constant 3 : i32
    %c8_i32_59 = arith.constant 8 : i32
    %124 = arith.muli %c3_i32, %c8_i32_59 : i32
    %125 = tpu.assume_multiple %124, 8 : i32
    %126 = arith.index_cast %125 : i32 to index
    %c0_60 = arith.constant 0 : index
    %127 = vector.load %arg8[%126, %c0_60] : memref<64x512xf32, #tpu.memory_space<vmem>>, vector<8x512xf32>
    %c0_61 = arith.constant 0 : index
    %c0_62 = arith.constant 0 : index
    %128 = vector.load %arg9[%c0_61, %c0_62] : memref<8x128xf32, #tpu.memory_space<vmem>>, vector<8x128xf32>
    %c0_63 = arith.constant 0 : index
    %c0_64 = arith.constant 0 : index
    %129 = vector.load %arg4[%c0_63, %c0_64] : memref<128x512xf32, #tpu.memory_space<vmem>>, vector<128x512xf32>
    %cst_65 = arith.constant dense<0.000000e+00> : vector<8x512xf32>
    %130 = tpu.matmul %128, %129, %cst_65 {dimension_numbers = #tpu.dot_dimension_numbers<[1], [0], [0], [1], [0, 0, 1, 1], [], []>} : vector<8x128xf32>, vector<128x512xf32>, vector<8x512xf32> -> vector<8x512xf32>
    %131 = arith.addf %127, %130 : vector<8x512xf32>
    %132 = vector.extract_strided_slice %131 {offsets = [0, 0], sizes = [8, 128], strides = [1, 1]} : vector<8x512xf32> to vector<8x128xf32>
    %133 = arith.negf %132 : vector<8x128xf32>
    %134 = math.exp %133 : vector<8x128xf32>
    %cst_66 = arith.constant 1.000000e+00 : f32
    %135 = vector.broadcast %cst_66 : f32 to vector<8x128xf32>
    %136 = arith.addf %135, %134 : vector<8x128xf32>
    %137 = arith.divf %135, %136 : vector<8x128xf32>
    %138 = vector.extract_strided_slice %131 {offsets = [0, 128], sizes = [8, 128], strides = [1, 1]} : vector<8x512xf32> to vector<8x128xf32>
    %139 = arith.negf %138 : vector<8x128xf32>
    %140 = math.exp %139 : vector<8x128xf32>
    %cst_67 = arith.constant 1.000000e+00 : f32
    %141 = vector.broadcast %cst_67 : f32 to vector<8x128xf32>
    %142 = arith.addf %141, %140 : vector<8x128xf32>
    %143 = arith.divf %141, %142 : vector<8x128xf32>
    %144 = vector.extract_strided_slice %131 {offsets = [0, 256], sizes = [8, 128], strides = [1, 1]} : vector<8x512xf32> to vector<8x128xf32>
    %145 = math.tanh %144 : vector<8x128xf32>
    %146 = vector.extract_strided_slice %131 {offsets = [0, 384], sizes = [8, 128], strides = [1, 1]} : vector<8x512xf32> to vector<8x128xf32>
    %147 = arith.negf %146 : vector<8x128xf32>
    %148 = math.exp %147 : vector<8x128xf32>
    %cst_68 = arith.constant 1.000000e+00 : f32
    %149 = vector.broadcast %cst_68 : f32 to vector<8x128xf32>
    %150 = arith.addf %149, %148 : vector<8x128xf32>
    %151 = arith.divf %149, %150 : vector<8x128xf32>
    %c0_69 = arith.constant 0 : index
    %c0_70 = arith.constant 0 : index
    %152 = vector.load %arg10[%c0_69, %c0_70] : memref<8x128xf32, #tpu.memory_space<vmem>>, vector<8x128xf32>
    %153 = arith.mulf %143, %152 : vector<8x128xf32>
    %154 = arith.mulf %137, %145 : vector<8x128xf32>
    %155 = arith.addf %153, %154 : vector<8x128xf32>
    %156 = math.tanh %155 : vector<8x128xf32>
    %157 = arith.mulf %151, %156 : vector<8x128xf32>
    %c0_71 = arith.constant 0 : index
    %c0_72 = arith.constant 0 : index
    %158 = vector.load %arg10[%c0_71, %c0_72] : memref<8x128xf32, #tpu.memory_space<vmem>>, vector<8x128xf32>
    tpu.vector_store %arg10[%c0_71, %c0_72], %155 {strides = array<i32>} : memref<8x128xf32, #tpu.memory_space<vmem>>, vector<8x128xf32>,
    %c0_73 = arith.constant 0 : index
    %c0_74 = arith.constant 0 : index
    %159 = vector.load %arg9[%c0_73, %c0_74] : memref<8x128xf32, #tpu.memory_space<vmem>>, vector<8x128xf32>
    tpu.vector_store %arg9[%c0_73, %c0_74], %157 {strides = array<i32>} : memref<8x128xf32, #tpu.memory_space<vmem>>, vector<8x128xf32>,
    %160 = arith.index_cast %125 : i32 to index
    %c0_75 = arith.constant 0 : index
    %161 = vector.load %arg11[%160, %c0_75] : memref<64x128xf32, #tpu.memory_space<vmem>>, vector<8x128xf32>
    tpu.vector_store %arg11[%160, %c0_75], %157 {strides = array<i32>} : memref<64x128xf32, #tpu.memory_space<vmem>>, vector<8x128xf32>,
    %c4_i32 = arith.constant 4 : i32
    %c8_i32_76 = arith.constant 8 : i32
    %162 = arith.muli %c4_i32, %c8_i32_76 : i32
    %163 = tpu.assume_multiple %162, 8 : i32
    %164 = arith.index_cast %163 : i32 to index
    %c0_77 = arith.constant 0 : index
    %165 = vector.load %arg8[%164, %c0_77] : memref<64x512xf32, #tpu.memory_space<vmem>>, vector<8x512xf32>
    %c0_78 = arith.constant 0 : index
    %c0_79 = arith.constant 0 : index
    %166 = vector.load %arg9[%c0_78, %c0_79] : memref<8x128xf32, #tpu.memory_space<vmem>>, vector<8x128xf32>
    %c0_80 = arith.constant 0 : index
    %c0_81 = arith.constant 0 : index
    %167 = vector.load %arg4[%c0_80, %c0_81] : memref<128x512xf32, #tpu.memory_space<vmem>>, vector<128x512xf32>
    %cst_82 = arith.constant dense<0.000000e+00> : vector<8x512xf32>
    %168 = tpu.matmul %166, %167, %cst_82 {dimension_numbers = #tpu.dot_dimension_numbers<[1], [0], [0], [1], [0, 0, 1, 1], [], []>} : vector<8x128xf32>, vector<128x512xf32>, vector<8x512xf32> -> vector<8x512xf32>
    %169 = arith.addf %165, %168 : vector<8x512xf32>
    %170 = vector.extract_strided_slice %169 {offsets = [0, 0], sizes = [8, 128], strides = [1, 1]} : vector<8x512xf32> to vector<8x128xf32>
    %171 = arith.negf %170 : vector<8x128xf32>
    %172 = math.exp %171 : vector<8x128xf32>
    %cst_83 = arith.constant 1.000000e+00 : f32
    %173 = vector.broadcast %cst_83 : f32 to vector<8x128xf32>
    %174 = arith.addf %173, %172 : vector<8x128xf32>
    %175 = arith.divf %173, %174 : vector<8x128xf32>
    %176 = vector.extract_strided_slice %169 {offsets = [0, 128], sizes = [8, 128], strides = [1, 1]} : vector<8x512xf32> to vector<8x128xf32>
    %177 = arith.negf %176 : vector<8x128xf32>
    %178 = math.exp %177 : vector<8x128xf32>
    %cst_84 = arith.constant 1.000000e+00 : f32
    %179 = vector.broadcast %cst_84 : f32 to vector<8x128xf32>
    %180 = arith.addf %179, %178 : vector<8x128xf32>
    %181 = arith.divf %179, %180 : vector<8x128xf32>
    %182 = vector.extract_strided_slice %169 {offsets = [0, 256], sizes = [8, 128], strides = [1, 1]} : vector<8x512xf32> to vector<8x128xf32>
    %183 = math.tanh %182 : vector<8x128xf32>
    %184 = vector.extract_strided_slice %169 {offsets = [0, 384], sizes = [8, 128], strides = [1, 1]} : vector<8x512xf32> to vector<8x128xf32>
    %185 = arith.negf %184 : vector<8x128xf32>
    %186 = math.exp %185 : vector<8x128xf32>
    %cst_85 = arith.constant 1.000000e+00 : f32
    %187 = vector.broadcast %cst_85 : f32 to vector<8x128xf32>
    %188 = arith.addf %187, %186 : vector<8x128xf32>
    %189 = arith.divf %187, %188 : vector<8x128xf32>
    %c0_86 = arith.constant 0 : index
    %c0_87 = arith.constant 0 : index
    %190 = vector.load %arg10[%c0_86, %c0_87] : memref<8x128xf32, #tpu.memory_space<vmem>>, vector<8x128xf32>
    %191 = arith.mulf %181, %190 : vector<8x128xf32>
    %192 = arith.mulf %175, %183 : vector<8x128xf32>
    %193 = arith.addf %191, %192 : vector<8x128xf32>
    %194 = math.tanh %193 : vector<8x128xf32>
    %195 = arith.mulf %189, %194 : vector<8x128xf32>
    %c0_88 = arith.constant 0 : index
    %c0_89 = arith.constant 0 : index
    %196 = vector.load %arg10[%c0_88, %c0_89] : memref<8x128xf32, #tpu.memory_space<vmem>>, vector<8x128xf32>
    tpu.vector_store %arg10[%c0_88, %c0_89], %193 {strides = array<i32>} : memref<8x128xf32, #tpu.memory_space<vmem>>, vector<8x128xf32>,
    %c0_90 = arith.constant 0 : index
    %c0_91 = arith.constant 0 : index
    %197 = vector.load %arg9[%c0_90, %c0_91] : memref<8x128xf32, #tpu.memory_space<vmem>>, vector<8x128xf32>
    tpu.vector_store %arg9[%c0_90, %c0_91], %195 {strides = array<i32>} : memref<8x128xf32, #tpu.memory_space<vmem>>, vector<8x128xf32>,
    %198 = arith.index_cast %163 : i32 to index
    %c0_92 = arith.constant 0 : index
    %199 = vector.load %arg11[%198, %c0_92] : memref<64x128xf32, #tpu.memory_space<vmem>>, vector<8x128xf32>
    tpu.vector_store %arg11[%198, %c0_92], %195 {strides = array<i32>} : memref<64x128xf32, #tpu.memory_space<vmem>>, vector<8x128xf32>,
    %c5_i32 = arith.constant 5 : i32
    %c8_i32_93 = arith.constant 8 : i32
    %200 = arith.muli %c5_i32, %c8_i32_93 : i32
    %201 = tpu.assume_multiple %200, 8 : i32
    %202 = arith.index_cast %201 : i32 to index
    %c0_94 = arith.constant 0 : index
    %203 = vector.load %arg8[%202, %c0_94] : memref<64x512xf32, #tpu.memory_space<vmem>>, vector<8x512xf32>
    %c0_95 = arith.constant 0 : index
    %c0_96 = arith.constant 0 : index
    %204 = vector.load %arg9[%c0_95, %c0_96] : memref<8x128xf32, #tpu.memory_space<vmem>>, vector<8x128xf32>
    %c0_97 = arith.constant 0 : index
    %c0_98 = arith.constant 0 : index
    %205 = vector.load %arg4[%c0_97, %c0_98] : memref<128x512xf32, #tpu.memory_space<vmem>>, vector<128x512xf32>
    %cst_99 = arith.constant dense<0.000000e+00> : vector<8x512xf32>
    %206 = tpu.matmul %204, %205, %cst_99 {dimension_numbers = #tpu.dot_dimension_numbers<[1], [0], [0], [1], [0, 0, 1, 1], [], []>} : vector<8x128xf32>, vector<128x512xf32>, vector<8x512xf32> -> vector<8x512xf32>
    %207 = arith.addf %203, %206 : vector<8x512xf32>
    %208 = vector.extract_strided_slice %207 {offsets = [0, 0], sizes = [8, 128], strides = [1, 1]} : vector<8x512xf32> to vector<8x128xf32>
    %209 = arith.negf %208 : vector<8x128xf32>
    %210 = math.exp %209 : vector<8x128xf32>
    %cst_100 = arith.constant 1.000000e+00 : f32
    %211 = vector.broadcast %cst_100 : f32 to vector<8x128xf32>
    %212 = arith.addf %211, %210 : vector<8x128xf32>
    %213 = arith.divf %211, %212 : vector<8x128xf32>
    %214 = vector.extract_strided_slice %207 {offsets = [0, 128], sizes = [8, 128], strides = [1, 1]} : vector<8x512xf32> to vector<8x128xf32>
    %215 = arith.negf %214 : vector<8x128xf32>
    %216 = math.exp %215 : vector<8x128xf32>
    %cst_101 = arith.constant 1.000000e+00 : f32
    %217 = vector.broadcast %cst_101 : f32 to vector<8x128xf32>
    %218 = arith.addf %217, %216 : vector<8x128xf32>
    %219 = arith.divf %217, %218 : vector<8x128xf32>
    %220 = vector.extract_strided_slice %207 {offsets = [0, 256], sizes = [8, 128], strides = [1, 1]} : vector<8x512xf32> to vector<8x128xf32>
    %221 = math.tanh %220 : vector<8x128xf32>
    %222 = vector.extract_strided_slice %207 {offsets = [0, 384], sizes = [8, 128], strides = [1, 1]} : vector<8x512xf32> to vector<8x128xf32>
    %223 = arith.negf %222 : vector<8x128xf32>
    %224 = math.exp %223 : vector<8x128xf32>
    %cst_102 = arith.constant 1.000000e+00 : f32
    %225 = vector.broadcast %cst_102 : f32 to vector<8x128xf32>
    %226 = arith.addf %225, %224 : vector<8x128xf32>
    %227 = arith.divf %225, %226 : vector<8x128xf32>
    %c0_103 = arith.constant 0 : index
    %c0_104 = arith.constant 0 : index
    %228 = vector.load %arg10[%c0_103, %c0_104] : memref<8x128xf32, #tpu.memory_space<vmem>>, vector<8x128xf32>
    %229 = arith.mulf %219, %228 : vector<8x128xf32>
    %230 = arith.mulf %213, %221 : vector<8x128xf32>
    %231 = arith.addf %229, %230 : vector<8x128xf32>
    %232 = math.tanh %231 : vector<8x128xf32>
    %233 = arith.mulf %227, %232 : vector<8x128xf32>
    %c0_105 = arith.constant 0 : index
    %c0_106 = arith.constant 0 : index
    %234 = vector.load %arg10[%c0_105, %c0_106] : memref<8x128xf32, #tpu.memory_space<vmem>>, vector<8x128xf32>
    tpu.vector_store %arg10[%c0_105, %c0_106], %231 {strides = array<i32>} : memref<8x128xf32, #tpu.memory_space<vmem>>, vector<8x128xf32>,
    %c0_107 = arith.constant 0 : index
    %c0_108 = arith.constant 0 : index
    %235 = vector.load %arg9[%c0_107, %c0_108] : memref<8x128xf32, #tpu.memory_space<vmem>>, vector<8x128xf32>
    tpu.vector_store %arg9[%c0_107, %c0_108], %233 {strides = array<i32>} : memref<8x128xf32, #tpu.memory_space<vmem>>, vector<8x128xf32>,
    %236 = arith.index_cast %201 : i32 to index
    %c0_109 = arith.constant 0 : index
    %237 = vector.load %arg11[%236, %c0_109] : memref<64x128xf32, #tpu.memory_space<vmem>>, vector<8x128xf32>
    tpu.vector_store %arg11[%236, %c0_109], %233 {strides = array<i32>} : memref<64x128xf32, #tpu.memory_space<vmem>>, vector<8x128xf32>,
    %c6_i32 = arith.constant 6 : i32
    %c8_i32_110 = arith.constant 8 : i32
    %238 = arith.muli %c6_i32, %c8_i32_110 : i32
    %239 = tpu.assume_multiple %238, 8 : i32
    %240 = arith.index_cast %239 : i32 to index
    %c0_111 = arith.constant 0 : index
    %241 = vector.load %arg8[%240, %c0_111] : memref<64x512xf32, #tpu.memory_space<vmem>>, vector<8x512xf32>
    %c0_112 = arith.constant 0 : index
    %c0_113 = arith.constant 0 : index
    %242 = vector.load %arg9[%c0_112, %c0_113] : memref<8x128xf32, #tpu.memory_space<vmem>>, vector<8x128xf32>
    %c0_114 = arith.constant 0 : index
    %c0_115 = arith.constant 0 : index
    %243 = vector.load %arg4[%c0_114, %c0_115] : memref<128x512xf32, #tpu.memory_space<vmem>>, vector<128x512xf32>
    %cst_116 = arith.constant dense<0.000000e+00> : vector<8x512xf32>
    %244 = tpu.matmul %242, %243, %cst_116 {dimension_numbers = #tpu.dot_dimension_numbers<[1], [0], [0], [1], [0, 0, 1, 1], [], []>} : vector<8x128xf32>, vector<128x512xf32>, vector<8x512xf32> -> vector<8x512xf32>
    %245 = arith.addf %241, %244 : vector<8x512xf32>
    %246 = vector.extract_strided_slice %245 {offsets = [0, 0], sizes = [8, 128], strides = [1, 1]} : vector<8x512xf32> to vector<8x128xf32>
    %247 = arith.negf %246 : vector<8x128xf32>
    %248 = math.exp %247 : vector<8x128xf32>
    %cst_117 = arith.constant 1.000000e+00 : f32
    %249 = vector.broadcast %cst_117 : f32 to vector<8x128xf32>
    %250 = arith.addf %249, %248 : vector<8x128xf32>
    %251 = arith.divf %249, %250 : vector<8x128xf32>
    %252 = vector.extract_strided_slice %245 {offsets = [0, 128], sizes = [8, 128], strides = [1, 1]} : vector<8x512xf32> to vector<8x128xf32>
    %253 = arith.negf %252 : vector<8x128xf32>
    %254 = math.exp %253 : vector<8x128xf32>
    %cst_118 = arith.constant 1.000000e+00 : f32
    %255 = vector.broadcast %cst_118 : f32 to vector<8x128xf32>
    %256 = arith.addf %255, %254 : vector<8x128xf32>
    %257 = arith.divf %255, %256 : vector<8x128xf32>
    %258 = vector.extract_strided_slice %245 {offsets = [0, 256], sizes = [8, 128], strides = [1, 1]} : vector<8x512xf32> to vector<8x128xf32>
    %259 = math.tanh %258 : vector<8x128xf32>
    %260 = vector.extract_strided_slice %245 {offsets = [0, 384], sizes = [8, 128], strides = [1, 1]} : vector<8x512xf32> to vector<8x128xf32>
    %261 = arith.negf %260 : vector<8x128xf32>
    %262 = math.exp %261 : vector<8x128xf32>
    %cst_119 = arith.constant 1.000000e+00 : f32
    %263 = vector.broadcast %cst_119 : f32 to vector<8x128xf32>
    %264 = arith.addf %263, %262 : vector<8x128xf32>
    %265 = arith.divf %263, %264 : vector<8x128xf32>
    %c0_120 = arith.constant 0 : index
    %c0_121 = arith.constant 0 : index
    %266 = vector.load %arg10[%c0_120, %c0_121] : memref<8x128xf32, #tpu.memory_space<vmem>>, vector<8x128xf32>
    %267 = arith.mulf %257, %266 : vector<8x128xf32>
    %268 = arith.mulf %251, %259 : vector<8x128xf32>
    %269 = arith.addf %267, %268 : vector<8x128xf32>
    %270 = math.tanh %269 : vector<8x128xf32>
    %271 = arith.mulf %265, %270 : vector<8x128xf32>
    %c0_122 = arith.constant 0 : index
    %c0_123 = arith.constant 0 : index
    %272 = vector.load %arg10[%c0_122, %c0_123] : memref<8x128xf32, #tpu.memory_space<vmem>>, vector<8x128xf32>
    tpu.vector_store %arg10[%c0_122, %c0_123], %269 {strides = array<i32>} : memref<8x128xf32, #tpu.memory_space<vmem>>, vector<8x128xf32>,
    %c0_124 = arith.constant 0 : index
    %c0_125 = arith.constant 0 : index
    %273 = vector.load %arg9[%c0_124, %c0_125] : memref<8x128xf32, #tpu.memory_space<vmem>>, vector<8x128xf32>
    tpu.vector_store %arg9[%c0_124, %c0_125], %271 {strides = array<i32>} : memref<8x128xf32, #tpu.memory_space<vmem>>, vector<8x128xf32>,
    %274 = arith.index_cast %239 : i32 to index
    %c0_126 = arith.constant 0 : index
    %275 = vector.load %arg11[%274, %c0_126] : memref<64x128xf32, #tpu.memory_space<vmem>>, vector<8x128xf32>
    tpu.vector_store %arg11[%274, %c0_126], %271 {strides = array<i32>} : memref<64x128xf32, #tpu.memory_space<vmem>>, vector<8x128xf32>,
    %c7_i32 = arith.constant 7 : i32
    %c8_i32_127 = arith.constant 8 : i32
    %276 = arith.muli %c7_i32, %c8_i32_127 : i32
    %277 = tpu.assume_multiple %276, 8 : i32
    %278 = arith.index_cast %277 : i32 to index
    %c0_128 = arith.constant 0 : index
    %279 = vector.load %arg8[%278, %c0_128] : memref<64x512xf32, #tpu.memory_space<vmem>>, vector<8x512xf32>
    %c0_129 = arith.constant 0 : index
    %c0_130 = arith.constant 0 : index
    %280 = vector.load %arg9[%c0_129, %c0_130] : memref<8x128xf32, #tpu.memory_space<vmem>>, vector<8x128xf32>
    %c0_131 = arith.constant 0 : index
    %c0_132 = arith.constant 0 : index
    %281 = vector.load %arg4[%c0_131, %c0_132] : memref<128x512xf32, #tpu.memory_space<vmem>>, vector<128x512xf32>
    %cst_133 = arith.constant dense<0.000000e+00> : vector<8x512xf32>
    %282 = tpu.matmul %280, %281, %cst_133 {dimension_numbers = #tpu.dot_dimension_numbers<[1], [0], [0], [1], [0, 0, 1, 1], [], []>} : vector<8x128xf32>, vector<128x512xf32>, vector<8x512xf32> -> vector<8x512xf32>
    %283 = arith.addf %279, %282 : vector<8x512xf32>
    %284 = vector.extract_strided_slice %283 {offsets = [0, 0], sizes = [8, 128], strides = [1, 1]} : vector<8x512xf32> to vector<8x128xf32>
    %285 = arith.negf %284 : vector<8x128xf32>
    %286 = math.exp %285 : vector<8x128xf32>
    %cst_134 = arith.constant 1.000000e+00 : f32
    %287 = vector.broadcast %cst_134 : f32 to vector<8x128xf32>
    %288 = arith.addf %287, %286 : vector<8x128xf32>
    %289 = arith.divf %287, %288 : vector<8x128xf32>
    %290 = vector.extract_strided_slice %283 {offsets = [0, 128], sizes = [8, 128], strides = [1, 1]} : vector<8x512xf32> to vector<8x128xf32>
    %291 = arith.negf %290 : vector<8x128xf32>
    %292 = math.exp %291 : vector<8x128xf32>
    %cst_135 = arith.constant 1.000000e+00 : f32
    %293 = vector.broadcast %cst_135 : f32 to vector<8x128xf32>
    %294 = arith.addf %293, %292 : vector<8x128xf32>
    %295 = arith.divf %293, %294 : vector<8x128xf32>
    %296 = vector.extract_strided_slice %283 {offsets = [0, 256], sizes = [8, 128], strides = [1, 1]} : vector<8x512xf32> to vector<8x128xf32>
    %297 = math.tanh %296 : vector<8x128xf32>
    %298 = vector.extract_strided_slice %283 {offsets = [0, 384], sizes = [8, 128], strides = [1, 1]} : vector<8x512xf32> to vector<8x128xf32>
    %299 = arith.negf %298 : vector<8x128xf32>
    %300 = math.exp %299 : vector<8x128xf32>
    %cst_136 = arith.constant 1.000000e+00 : f32
    %301 = vector.broadcast %cst_136 : f32 to vector<8x128xf32>
    %302 = arith.addf %301, %300 : vector<8x128xf32>
    %303 = arith.divf %301, %302 : vector<8x128xf32>
    %c0_137 = arith.constant 0 : index
    %c0_138 = arith.constant 0 : index
    %304 = vector.load %arg10[%c0_137, %c0_138] : memref<8x128xf32, #tpu.memory_space<vmem>>, vector<8x128xf32>
    %305 = arith.mulf %295, %304 : vector<8x128xf32>
    %306 = arith.mulf %289, %297 : vector<8x128xf32>
    %307 = arith.addf %305, %306 : vector<8x128xf32>
    %308 = math.tanh %307 : vector<8x128xf32>
    %309 = arith.mulf %303, %308 : vector<8x128xf32>
    %c0_139 = arith.constant 0 : index
    %c0_140 = arith.constant 0 : index
    %310 = vector.load %arg10[%c0_139, %c0_140] : memref<8x128xf32, #tpu.memory_space<vmem>>, vector<8x128xf32>
    tpu.vector_store %arg10[%c0_139, %c0_140], %307 {strides = array<i32>} : memref<8x128xf32, #tpu.memory_space<vmem>>, vector<8x128xf32>,
    %c0_141 = arith.constant 0 : index
    %c0_142 = arith.constant 0 : index
    %311 = vector.load %arg9[%c0_141, %c0_142] : memref<8x128xf32, #tpu.memory_space<vmem>>, vector<8x128xf32>
    tpu.vector_store %arg9[%c0_141, %c0_142], %309 {strides = array<i32>} : memref<8x128xf32, #tpu.memory_space<vmem>>, vector<8x128xf32>,
    %312 = arith.index_cast %277 : i32 to index
    %c0_143 = arith.constant 0 : index
    %313 = vector.load %arg11[%312, %c0_143] : memref<64x128xf32, #tpu.memory_space<vmem>>, vector<8x128xf32>
    tpu.vector_store %arg11[%312, %c0_143], %309 {strides = array<i32>} : memref<64x128xf32, #tpu.memory_space<vmem>>, vector<8x128xf32>,
    %c8_i32_144 = arith.constant 8 : i32
    %c0_145 = arith.constant 0 : index
    %c0_146 = arith.constant 0 : index
    %314 = vector.load %arg11[%c0_145, %c0_146] : memref<64x128xf32, #tpu.memory_space<vmem>>, vector<64x128xf32>
    %c0_147 = arith.constant 0 : index
    %c0_148 = arith.constant 0 : index
    %315 = vector.load %arg5[%c0_147, %c0_148] : memref<128x128xf32, #tpu.memory_space<vmem>>, vector<128x128xf32>
    %cst_149 = arith.constant dense<0.000000e+00> : vector<64x128xf32>
    %316 = tpu.matmul %314, %315, %cst_149 {dimension_numbers = #tpu.dot_dimension_numbers<[1], [0], [0], [1], [0, 0, 1, 1], [], []>} : vector<64x128xf32>, vector<128x128xf32>, vector<64x128xf32> -> vector<64x128xf32>
    %c0_150 = arith.constant 0 : index
    %c0_151 = arith.constant 0 : index
    %317 = vector.load %arg6[%c0_150, %c0_151] : memref<1x128xf32, #tpu.memory_space<vmem>>, vector<1x128xf32>
    %318 = vector.broadcast %317 : vector<1x128xf32> to vector<64x128xf32>
    %319 = arith.addf %316, %318 : vector<64x128xf32>
    %c0_152 = arith.constant 0 : index
    %c0_153 = arith.constant 0 : index
    %320 = vector.load %arg7[%c0_152, %c0_153] : memref<64x128xf32, #tpu.memory_space<vmem>>, vector<64x128xf32>
    tpu.vector_store %arg7[%c0_152, %c0_153], %319 {strides = array<i32>} : memref<64x128xf32, #tpu.memory_space<vmem>>, vector<64x128xf32>,
    return
  }
  func.func @transform_0(%arg0: i32) -> (i32, i32) {
    %c0_i32 = arith.constant 0 : i32
    %c0_i32_0 = arith.constant 0 : i32
    return %arg0, %c0_i32 : i32, i32
  }
  func.func @transform_1(%arg0: i32) -> (i32, i32) {
    %c0_i32 = arith.constant 0 : i32
    %c0_i32_0 = arith.constant 0 : i32
    %c0_i32_1 = arith.constant 0 : i32
    return %c0_i32, %c0_i32_0 : i32, i32
  }
  func.func @transform_2(%arg0: i32) -> (i32, i32) {
    %c0_i32 = arith.constant 0 : i32
    %c0_i32_0 = arith.constant 0 : i32
    %c0_i32_1 = arith.constant 0 : i32
    return %c0_i32, %c0_i32_0 : i32, i32
  }
  func.func @transform_3(%arg0: i32) -> (i32, i32) {
    %c0_i32 = arith.constant 0 : i32
    %c0_i32_0 = arith.constant 0 : i32
    %c0_i32_1 = arith.constant 0 : i32
    return %c0_i32, %c0_i32_0 : i32, i32
  }
  func.func @transform_4(%arg0: i32) -> (i32, i32) {
    %c0_i32 = arith.constant 0 : i32
    %c0_i32_0 = arith.constant 0 : i32
    %c0_i32_1 = arith.constant 0 : i32
    return %c0_i32, %c0_i32_0 : i32, i32
  }
  func.func @transform_5(%arg0: i32) -> (i32, i32) {
    %c0_i32 = arith.constant 0 : i32
    %c0_i32_0 = arith.constant 0 : i32
    %c0_i32_1 = arith.constant 0 : i32
    return %c0_i32, %c0_i32_0 : i32, i32
  }
  func.func @transform_6(%arg0: i32) -> (i32, i32) {
    %c0_i32 = arith.constant 0 : i32
    %c0_i32_0 = arith.constant 0 : i32
    return %arg0, %c0_i32 : i32, i32
  }
}

</mosaic_0001>

<bundles_post_ra>
// kernel: lstm_model.2
= control target key start
LH: loop header
LB: loop body
LE: loop exit
PB: predicated region body
PF: predicated region fallthrough
CT: control target
= control target key end

     0   :  { %v4082_v3 = vmov 0.0   ;;  %vm61_vm0 = vcmask 130048   ;;  %s4077_s1 = inlined_call_operand.vmem [shape: f32[16,512], index: 1, kind: input, shape index: {}]   ;;  %s4078_s0 = inlined_call_operand.vmem [shape: f32[64,16], index: 0, kind: input, shape index: {}]   ;;  %s4079_s3 = inlined_call_operand.vmem [shape: f32[128,512], index: 3, kind: input, shape index: {}]   ;;  %s4080_s2 = inlined_call_operand.vmem [shape: f32[1,512], index: 2, kind: input, shape index: {}]   ;;  %s4081_s4 = inlined_call_operand.vmem [shape: f32[64,128], index: 4, kind: output, shape index: {}]  }
   0x1   :  { %v36_v0 = vld [vmem:[%s4077_s1 + $0x28] sm:$0xff]  ;;  %v38_v1 = vld [vmem:[%s4077_s1 + $0x38] sm:$0xff]  ;;  %v35_v2 = vld [vmem:[%s4077_s1 + $0x20] sm:$0xff]  ;;  %150 = vmatprep.mubr.f32.mxu0 %v4082_v3  ;;  %263 = vmatprep.mubr.f32.mxu1 %v4082_v3 }
   0x2   :  { %114 = vmatprep.subr.mxu0 %v36_v0  ;;  %227 = vmatprep.subr.mxu1 %v38_v1  ;;  %v37_v4 = vld [vmem:[%s4077_s1 + $0x30] sm:$0xff]  ;;  %v32_v5 = vld [vmem:[%s4077_s1 + $0x8] sm:$0xff]  ;;  %v34_v6 = vld [vmem:[%s4077_s1 + $0x18] sm:$0xff] }
   0x3   :  { %115 = vmatpush1.msra.mxu0 %v35_v2  ;;  %228 = vmatpush1.msra.mxu1 %v37_v4  ;;  %v31_v7 = vld [vmem:[%s4077_s1] sm:$0xff]  ;;  %v33_v8 = vld [vmem:[%s4077_s1 + $0x10] sm:$0xff]  ;;  %v2564_v10 = vld [vmem:[%s4079_s3 + $0x1e8] sm:$0xff] }
   0x4   :  { %v23_v9 = vld [vmem:[%s4078_s0] sm:$0xff]  ;;  %116 = vmatprep.subr.mxu0 %v32_v5  ;;  %229 = vmatprep.subr.mxu1 %v34_v6  ;;  %v2569_v11 = vld [vmem:[%s4079_s3 + $0x1f8] sm:$0xff]  ;;  %v2579_v13 = vld [vmem:[%s4079_s3 + $0x1f0] sm:$0xff] }
   0x5   :  { %117 = vmatpush1.msra.mxu0 %v31_v7  ;;  %230 = vmatpush1.msra.mxu1 %v33_v8  ;;  %v2574_v12 = vld [vmem:[%s4079_s3 + $0x1e0] sm:$0xff]  ;;  %v2586_v14 = vld [vmem:[%s4079_s3 + $0x1c8] sm:$0xff]  ;;  %v2591_v15 = vld [vmem:[%s4079_s3 + $0x1d8] sm:$0xff] }
   0x6   :  { %2330 = vmatmul.mubr.msk.f32.vlgmr.msra.gmra.mxu0 %vm61_vm0, %v23_v9  ;;  %2338 = vmatmul.mubr.msk.f32.vlgmr.msra.gmra.mxu1 %vm61_vm0, %v23_v9  ;;  %v2600_v16 = vld [vmem:[%s4079_s3 + $0x1c0] sm:$0xff]  ;;  %v2605_v17 = vld [vmem:[%s4079_s3 + $0x1d0] sm:$0xff]  ;;  %v24_v18 = vld [vmem:[%s4078_s0 + $0x8] sm:$0xff] }
   0x7   :  { %416 = vmatprep.subr.mxu0 %v2564_v10  ;;  %487 = vmatprep.subr.mxu1 %v2569_v11  ;;  %v2617_v19 = vld [vmem:[%s4079_s3 + $0x1a8] sm:$0xff]  ;;  %v2622_v20 = vld [vmem:[%s4079_s3 + $0x1b8] sm:$0xff]  ;;  %v2629_v21 = vld [vmem:[%s4079_s3 + $0x1a0] sm:$0xff] }
   0x8   :  { %417 = vmatpush1.msra.mxu0 %v2574_v12  ;;  %488 = vmatpush1.msra.mxu1 %v2579_v13  ;;  %v2634_v22 = vld [vmem:[%s4079_s3 + $0x1b0] sm:$0xff]  ;;  %v2641_v23 = vld [vmem:[%s4079_s3 + $0x188] sm:$0xff]  ;;  %v2646_v24 = vld [vmem:[%s4079_s3 + $0x198] sm:$0xff] }
   0x9   :  { %418 = vmatprep.subr.mxu0 %v2586_v14  ;;  %489 = vmatprep.subr.mxu1 %v2591_v15  ;;  %v2655_v25 = vld [vmem:[%s4079_s3 + $0x180] sm:$0xff]  ;;  %v2660_v26 = vld [vmem:[%s4079_s3 + $0x190] sm:$0xff]  ;;  %v2672_v28 = vld [vmem:[%s4079_s3 + $0x168] sm:$0xff] }
   0xa   :  { %156 = vmatprep.mubr.f32.mxu0 %v4082_v3  ;;  %269 = vmatprep.mubr.f32.mxu1 %v4082_v3  ;;  %v25_v27 = vld [vmem:[%s4078_s0 + $0x10] sm:$0xff]  ;;  %v2677_v29 = vld [vmem:[%s4079_s3 + $0x178] sm:$0xff]  ;;  %v2684_v30 = vld [vmem:[%s4079_s3 + $0x160] sm:$0xff] }
   0xb   :  { %419 = vmatpush1.msra.mxu0 %v2600_v16  ;;  %490 = vmatpush1.msra.mxu1 %v2605_v17  ;;  %v2689_v31 = vld [vmem:[%s4079_s3 + $0x170] sm:$0xff]  ;;  %v2696_v32 = vld [vmem:[%s4079_s3 + $0x148] sm:$0xff]  ;;  %v2701_v33 = vld [vmem:[%s4079_s3 + $0x158] sm:$0xff] }
   0xc   :  { %2331 = vmatmul.mubr.msk.f32.gmra.mxu0 %vm61_vm0, %v24_v18  ;;  %2339 = vmatmul.mubr.msk.f32.gmra.mxu1 %vm61_vm0, %v24_v18  ;;  %v2710_v34 = vld [vmem:[%s4079_s3 + $0x140] sm:$0xff]  ;;  %v2715_v35 = vld [vmem:[%s4079_s3 + $0x150] sm:$0xff]  ;;  %v26_v36 = vld [vmem:[%s4078_s0 + $0x18] sm:$0xff] }
   0xd   :  { %420 = vmatprep.subr.mxu0 %v2617_v19  ;;  %491 = vmatprep.subr.mxu1 %v2622_v20  ;;  %v2727_v37 = vld [vmem:[%s4079_s3 + $0x128] sm:$0xff]  ;;  %v2732_v38 = vld [vmem:[%s4079_s3 + $0x138] sm:$0xff]  ;;  %v2739_v39 = vld [vmem:[%s4079_s3 + $0x120] sm:$0xff] }
   0xe   :  { %421 = vmatpush1.msra.mxu0 %v2629_v21  ;;  %492 = vmatpush1.msra.mxu1 %v2634_v22  ;;  %v2744_v40 = vld [vmem:[%s4079_s3 + $0x130] sm:$0xff]  ;;  %v2751_v41 = vld [vmem:[%s4079_s3 + $0x108] sm:$0xff]  ;;  %v2756_v42 = vld [vmem:[%s4079_s3 + $0x118] sm:$0xff] }
   0xf   :  { %422 = vmatprep.subr.mxu0 %v2641_v23  ;;  %493 = vmatprep.subr.mxu1 %v2646_v24  ;;  %v2765_v43 = vld [vmem:[%s4079_s3 + $0x100] sm:$0xff]  ;;  %v2770_v44 = vld [vmem:[%s4079_s3 + $0x110] sm:$0xff]  ;;  %v2782_v46 = vld [vmem:[%s4079_s3 + $0xe8] sm:$0xff] }
  0x10   :  { %162 = vmatprep.mubr.f32.mxu0 %v4082_v3  ;;  %275 = vmatprep.mubr.f32.mxu1 %v4082_v3  ;;  %v27_v45 = vld [vmem:[%s4078_s0 + $0x20] sm:$0xff]  ;;  %v2787_v47 = vld [vmem:[%s4079_s3 + $0xf8] sm:$0xff]  ;;  %v2799_v49 = vld [vmem:[%s4079_s3 + $0xf0] sm:$0xff] }
  0x11   :  { %423 = vmatpush1.msra.mxu0 %v2655_v25  ;;  %494 = vmatpush1.msra.mxu1 %v2660_v26  ;;  %v2794_v48 = vld [vmem:[%s4079_s3 + $0xe0] sm:$0xff]  ;;  %v2806_v50 = vld [vmem:[%s4079_s3 + $0xc8] sm:$0xff]  ;;  %v2811_v51 = vld [vmem:[%s4079_s3 + $0xd8] sm:$0xff] }
  0x12   :  { %2332 = vmatmul.mubr.msk.f32.gmra.mxu0 %vm61_vm0, %v25_v27  ;;  %2340 = vmatmul.mubr.msk.f32.gmra.mxu1 %vm61_vm0, %v25_v27  ;;  %v2820_v52 = vld [vmem:[%s4079_s3 + $0xc0] sm:$0xff]  ;;  %v2825_v53 = vld [vmem:[%s4079_s3 + $0xd0] sm:$0xff]  ;;  %v28_v54 = vld [vmem:[%s4078_s0 + $0x28] sm:$0xff] }
  0x13   :  { %424 = vmatprep.subr.mxu0 %v2672_v28  ;;  %495 = vmatprep.subr.mxu1 %v2677_v29  ;;  %v2837_v55 = vld [vmem:[%s4079_s3 + $0xa8] sm:$0xff]  ;;  %v2842_v56 = vld [vmem:[%s4079_s3 + $0xb8] sm:$0xff]  ;;  %v2849_v57 = vld [vmem:[%s4079_s3 + $0xa0] sm:$0xff] }
  0x14   :  { %425 = vmatpush1.msra.mxu0 %v2684_v30  ;;  %496 = vmatpush1.msra.mxu1 %v2689_v31  ;;  %v2854_v58 = vld [vmem:[%s4079_s3 + $0xb0] sm:$0xff]  ;;  %v2861_v59 = vld [vmem:[%s4079_s3 + $0x88] sm:$0xff]  ;;  %v2866_v60 = vld [vmem:[%s4079_s3 + $0x98] sm:$0xff] }
  0x15   :  { %426 = vmatprep.subr.mxu0 %v2696_v32  ;;  %497 = vmatprep.subr.mxu1 %v2701_v33  ;;  %4147 = vst [vmem:[#allocation5_spill] sm:$0xff] %v2861_v59  ;;  %4148 = vst [vmem:[#allocation6_spill] sm:$0xff] %v2866_v60  ;;  %v2875_v61 = vld [vmem:[%s4079_s3 + $0x80] sm:$0xff]  ;;  %v2880_v62 = vld [vmem:[%s4079_s3 + $0x90] sm:$0xff] }
  0x16   :  { %168 = vmatprep.mubr.f32.mxu0 %v4082_v3  ;;  %281 = vmatprep.mubr.f32.mxu1 %v4082_v3  ;;  %4149 = vst [vmem:[#allocation7_spill] sm:$0xff] %v2875_v61  ;;  %4150 = vst [vmem:[#allocation8_spill] sm:$0xff] %v2880_v62  ;;  %v29_v63 = vld [vmem:[%s4078_s0 + $0x30] sm:$0xff]  ;;  %v2892_v0 = vld [vmem:[%s4079_s3 + $0x68] sm:$0xff] }
  0x17   :  { %427 = vmatpush1.msra.mxu0 %v2710_v34  ;;  %498 = vmatpush1.msra.mxu1 %v2715_v35  ;;  %4151 = vst [vmem:[#allocation9_spill] sm:$0xff] %v2892_v0  ;;  %v2897_v1 = vld [vmem:[%s4079_s3 + $0x78] sm:$0xff]  ;;  %v2904_v2 = vld [vmem:[%s4079_s3 + $0x60] sm:$0xff]  ;;  %v2909_v4 = vld [vmem:[%s4079_s3 + $0x70] sm:$0xff] }
  0x18   :  { %2333 = vmatmul.mubr.msk.f32.gmra.mxu0 %vm61_vm0, %v26_v36  ;;  %2341 = vmatmul.mubr.msk.f32.gmra.mxu1 %vm61_vm0, %v26_v36  ;;  %4152 = vst [vmem:[#allocation10_spill] sm:$0xff] %v2897_v1  ;;  %4153 = vst [vmem:[#allocation11_spill] sm:$0xff] %v2904_v2  ;;  %v2916_v5 = vld [vmem:[%s4079_s3 + $0x48] sm:$0xff]  ;;  %v2921_v6 = vld [vmem:[%s4079_s3 + $0x58] sm:$0xff] }
  0x19   :  { %428 = vmatprep.subr.mxu0 %v2727_v37  ;;  %499 = vmatprep.subr.mxu1 %v2732_v38  ;;  %4154 = vst [vmem:[#allocation12_spill] sm:$0xff] %v2909_v4  ;;  %4155 = vst [vmem:[#allocation13_spill] sm:$0xff] %v2916_v5  ;;  %v2930_v7 = vld [vmem:[%s4079_s3 + $0x40] sm:$0xff]  ;;  %v2935_v8 = vld [vmem:[%s4079_s3 + $0x50] sm:$0xff] }
  0x1a   :  { %429 = vmatpush1.msra.mxu0 %v2739_v39  ;;  %500 = vmatpush1.msra.mxu1 %v2744_v40  ;;  %4156 = vst [vmem:[#allocation14_spill] sm:$0xff] %v2921_v6  ;;  %4157 = vst [vmem:[#allocation15_spill] sm:$0xff] %v2930_v7  ;;  %v30_v9 = vld [vmem:[%s4078_s0 + $0x38] sm:$0xff]  ;;  %v2947_v18 = vld [vmem:[%s4079_s3 + $0x28] sm:$0xff] }
  0x1b   :  { %430 = vmatprep.subr.mxu0 %v2751_v41  ;;  %501 = vmatprep.subr.mxu1 %v2756_v42  ;;  %4158 = vst [vmem:[#allocation16_spill] sm:$0xff] %v2935_v8  ;;  %4159 = vst [vmem:[#allocation17_spill] sm:$0xff] %v2947_v18  ;;  %v2952_v27 = vld [vmem:[%s4079_s3 + $0x38] sm:$0xff]  ;;  %v2959_v36 = vld [vmem:[%s4079_s3 + $0x20] sm:$0xff] }
  0x1c   :  { %174 = vmatprep.mubr.f32.mxu0 %v4082_v3  ;;  %287 = vmatprep.mubr.f32.mxu1 %v4082_v3  ;;  %4160 = vst [vmem:[#allocation18_spill] sm:$0xff] %v2952_v27  ;;  %4161 = vst [vmem:[#allocation19_spill] sm:$0xff] %v2959_v36 }
  0x1d   :  { %431 = vmatpush1.msra.mxu0 %v2765_v43  ;;  %502 = vmatpush1.msra.mxu1 %v2770_v44 }
  0x1e   :  { %2334 = vmatmul.mubr.msk.f32.gmra.mxu0 %vm61_vm0, %v27_v45  ;;  %2342 = vmatmul.mubr.msk.f32.gmra.mxu1 %vm61_vm0, %v27_v45  ;;  %v2964_v45 = vld [vmem:[%s4079_s3 + $0x30] sm:$0xff] }
  0x1f   :  { %432 = vmatprep.subr.mxu0 %v2782_v46  ;;  %503 = vmatprep.subr.mxu1 %v2787_v47  ;;  %4162 = vst [vmem:[#allocation20_spill] sm:$0xff] %v2964_v45 }
  0x20   :  { %433 = vmatpush1.msra.mxu0 %v2794_v48  ;;  %504 = vmatpush1.msra.mxu1 %v2799_v49 }
  0x21   :  { %434 = vmatprep.subr.mxu0 %v2806_v50  ;;  %505 = vmatprep.subr.mxu1 %v2811_v51 }
  0x22   :  { %180 = vmatprep.mubr.f32.mxu0 %v4082_v3  ;;  %293 = vmatprep.mubr.f32.mxu1 %v4082_v3 }
  0x23   :  { %435 = vmatpush1.msra.mxu0 %v2820_v52  ;;  %506 = vmatpush1.msra.mxu1 %v2825_v53 }
  0x24   :  { %2335 = vmatmul.mubr.msk.f32.gmra.mxu0 %vm61_vm0, %v28_v54  ;;  %2343 = vmatmul.mubr.msk.f32.gmra.mxu1 %vm61_vm0, %v28_v54  ;;  %v2971_v54 = vld [vmem:[%s4079_s3 + $0x8] sm:$0xff] }
  0x25   :  { %436 = vmatprep.subr.mxu0 %v2837_v55  ;;  %507 = vmatprep.subr.mxu1 %v2842_v56  ;;  %4163 = vst [vmem:[#allocation21_spill] sm:$0xff] %v2971_v54 }
  0x26   :  { %437 = vmatpush1.msra.mxu0 %v2849_v57  ;;  %508 = vmatpush1.msra.mxu1 %v2854_v58 }
  0x27   :  { %438 = vmatprep.subr.mxu0 %v2861_v59  ;;  %509 = vmatprep.subr.mxu1 %v2866_v60 }
  0x28   :  { %186 = vmatprep.mubr.f32.mxu0 %v4082_v3  ;;  %299 = vmatprep.mubr.f32.mxu1 %v4082_v3 }
  0x29   :  { %439 = vmatpush1.msra.mxu0 %v2875_v61  ;;  %510 = vmatpush1.msra.mxu1 %v2880_v62 }
  0x2a   :  { %2336 = vmatmul.mubr.msk.f32.gmra.mxu0 %vm61_vm0, %v29_v63  ;;  %2344 = vmatmul.mubr.msk.f32.gmra.mxu1 %vm61_vm0, %v29_v63  ;;  %v2976_v63 = vld [vmem:[%s4079_s3 + $0x18] sm:$0xff] }
  0x2b   :  { %440 = vmatprep.subr.mxu0 %v2892_v0  ;;  %511 = vmatprep.subr.mxu1 %v2897_v1  ;;  %4164 = vst [vmem:[#allocation22_spill] sm:$0xff] %v2976_v63 }
  0x2c   :  { %441 = vmatpush1.msra.mxu0 %v2904_v2  ;;  %512 = vmatpush1.msra.mxu1 %v2909_v4 }
  0x2d   :  { %442 = vmatprep.subr.mxu0 %v2916_v5  ;;  %513 = vmatprep.subr.mxu1 %v2921_v6 }
  0x2e   :  { %192 = vmatprep.mubr.f32.mxu0 %v4082_v3  ;;  %305 = vmatprep.mubr.f32.mxu1 %v4082_v3  ;;  %v2983_v3 = vld [vmem:[%s4079_s3] sm:$0xff] }
  0x2f   :  { %443 = vmatpush1.msra.mxu0 %v2930_v7  ;;  %514 = vmatpush1.msra.mxu1 %v2935_v8  ;;  %4165 = vst [vmem:[#allocation23_spill] sm:$0xff] %v2983_v3 }
  0x30   :  { %2337 = vmatmul.mubr.msk.f32.gmra.mxu0 %vm61_vm0, %v30_v9  ;;  %2345 = vmatmul.mubr.msk.f32.gmra.mxu1 %vm61_vm0, %v30_v9  ;;  %v2990_v9 = vld [vmem:[%s4079_s3 + $0x10] sm:$0xff] }
  0x31   :  { %444 = vmatprep.subr.mxu0 %v2947_v18  ;;  %515 = vmatprep.subr.mxu1 %v2952_v27  ;;  %4166 = vst [vmem:[#allocation24_spill] sm:$0xff] %v2990_v9  ;;  %v4167_v27 = vmov 0.0  }
  0x32   :  { %445 = vmatpush1.msra.mxu0 %v2959_v36  ;;  %516 = vmatpush1.msra.mxu1 %v2964_v45 }
  0x33   :  { %446 = vmatprep.subr.mxu0 %v2971_v54  ;;  %517 = vmatprep.subr.mxu1 %v2976_v63 }
  0x34   :  { %447 = vmatpush1.msra.mxu0 %v2983_v3  ;;  %480 = vmatprep.mubr.f32.mxu0 %v4167_v27 }
  0x35   :  { %518 = vmatpush1.msra.mxu1 %v2990_v9  ;;  %551 = vmatprep.mubr.f32.mxu1 %v4167_v27 }
  0x36   :  { %481 = vmatmul.mubr.f32.vlgmr.msra.gmra.mxu0 %v4167_v27  ;;  %552 = vmatmul.mubr.f32.vlgmr.msra.gmra.mxu1 %v4167_v27 }
  0x37   :  { %662 = vmatprep.subr.mxu0 %v2564_v10  ;;  %733 = vmatprep.subr.mxu1 %v2569_v11 }
  0x38   :  { %663 = vmatpush1.msra.mxu0 %v2574_v12  ;;  %734 = vmatpush1.msra.mxu1 %v2579_v13 }
  0x39   :  { %664 = vmatprep.subr.mxu0 %v2586_v14  ;;  %735 = vmatprep.subr.mxu1 %v2591_v15 }
  0x3a   :  { %665 = vmatpush1.msra.mxu0 %v2600_v16  ;;  %736 = vmatpush1.msra.mxu1 %v2605_v17 }
  0x3b   :  { %666 = vmatprep.subr.mxu0 %v2617_v19  ;;  %737 = vmatprep.subr.mxu1 %v2622_v20 }
  0x3c   :  { %667 = vmatpush1.msra.mxu0 %v2629_v21  ;;  %738 = vmatpush1.msra.mxu1 %v2634_v22 }
  0x3d   :  { %668 = vmatprep.subr.mxu0 %v2641_v23  ;;  %739 = vmatprep.subr.mxu1 %v2646_v24 }
  0x3e   :  { %669 = vmatpush1.msra.mxu0 %v2655_v25  ;;  %740 = vmatpush1.msra.mxu1 %v2660_v26 }
  0x3f   :  { %670 = vmatprep.subr.mxu0 %v2672_v28  ;;  %741 = vmatprep.subr.mxu1 %v2677_v29 }
  0x40   :  { %671 = vmatpush1.msra.mxu0 %v2684_v30  ;;  %742 = vmatpush1.msra.mxu1 %v2689_v31 }
  0x41   :  { %672 = vmatprep.subr.mxu0 %v2696_v32  ;;  %743 = vmatprep.subr.mxu1 %v2701_v33 }
  0x42   :  { %673 = vmatpush1.msra.mxu0 %v2710_v34  ;;  %744 = vmatpush1.msra.mxu1 %v2715_v35 }
  0x43   :  { %674 = vmatprep.subr.mxu0 %v2727_v37  ;;  %745 = vmatprep.subr.mxu1 %v2732_v38 }
  0x44   :  { %675 = vmatpush1.msra.mxu0 %v2739_v39  ;;  %746 = vmatpush1.msra.mxu1 %v2744_v40 }
  0x45   :  { %676 = vmatprep.subr.mxu0 %v2751_v41  ;;  %747 = vmatprep.subr.mxu1 %v2756_v42 }
  0x46   :  { %677 = vmatpush1.msra.mxu0 %v2765_v43  ;;  %748 = vmatpush1.msra.mxu1 %v2770_v44 }
  0x47   :  { %678 = vmatprep.subr.mxu0 %v2782_v46  ;;  %749 = vmatprep.subr.mxu1 %v2787_v47 }
  0x48   :  { %679 = vmatpush1.msra.mxu0 %v2794_v48  ;;  %750 = vmatpush1.msra.mxu1 %v2799_v49 }
  0x49   :  { %680 = vmatprep.subr.mxu0 %v2806_v50  ;;  %751 = vmatprep.subr.mxu1 %v2811_v51 }
  0x4a   :  { %681 = vmatpush1.msra.mxu0 %v2820_v52  ;;  %752 = vmatpush1.msra.mxu1 %v2825_v53 }
  0x4b   :  { %682 = vmatprep.subr.mxu0 %v2837_v55  ;;  %753 = vmatprep.subr.mxu1 %v2842_v56 }
  0x4c   :  { %683 = vmatpush1.msra.mxu0 %v2849_v57  ;;  %754 = vmatpush1.msra.mxu1 %v2854_v58 }
  0x4d   :  { %684 = vmatprep.subr.mxu0 %v2861_v59  ;;  %755 = vmatprep.subr.mxu1 %v2866_v60 }
  0x4e   :  { %685 = vmatpush1.msra.mxu0 %v2875_v61  ;;  %756 = vmatpush1.msra.mxu1 %v2880_v62  ;;  %v4168_v61 = vld [vmem:[#allocation18_spill] sm:$0xff] }
  0x4f   :  { %686 = vmatprep.subr.mxu0 %v2892_v0  ;;  %757 = vmatprep.subr.mxu1 %v2897_v1 }
  0x50   :  { %687 = vmatpush1.msra.mxu0 %v2904_v2  ;;  %758 = vmatpush1.msra.mxu1 %v2909_v4 }
  0x51   :  { %688 = vmatprep.subr.mxu0 %v2916_v5  ;;  %759 = vmatprep.subr.mxu1 %v2921_v6 }
  0x52   :  { %689 = vmatpush1.msra.mxu0 %v2930_v7  ;;  %760 = vmatpush1.msra.mxu1 %v2935_v8 }
  0x53   :  { %690 = vmatprep.subr.mxu0 %v2947_v18  ;;  %761 = vmatprep.subr.mxu1 %v4168_v61  ;;  %v41_v61 = vlaneseq }
  0x54   :  { %691 = vmatpush1.msra.mxu0 %v2959_v36  ;;  %762 = vmatpush1.msra.mxu1 %v2964_v45 }
  0x55   :  { %692 = vmatprep.subr.mxu0 %v2971_v54  ;;  %763 = vmatprep.subr.mxu1 %v2976_v63  ;;  %v42_v36 = vshrl.u32 %v41_v61, 7 }
  0x56   :  { %693 = vmatpush1.msra.mxu0 %v2983_v3  ;;  %726 = vmatprep.mubr.f32.mxu0 %v4167_v27  ;;  %v39_v3 = vld [vmem:[%s4080_s2] sm:$0xf] }
  0x57   :  { %764 = vmatpush1.msra.mxu1 %v2990_v9  ;;  %797 = vmatprep.mubr.f32.mxu1 %v4167_v27  ;;  %v43_v54 = vsub.s32 0, %v42_v36  ;;  %v51_v63 = vsub.s32 2, %v42_v36  ;;  %v47_v27 = vsub.s32 1, %v42_v36 }
  0x58   :  { %909 = vmatprep.subr.mxu0 %v2564_v10  ;;  %980 = vmatprep.subr.mxu1 %v2569_v11  ;;  %v55_v10 = vsub.s32 3, %v42_v36 }
  0x59   :  { %v44_v7 = vrot.slane %v39_v3, %v43_v54  ;;  %v3079_v11 = vrot.slane %v39_v3, %v51_v63  ;;  %v48_v5 = vrot.slane %v39_v3, %v47_v27 }
  0x5a   :  { %v3081_v4 = vrot.slane %v39_v3, %v55_v10 }
  0xc6   :  { %v3068_v18 = vpop.f32.mrf.mxu0  ;;  %v3070_v45 = vpop.f32.mrf.mxu1 }
  0xc8   :  { %v3075_v8 = vpop.f32.mrf.mxu0  ;;  %v3077_v9 = vpop.f32.mrf.mxu1 }
  0xcc   :  { %v158_v61 = vpop.f32.mrf.mxu0  ;;  %v271_v6 = vpop.f32.mrf.mxu1 }
  0xcd   :  { %v3083_v2 = vadd.f32 %v158_v61, %v44_v7  ;;  %v3086_v1 = vadd.f32 %v271_v6, %v3079_v11 }
  0xce   :  { %v160_v0 = vpop.f32.mrf.mxu0  ;;  %v273_v62 = vpop.f32.mrf.mxu1 }
  0xcf   :  { %4169 = vst [vmem:[#allocation25_spill] sm:$0xff] %v3083_v2  ;;  %4170 = vst [vmem:[#allocation26_spill] sm:$0xff] %v3086_v1  ;;  %v3088_v60 = vadd.f32 %v160_v0, %v48_v5  ;;  %v3091_v59 = vadd.f32 %v273_v62, %v3081_v4 }
  0xd1   :  { %4171 = vst [vmem:[#allocation27_spill] sm:$0xff] %v3088_v60  ;;  %4172 = vst [vmem:[#allocation28_spill] sm:$0xff] %v3091_v59 }
  0xd2   :  { %v164_v36 = vpop.f32.mrf.mxu0  ;;  %v277_v54 = vpop.f32.mrf.mxu1 }
  0xd3   :  { %v3093_v63 = vadd.f32 %v164_v36, %v44_v7  ;;  %v3096_v27 = vadd.f32 %v277_v54, %v3079_v11 }
  0xd4   :  { %v166_v3 = vpop.f32.mrf.mxu0  ;;  %v279_v10 = vpop.f32.mrf.mxu1 }
  0xd5   :  { %4173 = vst [vmem:[#allocation29_spill] sm:$0xff] %v3093_v63  ;;  %4174 = vst [vmem:[#allocation30_spill] sm:$0xff] %v3096_v27  ;;  %v3098_v61 = vadd.f32 %v166_v3, %v48_v5  ;;  %v3101_v6 = vadd.f32 %v279_v10, %v3081_v4 }
  0xd7   :  { %4175 = vst [vmem:[#allocation31_spill] sm:$0xff] %v3098_v61  ;;  %4176 = vst [vmem:[#allocation32_spill] sm:$0xff] %v3101_v6 }
  0xd8   :  { %v170_v1 = vpop.f32.mrf.mxu0  ;;  %v283_v0 = vpop.f32.mrf.mxu1 }
  0xd9   :  { %v3103_v60 = vadd.f32 %v170_v1, %v44_v7  ;;  %v3106_v62 = vadd.f32 %v283_v0, %v3079_v11 }
  0xda   :  { %v172_v59 = vpop.f32.mrf.mxu0  ;;  %v285_v36 = vpop.f32.mrf.mxu1 }
  0xdb   :  { %4177 = vst [vmem:[#allocation33_spill] sm:$0xff] %v3103_v60  ;;  %4178 = vst [vmem:[#allocation34_spill] sm:$0xff] %v3106_v62  ;;  %v3108_v63 = vadd.f32 %v172_v59, %v48_v5  ;;  %v3111_v54 = vadd.f32 %v285_v36, %v3081_v4 }
  0xdd   :  { %4179 = vst [vmem:[#allocation35_spill] sm:$0xff] %v3108_v63  ;;  %4180 = vst [vmem:[#allocation36_spill] sm:$0xff] %v3111_v54 }
  0xde   :  { %v176_v27 = vpop.f32.mrf.mxu0  ;;  %v289_v3 = vpop.f32.mrf.mxu1 }
  0xdf   :  { %v3113_v61 = vadd.f32 %v176_v27, %v44_v7  ;;  %v3116_v10 = vadd.f32 %v289_v3, %v3079_v11 }
  0xe0   :  { %v178_v6 = vpop.f32.mrf.mxu0  ;;  %v291_v1 = vpop.f32.mrf.mxu1 }
  0xe1   :  { %4181 = vst [vmem:[#allocation37_spill] sm:$0xff] %v3113_v61  ;;  %4182 = vst [vmem:[#allocation38_spill] sm:$0xff] %v3116_v10  ;;  %v3118_v60 = vadd.f32 %v178_v6, %v48_v5  ;;  %v3121_v0 = vadd.f32 %v291_v1, %v3081_v4 }
  0xe3   :  { %4183 = vst [vmem:[#allocation39_spill] sm:$0xff] %v3118_v60  ;;  %4184 = vst [vmem:[#allocation40_spill] sm:$0xff] %v3121_v0 }
  0xe4   :  { %v182_v62 = vpop.f32.mrf.mxu0  ;;  %v295_v59 = vpop.f32.mrf.mxu1 }
  0xe5   :  { %v3123_v63 = vadd.f32 %v182_v62, %v44_v7  ;;  %v3126_v36 = vadd.f32 %v295_v59, %v3079_v11 }
  0xe6   :  { %v184_v54 = vpop.f32.mrf.mxu0  ;;  %v297_v27 = vpop.f32.mrf.mxu1 }
  0xe7   :  { %4185 = vst [vmem:[#allocation41_spill] sm:$0xff] %v3123_v63  ;;  %4186 = vst [vmem:[#allocation42_spill] sm:$0xff] %v3126_v36  ;;  %v3128_v61 = vadd.f32 %v184_v54, %v48_v5  ;;  %v3131_v3 = vadd.f32 %v297_v27, %v3081_v4 }
  0xe9   :  { %4187 = vst [vmem:[#allocation43_spill] sm:$0xff] %v3128_v61  ;;  %4188 = vst [vmem:[#allocation44_spill] sm:$0xff] %v3131_v3 }
  0xea   :  { %v188_v10 = vpop.f32.mrf.mxu0  ;;  %v301_v6 = vpop.f32.mrf.mxu1 }
  0xeb   :  { %v3133_v60 = vadd.f32 %v188_v10, %v44_v7  ;;  %v3136_v1 = vadd.f32 %v301_v6, %v3079_v11 }
  0xec   :  { %v190_v0 = vpop.f32.mrf.mxu0  ;;  %v303_v62 = vpop.f32.mrf.mxu1 }
  0xed   :  { %4189 = vst [vmem:[#allocation45_spill] sm:$0xff] %v3133_v60  ;;  %4190 = vst [vmem:[#allocation46_spill] sm:$0xff] %v3136_v1  ;;  %v3138_v63 = vadd.f32 %v190_v0, %v48_v5  ;;  %v3141_v59 = vadd.f32 %v303_v62, %v3081_v4  ;;  %v153_v0 = vadd.f32 %v3068_v18, %v44_v7 }
  0xee   :  { %v155_v62 = vadd.f32 %v3075_v8, %v48_v5 }
  0xef   :  { %4191 = vst [vmem:[#allocation47_spill] sm:$0xff] %v3138_v63  ;;  %4192 = vst [vmem:[#allocation48_spill] sm:$0xff] %v3141_v59 }
  0xf0   :  { %v194_v36 = vpop.f32.mrf.mxu0  ;;  %v307_v54 = vpop.f32.mrf.mxu1 }
  0xf1   :  { %v3143_v61 = vadd.f32 %v194_v36, %v44_v7  ;;  %v3146_v27 = vadd.f32 %v307_v54, %v3079_v11 }
  0xf2   :  { %v196_v3 = vpop.f32.mrf.mxu0  ;;  %v309_v10 = vpop.f32.mrf.mxu1 }
  0xf3   :  { %4193 = vst [vmem:[#allocation49_spill] sm:$0xff] %v3143_v61  ;;  %4194 = vst [vmem:[#allocation50_spill] sm:$0xff] %v3146_v27  ;;  %v3148_v60 = vadd.f32 %v196_v3, %v48_v5  ;;  %v3151_v6 = vadd.f32 %v309_v10, %v3081_v4  ;;  %v268_v3 = vadd.f32 %v3077_v9, %v3081_v4 }
  0xf4   :  { %v266_v10 = vadd.f32 %v3070_v45, %v3079_v11 }
  0xf5   :  { %4195 = vst [vmem:[#allocation51_spill] sm:$0xff] %v3148_v60  ;;  %4196 = vst [vmem:[#allocation52_spill] sm:$0xff] %v3151_v6 }
  0xf6   :  { %v482_v1 = vpop.f32.mrf.mxu0  ;;  %v553_v61 = vpop.f32.mrf.mxu1 }
  0xf7   :  { %v558_v59 = vadd.f32 %v482_v1, %v153_v0  ;;  %v560_v6 = vadd.f32 %v553_v61, %v266_v10 }
  0xf8   :  { %v484_v63 = vpop.f32.mrf.mxu0  ;;  %v555_v27 = vpop.f32.mrf.mxu1 }
  0xf9   :  { %v2346_v2 = vmul.f32 -1.442695, %v558_v59  ;;  %v559_v36 = vadd.f32 %v484_v63, %v155_v62  ;;  %v561_v60 = vadd.f32 %v555_v27, %v268_v3 }
  0xfb   :  { %2378 = vpow2.f32 %v2346_v2  ;;  %v2347_v54 = vmul.f32 -1.442695, %v559_v36  ;;  %v2348_v7 = vmul.f32 -1.442695, %v561_v60 }
  0xfd   :  { %2380 = vpow2.f32 %v2347_v54 }
  0xfe   :  { %2382 = vpow2.f32 %v2348_v7 }
 0x108   :  { %v2379_v18 = vpop.eup %2378 }
 0x109   :  { %v565_v5 = vadd.f32 1.0, %v2379_v18 }
 0x10a   :  { %v2381_v8 = vpop.eup %2380 }
 0x10b   :  { %2384 = vrcp.f32 %v565_v5  ;;  %v571_v63 = vadd.f32 1.0, %v2381_v8  ;;  %v2383_v2 = vpop.eup %2382  ;;  %v3245_v8 = vld [vmem:[%s4079_s3 + $0x1e8] sm:$0xff] }
 0x10c   :  { %2386 = vtanh.f32 %v560_v6  ;;  %v578_v62 = vadd.f32 1.0, %v2383_v2  ;;  %v3257_v2 = vld [vmem:[%s4079_s3 + $0x1e0] sm:$0xff] }
 0x10d   :  { %2388 = vrcp.f32 %v571_v63  ;;  %v3250_v63 = vld [vmem:[%s4079_s3 + $0x1f8] sm:$0xff] }
 0x10e   :  { %2390 = vrcp.f32 %v578_v62  ;;  %v3281_v62 = vld [vmem:[%s4079_s3 + $0x1c0] sm:$0xff] }
 0x118   :  { %v2385_v1 = vpop.eup %2384 }
 0x119   :  { %v2387_v59 = vpop.eup %2386 }
 0x11a   :  { %v2389_v0 = vpop.eup %2388  ;;  %v583_v9 = vmul.f32 %v2387_v59, %v2385_v1  ;;  %v3262_v1 = vld [vmem:[%s4079_s3 + $0x1f0] sm:$0xff]  ;;  %v3269_v59 = vld [vmem:[%s4079_s3 + $0x1c8] sm:$0xff] }
 0x11b   :  { %v582_v4 = vmul.f32 0.0, %v2389_v0  ;;  %v2391_v60 = vpop.eup %2390  ;;  %v3274_v0 = vld [vmem:[%s4079_s3 + $0x1d8] sm:$0xff] }
 0x11d   :  { %v3159_v27 = vadd.f32 %v583_v9, %v582_v4  ;;  %v3286_v4 = vld [vmem:[%s4079_s3 + $0x1d0] sm:$0xff]  ;;  %v3293_v9 = vld [vmem:[%s4079_s3 + $0x1a8] sm:$0xff] }
 0x11f   :  { %2392 = vtanh.f32 %v3159_v27 }
 0x12c   :  { %v2393_v45 = vpop.eup %2392 }
 0x12d   :  { %v586_v11 = vmul.f32 %v2393_v45, %v2391_v60  ;;  %v3305_v60 = vld [vmem:[%s4079_s3 + $0x1a0] sm:$0xff]  ;;  %v3310_v45 = vld [vmem:[%s4079_s3 + $0x1b0] sm:$0xff] }
 0x12f   :  { %589 = vst [vmem:[%s4081_s4] sm:$0xff] %v586_v11  ;;  %727 = vmatmul.mubr.f32.vlgmr.msra.gmra.mxu0 %v586_v11  ;;  %798 = vmatmul.mubr.f32.vlgmr.msra.gmra.mxu1 %v586_v11  ;;  %v3317_v11 = vld [vmem:[%s4079_s3 + $0x188] sm:$0xff] }
 0x130   :  { %910 = vmatpush1.msra.mxu0 %v2574_v12  ;;  %981 = vmatpush1.msra.mxu1 %v2579_v13  ;;  %v4197_v12 = vld [vmem:[#allocation5_spill] sm:$0xff]  ;;  %v4198_v13 = vld [vmem:[#allocation6_spill] sm:$0xff] }
 0x131   :  { %911 = vmatprep.subr.mxu0 %v2586_v14  ;;  %982 = vmatprep.subr.mxu1 %v2591_v15  ;;  %v4199_v14 = vld [vmem:[#allocation7_spill] sm:$0xff]  ;;  %v4200_v15 = vld [vmem:[#allocation8_spill] sm:$0xff]  ;;  %4222 = vst [vmem:[#allocation5_spill] sm:$0xff] %v3245_v8  ;;  %4223 = vst [vmem:[#allocation6_spill] sm:$0xff] %v3250_v63 }
 0x132   :  { %912 = vmatpush1.msra.mxu0 %v2600_v16  ;;  %983 = vmatpush1.msra.mxu1 %v2605_v17  ;;  %v4201_v16 = vld [vmem:[#allocation9_spill] sm:$0xff]  ;;  %v4202_v17 = vld [vmem:[#allocation10_spill] sm:$0xff] }
 0x133   :  { %913 = vmatprep.subr.mxu0 %v2617_v19  ;;  %984 = vmatprep.subr.mxu1 %v2622_v20  ;;  %v4203_v19 = vld [vmem:[#allocation11_spill] sm:$0xff]  ;;  %v4204_v20 = vld [vmem:[#allocation12_spill] sm:$0xff] }
 0x134   :  { %914 = vmatpush1.msra.mxu0 %v2629_v21  ;;  %985 = vmatpush1.msra.mxu1 %v2634_v22  ;;  %v4205_v21 = vld [vmem:[#allocation13_spill] sm:$0xff]  ;;  %v4206_v22 = vld [vmem:[#allocation14_spill] sm:$0xff] }
 0x135   :  { %915 = vmatprep.subr.mxu0 %v2641_v23  ;;  %986 = vmatprep.subr.mxu1 %v2646_v24  ;;  %v4207_v23 = vld [vmem:[#allocation15_spill] sm:$0xff]  ;;  %v4208_v24 = vld [vmem:[#allocation16_spill] sm:$0xff] }
 0x136   :  { %916 = vmatpush1.msra.mxu0 %v2655_v25  ;;  %987 = vmatpush1.msra.mxu1 %v2660_v26  ;;  %v4209_v25 = vld [vmem:[#allocation17_spill] sm:$0xff]  ;;  %v4210_v26 = vld [vmem:[#allocation18_spill] sm:$0xff] }
 0x137   :  { %917 = vmatprep.subr.mxu0 %v2672_v28  ;;  %988 = vmatprep.subr.mxu1 %v2677_v29  ;;  %v4211_v28 = vld [vmem:[#allocation19_spill] sm:$0xff]  ;;  %v4212_v29 = vld [vmem:[#allocation20_spill] sm:$0xff] }
 0x138   :  { %918 = vmatpush1.msra.mxu0 %v2684_v30  ;;  %989 = vmatpush1.msra.mxu1 %v2689_v31  ;;  %v4213_v30 = vld [vmem:[#allocation21_spill] sm:$0xff]  ;;  %v4214_v31 = vld [vmem:[#allocation22_spill] sm:$0xff] }
 0x139   :  { %919 = vmatprep.subr.mxu0 %v2696_v32  ;;  %990 = vmatprep.subr.mxu1 %v2701_v33  ;;  %v4215_v32 = vld [vmem:[#allocation23_spill] sm:$0xff]  ;;  %v4216_v33 = vmov 0.0  }
 0x13a   :  { %920 = vmatpush1.msra.mxu0 %v2710_v34  ;;  %991 = vmatpush1.msra.mxu1 %v2715_v35  ;;  %v4217_v34 = vld [vmem:[#allocation24_spill] sm:$0xff] }
 0x13b   :  { %921 = vmatprep.subr.mxu0 %v2727_v37  ;;  %992 = vmatprep.subr.mxu1 %v2732_v38  ;;  %v4218_v37 = vld [vmem:[#allocation25_spill] sm:$0xff] }
 0x13c   :  { %922 = vmatpush1.msra.mxu0 %v2739_v39  ;;  %993 = vmatpush1.msra.mxu1 %v2744_v40 }
 0x13d   :  { %923 = vmatprep.subr.mxu0 %v2751_v41  ;;  %994 = vmatprep.subr.mxu1 %v2756_v42  ;;  %v4219_v41 = vld [vmem:[#allocation27_spill] sm:$0xff] }
 0x13e   :  { %924 = vmatpush1.msra.mxu0 %v2765_v43  ;;  %995 = vmatpush1.msra.mxu1 %v2770_v44 }
 0x13f   :  { %925 = vmatprep.subr.mxu0 %v2782_v46  ;;  %996 = vmatprep.subr.mxu1 %v2787_v47  ;;  %v4220_v47 = vld [vmem:[#allocation28_spill] sm:$0xff] }
 0x140   :  { %926 = vmatpush1.msra.mxu0 %v2794_v48  ;;  %997 = vmatpush1.msra.mxu1 %v2799_v49  ;;  %v4221_v49 = vld [vmem:[#allocation26_spill] sm:$0xff] }
 0x141   :  { %927 = vmatprep.subr.mxu0 %v2806_v50  ;;  %998 = vmatprep.subr.mxu1 %v2811_v51 }
 0x142   :  { %928 = vmatpush1.msra.mxu0 %v2820_v52  ;;  %999 = vmatpush1.msra.mxu1 %v2825_v53 }
 0x143   :  { %929 = vmatprep.subr.mxu0 %v2837_v55  ;;  %1000 = vmatprep.subr.mxu1 %v2842_v56 }
 0x144   :  { %930 = vmatpush1.msra.mxu0 %v2849_v57  ;;  %1001 = vmatpush1.msra.mxu1 %v2854_v58 }
 0x145   :  { %931 = vmatprep.subr.mxu0 %v4197_v12  ;;  %1002 = vmatprep.subr.mxu1 %v4198_v13  ;;  %v3322_v12 = vld [vmem:[%s4079_s3 + $0x198] sm:$0xff]  ;;  %v3329_v13 = vld [vmem:[%s4079_s3 + $0x180] sm:$0xff] }
 0x146   :  { %932 = vmatpush1.msra.mxu0 %v4199_v14  ;;  %1003 = vmatpush1.msra.mxu1 %v4200_v15  ;;  %v3334_v14 = vld [vmem:[%s4079_s3 + $0x190] sm:$0xff]  ;;  %v3341_v15 = vld [vmem:[%s4079_s3 + $0x168] sm:$0xff] }
 0x147   :  { %933 = vmatprep.subr.mxu0 %v4201_v16  ;;  %1004 = vmatprep.subr.mxu1 %v4202_v17  ;;  %v3346_v16 = vld [vmem:[%s4079_s3 + $0x178] sm:$0xff]  ;;  %v3353_v17 = vld [vmem:[%s4079_s3 + $0x160] sm:$0xff] }
 0x148   :  { %934 = vmatpush1.msra.mxu0 %v4203_v19  ;;  %1005 = vmatpush1.msra.mxu1 %v4204_v20  ;;  %v3358_v19 = vld [vmem:[%s4079_s3 + $0x170] sm:$0xff]  ;;  %v3365_v20 = vld [vmem:[%s4079_s3 + $0x148] sm:$0xff] }
 0x149   :  { %935 = vmatprep.subr.mxu0 %v4205_v21  ;;  %1006 = vmatprep.subr.mxu1 %v4206_v22  ;;  %v3370_v21 = vld [vmem:[%s4079_s3 + $0x158] sm:$0xff]  ;;  %v3377_v22 = vld [vmem:[%s4079_s3 + $0x140] sm:$0xff] }
 0x14a   :  { %936 = vmatpush1.msra.mxu0 %v4207_v23  ;;  %1007 = vmatpush1.msra.mxu1 %v4208_v24  ;;  %v3382_v23 = vld [vmem:[%s4079_s3 + $0x150] sm:$0xff]  ;;  %v3389_v24 = vld [vmem:[%s4079_s3 + $0x128] sm:$0xff] }
 0x14b   :  { %937 = vmatprep.subr.mxu0 %v4209_v25  ;;  %1008 = vmatprep.subr.mxu1 %v4210_v26  ;;  %v3394_v25 = vld [vmem:[%s4079_s3 + $0x138] sm:$0xff]  ;;  %v3401_v26 = vld [vmem:[%s4079_s3 + $0x120] sm:$0xff] }
 0x14c   :  { %938 = vmatpush1.msra.mxu0 %v4211_v28  ;;  %1009 = vmatpush1.msra.mxu1 %v4212_v29  ;;  %v3406_v28 = vld [vmem:[%s4079_s3 + $0x130] sm:$0xff]  ;;  %v3413_v29 = vld [vmem:[%s4079_s3 + $0x108] sm:$0xff] }
 0x14d   :  { %939 = vmatprep.subr.mxu0 %v4213_v30  ;;  %1010 = vmatprep.subr.mxu1 %v4214_v31  ;;  %v3418_v30 = vld [vmem:[%s4079_s3 + $0x118] sm:$0xff]  ;;  %v3423_v31 = vld [vmem:[%s4079_s3 + $0x100] sm:$0xff] }
 0x14e   :  { %940 = vmatpush1.msra.mxu0 %v4215_v32  ;;  %973 = vmatprep.mubr.f32.mxu0 %v4216_v33  ;;  %v3430_v32 = vld [vmem:[%s4079_s3 + $0x110] sm:$0xff] }
 0x14f   :  { %1011 = vmatpush1.msra.mxu1 %v4217_v34  ;;  %1044 = vmatprep.mubr.f32.mxu1 %v4216_v33  ;;  %v3435_v34 = vld [vmem:[%s4079_s3 + $0xe8] sm:$0xff] }
 0x150   :  { %1156 = vmatprep.subr.mxu0 %v3245_v8  ;;  %1227 = vmatprep.subr.mxu1 %v3250_v63 }
 0x1ef   :  { %v728_v35 = vpop.f32.mrf.mxu0  ;;  %v799_v43 = vpop.f32.mrf.mxu1 }
 0x1f0   :  { %v804_v38 = vadd.f32 %v728_v35, %v4218_v37  ;;  %v806_v50 = vadd.f32 %v799_v43, %v4221_v49  ;;  %v3440_v35 = vld [vmem:[%s4079_s3 + $0xf8] sm:$0xff]  ;;  %v3447_v37 = vld [vmem:[%s4079_s3 + $0xe0] sm:$0xff]  ;;  %v3481_v43 = vld [vmem:[%s4079_s3 + $0xa8] sm:$0xff] }
 0x1f1   :  { %v730_v39 = vpop.f32.mrf.mxu0  ;;  %v801_v46 = vpop.f32.mrf.mxu1  ;;  %v3510_v49 = vld [vmem:[%s4079_s3 + $0x98] sm:$0xff] }
 0x1f2   :  { %v2349_v40 = vmul.f32 -1.442695, %v804_v38  ;;  %v805_v42 = vadd.f32 %v730_v39, %v4219_v41  ;;  %v807_v48 = vadd.f32 %v801_v46, %v4220_v47  ;;  %v3452_v38 = vld [vmem:[%s4079_s3 + $0xf0] sm:$0xff]  ;;  %v3457_v39 = vld [vmem:[%s4079_s3 + $0xc8] sm:$0xff]  ;;  %v3469_v41 = vld [vmem:[%s4079_s3 + $0xc0] sm:$0xff] }
 0x1f3   :  { %v3493_v46 = vld [vmem:[%s4079_s3 + $0xa0] sm:$0xff]  ;;  %v3498_v47 = vld [vmem:[%s4079_s3 + $0xb0] sm:$0xff] }
 0x1f4   :  { %2394 = vpow2.f32 %v2349_v40  ;;  %v2350_v44 = vmul.f32 -1.442695, %v805_v42  ;;  %v2351_v51 = vmul.f32 -1.442695, %v807_v48  ;;  %v3464_v40 = vld [vmem:[%s4079_s3 + $0xd8] sm:$0xff]  ;;  %v3474_v42 = vld [vmem:[%s4079_s3 + $0xd0] sm:$0xff] }
 0x1f5   :  { %v3505_v48 = vld [vmem:[%s4079_s3 + $0x88] sm:$0xff] }
 0x1f6   :  { %2396 = vpow2.f32 %v2350_v44  ;;  %v3486_v44 = vld [vmem:[%s4079_s3 + $0xb8] sm:$0xff] }
 0x1f7   :  { %2398 = vtanh.f32 %v806_v50  ;;  %v3517_v50 = vld [vmem:[%s4079_s3 + $0x80] sm:$0xff] }
 0x1f8   :  { %2400 = vpow2.f32 %v2351_v51  ;;  %v3522_v51 = vld [vmem:[%s4079_s3 + $0x90] sm:$0xff] }
 0x1f9   :  { %4224 = vst [vmem:[#allocation7_spill] sm:$0xff] %v3522_v51 }
 0x201   :  { %v2395_v52 = vpop.eup %2394 }
 0x202   :  { %v811_v53 = vadd.f32 1.0, %v2395_v52  ;;  %v3529_v52 = vld [vmem:[%s4079_s3 + $0x68] sm:$0xff] }
 0x203   :  { %v2397_v55 = vpop.eup %2396  ;;  %4225 = vst [vmem:[#allocation8_spill] sm:$0xff] %v3529_v52 }
 0x204   :  { %2402 = vrcp.f32 %v811_v53  ;;  %v817_v56 = vadd.f32 1.0, %v2397_v55  ;;  %v2399_v57 = vpop.eup %2398  ;;  %v3534_v53 = vld [vmem:[%s4079_s3 + $0x78] sm:$0xff]  ;;  %v3541_v55 = vld [vmem:[%s4079_s3 + $0x60] sm:$0xff] }
 0x205   :  { %v2401_v58 = vpop.eup %2400  ;;  %4226 = vst [vmem:[#allocation9_spill] sm:$0xff] %v3534_v53  ;;  %4227 = vst [vmem:[#allocation10_spill] sm:$0xff] %v3541_v55 }
 0x206   :  { %2404 = vrcp.f32 %v817_v56  ;;  %v824_v54 = vadd.f32 1.0, %v2401_v58  ;;  %v3546_v56 = vld [vmem:[%s4079_s3 + $0x70] sm:$0xff]  ;;  %v3558_v58 = vld [vmem:[%s4079_s3 + $0x58] sm:$0xff] }
 0x207   :  { %4228 = vst [vmem:[#allocation11_spill] sm:$0xff] %v3546_v56  ;;  %4230 = vst [vmem:[#allocation13_spill] sm:$0xff] %v3558_v58 }
 0x208   :  { %2406 = vrcp.f32 %v824_v54  ;;  %v3582_v54 = vld [vmem:[%s4079_s3 + $0x38] sm:$0xff] }
 0x209   :  { %4234 = vst [vmem:[#allocation17_spill] sm:$0xff] %v3582_v54 }
 0x211   :  { %v2403_v61 = vpop.eup %2402 }
 0x212   :  { %v829_v6 = vmul.f32 %v2403_v61, %v2399_v57  ;;  %v3553_v57 = vld [vmem:[%s4079_s3 + $0x48] sm:$0xff]  ;;  %v3565_v61 = vld [vmem:[%s4079_s3 + $0x40] sm:$0xff] }
 0x213   :  { %v2405_v36 = vpop.eup %2404  ;;  %4229 = vst [vmem:[#allocation12_spill] sm:$0xff] %v3553_v57  ;;  %4231 = vst [vmem:[#allocation14_spill] sm:$0xff] %v3565_v61 }
 0x214   :  { %v828_v3 = vmul.f32 %v2405_v36, %v3159_v27  ;;  %v3298_v27 = vld [vmem:[%s4079_s3 + $0x1b8] sm:$0xff]  ;;  %v3577_v36 = vld [vmem:[%s4079_s3 + $0x28] sm:$0xff] }
 0x215   :  { %v2407_v7 = vpop.eup %2406  ;;  %4233 = vst [vmem:[#allocation16_spill] sm:$0xff] %v3577_v36 }
 0x216   :  { %v3234_v10 = vadd.f32 %v829_v6, %v828_v3  ;;  %v3570_v6 = vld [vmem:[%s4079_s3 + $0x50] sm:$0xff]  ;;  %v3589_v3 = vld [vmem:[%s4079_s3 + $0x20] sm:$0xff] }
 0x217   :  { %4232 = vst [vmem:[#allocation15_spill] sm:$0xff] %v3570_v6  ;;  %4235 = vst [vmem:[#allocation18_spill] sm:$0xff] %v3589_v3 }
 0x218   :  { %2408 = vtanh.f32 %v3234_v10 }
 0x225   :  { %v2409_v18 = vpop.eup %2408 }
 0x226   :  { %v832_v5 = vmul.f32 %v2409_v18, %v2407_v7  ;;  %v3594_v7 = vld [vmem:[%s4079_s3 + $0x30] sm:$0xff]  ;;  %v3601_v18 = vld [vmem:[%s4079_s3 + $0x8] sm:$0xff] }
 0x227   :  { %4236 = vst [vmem:[#allocation19_spill] sm:$0xff] %v3594_v7  ;;  %4237 = vst [vmem:[#allocation20_spill] sm:$0xff] %v3601_v18 }
 0x228   :  { %2352 = vst [vmem:[%s4081_s4 + $0x8] sm:$0xff] %v832_v5  ;;  %974 = vmatmul.mubr.f32.vlgmr.msra.gmra.mxu0 %v832_v5  ;;  %1045 = vmatmul.mubr.f32.vlgmr.msra.gmra.mxu1 %v832_v5  ;;  %v3606_v5 = vld [vmem:[%s4079_s3 + $0x18] sm:$0xff] }
 0x229   :  { %1220 = vmatprep.mubr.f32.mxu0 %v4216_v33  ;;  %1291 = vmatprep.mubr.f32.mxu1 %v4216_v33  ;;  %4238 = vst [vmem:[#allocation21_spill] sm:$0xff] %v3606_v5  ;;  %v3613_v33 = vld [vmem:[%s4079_s3] sm:$0xff] }
 0x22a   :  { %1157 = vmatpush1.msra.mxu0 %v3257_v2  ;;  %1228 = vmatpush1.msra.mxu1 %v3262_v1  ;;  %4239 = vst [vmem:[#allocation22_spill] sm:$0xff] %v3613_v33 }
 0x22b   :  { %1158 = vmatprep.subr.mxu0 %v3269_v59  ;;  %1229 = vmatprep.subr.mxu1 %v3274_v0 }
 0x22c   :  { %1159 = vmatpush1.msra.mxu0 %v3281_v62  ;;  %1230 = vmatpush1.msra.mxu1 %v3286_v4 }
 0x22d   :  { %1160 = vmatprep.subr.mxu0 %v3293_v9  ;;  %1231 = vmatprep.subr.mxu1 %v3298_v27 }
 0x22e   :  { %1161 = vmatpush1.msra.mxu0 %v3305_v60  ;;  %1232 = vmatpush1.msra.mxu1 %v3310_v45 }
 0x22f   :  { %1162 = vmatprep.subr.mxu0 %v3317_v11  ;;  %1233 = vmatprep.subr.mxu1 %v3322_v12 }
 0x230   :  { %1163 = vmatpush1.msra.mxu0 %v3329_v13  ;;  %1234 = vmatpush1.msra.mxu1 %v3334_v14 }
 0x231   :  { %1164 = vmatprep.subr.mxu0 %v3341_v15  ;;  %1235 = vmatprep.subr.mxu1 %v3346_v16 }
 0x232   :  { %1165 = vmatpush1.msra.mxu0 %v3353_v17  ;;  %1236 = vmatpush1.msra.mxu1 %v3358_v19 }
 0x233   :  { %1166 = vmatprep.subr.mxu0 %v3365_v20  ;;  %1237 = vmatprep.subr.mxu1 %v3370_v21 }
 0x234   :  { %1167 = vmatpush1.msra.mxu0 %v3377_v22  ;;  %1238 = vmatpush1.msra.mxu1 %v3382_v23 }
 0x235   :  { %1168 = vmatprep.subr.mxu0 %v3389_v24  ;;  %1239 = vmatprep.subr.mxu1 %v3394_v25 }
 0x236   :  { %1169 = vmatpush1.msra.mxu0 %v3401_v26  ;;  %1240 = vmatpush1.msra.mxu1 %v3406_v28 }
 0x237   :  { %1170 = vmatprep.subr.mxu0 %v3413_v29  ;;  %1241 = vmatprep.subr.mxu1 %v3418_v30 }
 0x238   :  { %1171 = vmatpush1.msra.mxu0 %v3423_v31  ;;  %1242 = vmatpush1.msra.mxu1 %v3430_v32 }
 0x239   :  { %1172 = vmatprep.subr.mxu0 %v3435_v34  ;;  %1243 = vmatprep.subr.mxu1 %v3440_v35 }
 0x23a   :  { %1173 = vmatpush1.msra.mxu0 %v3447_v37  ;;  %1244 = vmatpush1.msra.mxu1 %v3452_v38 }
 0x23b   :  { %1174 = vmatprep.subr.mxu0 %v3457_v39  ;;  %1245 = vmatprep.subr.mxu1 %v3464_v40 }
 0x23c   :  { %1175 = vmatpush1.msra.mxu0 %v3469_v41  ;;  %1246 = vmatpush1.msra.mxu1 %v3474_v42 }
 0x23d   :  { %1176 = vmatprep.subr.mxu0 %v3481_v43  ;;  %1247 = vmatprep.subr.mxu1 %v3486_v44 }
 0x23e   :  { %1177 = vmatpush1.msra.mxu0 %v3493_v46  ;;  %1248 = vmatpush1.msra.mxu1 %v3498_v47 }
 0x23f   :  { %1178 = vmatprep.subr.mxu0 %v3505_v48  ;;  %1249 = vmatprep.subr.mxu1 %v3510_v49 }
 0x240   :  { %1179 = vmatpush1.msra.mxu0 %v3517_v50  ;;  %1250 = vmatpush1.msra.mxu1 %v3522_v51 }
 0x241   :  { %1180 = vmatprep.subr.mxu0 %v3529_v52  ;;  %1251 = vmatprep.subr.mxu1 %v3534_v53  ;;  %v4244_v53 = vld [vmem:[#allocation30_spill] sm:$0xff] }
 0x242   :  { %1181 = vmatpush1.msra.mxu0 %v3541_v55  ;;  %1252 = vmatpush1.msra.mxu1 %v3546_v56  ;;  %v4243_v55 = vld [vmem:[#allocation32_spill] sm:$0xff] }
 0x243   :  { %1182 = vmatprep.subr.mxu0 %v3553_v57  ;;  %1253 = vmatprep.subr.mxu1 %v3558_v58 }
 0x244   :  { %1183 = vmatpush1.msra.mxu0 %v3565_v61  ;;  %1254 = vmatpush1.msra.mxu1 %v3570_v6  ;;  %v3618_v6 = vld [vmem:[%s4079_s3 + $0x10] sm:$0xff] }
 0x245   :  { %1184 = vmatprep.subr.mxu0 %v3577_v36  ;;  %1255 = vmatprep.subr.mxu1 %v3582_v54  ;;  %4240 = vst [vmem:[#allocation23_spill] sm:$0xff] %v3618_v6  ;;  %v4241_v36 = vld [vmem:[#allocation29_spill] sm:$0xff] }
 0x246   :  { %1185 = vmatpush1.msra.mxu0 %v3589_v3  ;;  %1256 = vmatpush1.msra.mxu1 %v3594_v7  ;;  %v4242_v3 = vld [vmem:[#allocation31_spill] sm:$0xff] }
 0x247   :  { %1186 = vmatprep.subr.mxu0 %v3601_v18  ;;  %1257 = vmatprep.subr.mxu1 %v3606_v5 }
 0x248   :  { %1187 = vmatpush1.msra.mxu0 %v3613_v33  ;;  %1258 = vmatpush1.msra.mxu1 %v3618_v6 }
 0x249   :  { %1403 = vmatprep.subr.mxu0 %v3245_v8  ;;  %1474 = vmatprep.subr.mxu1 %v3250_v63 }
 0x2e8   :  { %v975_v54 = vpop.f32.mrf.mxu0  ;;  %v1046_v7 = vpop.f32.mrf.mxu1 }
 0x2e9   :  { %v1051_v61 = vadd.f32 %v975_v54, %v4241_v36  ;;  %v1053_v6 = vadd.f32 %v1046_v7, %v4244_v53  ;;  %v4250_v7 = vld [vmem:[#allocation12_spill] sm:$0xff] }
 0x2ea   :  { %v977_v58 = vpop.f32.mrf.mxu0  ;;  %v1048_v5 = vpop.f32.mrf.mxu1 }
 0x2eb   :  { %v2353_v57 = vmul.f32 -1.442695, %v1051_v61  ;;  %v1052_v56 = vadd.f32 %v977_v58, %v4242_v3  ;;  %v1054_v33 = vadd.f32 %v1048_v5, %v4243_v55  ;;  %v4251_v5 = vld [vmem:[#allocation13_spill] sm:$0xff] }
 0x2ed   :  { %2410 = vpow2.f32 %v2353_v57  ;;  %v2354_v18 = vmul.f32 -1.442695, %v1052_v56  ;;  %v2355_v52 = vmul.f32 -1.442695, %v1054_v33 }
 0x2ef   :  { %2412 = vpow2.f32 %v2354_v18 }
 0x2f0   :  { %2414 = vtanh.f32 %v1053_v6  ;;  %v4249_v6 = vld [vmem:[#allocation11_spill] sm:$0xff] }
 0x2f1   :  { %2416 = vpow2.f32 %v2355_v52  ;;  %v4248_v52 = vld [vmem:[#allocation10_spill] sm:$0xff] }
 0x2fa   :  { %v2411_v8 = vpop.eup %2410 }
 0x2fb   :  { %v1058_v51 = vadd.f32 1.0, %v2411_v8 }
 0x2fc   :  { %v2413_v63 = vpop.eup %2412 }
 0x2fd   :  { %2418 = vrcp.f32 %v1058_v51  ;;  %v1064_v36 = vadd.f32 1.0, %v2413_v63  ;;  %v2415_v61 = vpop.eup %2414  ;;  %v4246_v63 = vld [vmem:[#allocation8_spill] sm:$0xff]  ;;  %v4247_v51 = vld [vmem:[#allocation9_spill] sm:$0xff] }
 0x2fe   :  { %v2417_v58 = vpop.eup %2416 }
 0x2ff   :  { %2420 = vrcp.f32 %v1064_v36  ;;  %v1071_v3 = vadd.f32 1.0, %v2417_v58  ;;  %v4252_v36 = vld [vmem:[#allocation14_spill] sm:$0xff]  ;;  %v4254_v58 = vld [vmem:[#allocation16_spill] sm:$0xff] }
 0x301   :  { %2422 = vrcp.f32 %v1071_v3  ;;  %v4258_v3 = vld [vmem:[#allocation20_spill] sm:$0xff] }
 0x30a   :  { %v2419_v57 = vpop.eup %2418 }
 0x30b   :  { %v1076_v54 = vmul.f32 %v2419_v57, %v2415_v61  ;;  %v4253_v61 = vld [vmem:[#allocation15_spill] sm:$0xff]  ;;  %v4255_v57 = vld [vmem:[#allocation17_spill] sm:$0xff] }
 0x30c   :  { %v2421_v56 = vpop.eup %2420 }
 0x30d   :  { %v1075_v18 = vmul.f32 %v2421_v56, %v3234_v10  ;;  %v4245_v10 = vld [vmem:[#allocation7_spill] sm:$0xff] }
 0x30e   :  { %v2423_v33 = vpop.eup %2422  ;;  %v4257_v56 = vld [vmem:[#allocation19_spill] sm:$0xff] }
 0x30f   :  { %v3633_v55 = vadd.f32 %v1076_v54, %v1075_v18  ;;  %v4256_v54 = vld [vmem:[#allocation18_spill] sm:$0xff]  ;;  %v4259_v18 = vld [vmem:[#allocation21_spill] sm:$0xff] }
 0x311   :  { %2424 = vtanh.f32 %v3633_v55 }
 0x31e   :  { %v2425_v8 = vpop.eup %2424 }
 0x31f   :  { %v1079_v53 = vmul.f32 %v2425_v8, %v2423_v33  ;;  %v4260_v33 = vld [vmem:[#allocation22_spill] sm:$0xff]  ;;  %v4261_v8 = vmov 0.0  }
 0x321   :  { %2356 = vst [vmem:[%s4081_s4 + $0x10] sm:$0xff] %v1079_v53  ;;  %1221 = vmatmul.mubr.f32.vlgmr.msra.gmra.mxu0 %v1079_v53  ;;  %1292 = vmatmul.mubr.f32.vlgmr.msra.gmra.mxu1 %v1079_v53  ;;  %v4262_v53 = vld [vmem:[#allocation23_spill] sm:$0xff] }
 0x322   :  { %1404 = vmatpush1.msra.mxu0 %v3257_v2  ;;  %1475 = vmatpush1.msra.mxu1 %v3262_v1 }
 0x323   :  { %1405 = vmatprep.subr.mxu0 %v3269_v59  ;;  %1476 = vmatprep.subr.mxu1 %v3274_v0 }
 0x324   :  { %1406 = vmatpush1.msra.mxu0 %v3281_v62  ;;  %1477 = vmatpush1.msra.mxu1 %v3286_v4 }
 0x325   :  { %1407 = vmatprep.subr.mxu0 %v3293_v9  ;;  %1478 = vmatprep.subr.mxu1 %v3298_v27 }
 0x326   :  { %1408 = vmatpush1.msra.mxu0 %v3305_v60  ;;  %1479 = vmatpush1.msra.mxu1 %v3310_v45 }
 0x327   :  { %1409 = vmatprep.subr.mxu0 %v3317_v11  ;;  %1480 = vmatprep.subr.mxu1 %v3322_v12 }
 0x328   :  { %1410 = vmatpush1.msra.mxu0 %v3329_v13  ;;  %1481 = vmatpush1.msra.mxu1 %v3334_v14 }
 0x329   :  { %1411 = vmatprep.subr.mxu0 %v3341_v15  ;;  %1482 = vmatprep.subr.mxu1 %v3346_v16 }
 0x32a   :  { %1412 = vmatpush1.msra.mxu0 %v3353_v17  ;;  %1483 = vmatpush1.msra.mxu1 %v3358_v19 }
 0x32b   :  { %1413 = vmatprep.subr.mxu0 %v3365_v20  ;;  %1484 = vmatprep.subr.mxu1 %v3370_v21 }
 0x32c   :  { %1414 = vmatpush1.msra.mxu0 %v3377_v22  ;;  %1485 = vmatpush1.msra.mxu1 %v3382_v23 }
 0x32d   :  { %1415 = vmatprep.subr.mxu0 %v3389_v24  ;;  %1486 = vmatprep.subr.mxu1 %v3394_v25 }
 0x32e   :  { %1416 = vmatpush1.msra.mxu0 %v3401_v26  ;;  %1487 = vmatpush1.msra.mxu1 %v3406_v28 }
 0x32f   :  { %1417 = vmatprep.subr.mxu0 %v3413_v29  ;;  %1488 = vmatprep.subr.mxu1 %v3418_v30 }
 0x330   :  { %1418 = vmatpush1.msra.mxu0 %v3423_v31  ;;  %1489 = vmatpush1.msra.mxu1 %v3430_v32 }
 0x331   :  { %1419 = vmatprep.subr.mxu0 %v3435_v34  ;;  %1490 = vmatprep.subr.mxu1 %v3440_v35 }
 0x332   :  { %1420 = vmatpush1.msra.mxu0 %v3447_v37  ;;  %1491 = vmatpush1.msra.mxu1 %v3452_v38 }
 0x333   :  { %1421 = vmatprep.subr.mxu0 %v3457_v39  ;;  %1492 = vmatprep.subr.mxu1 %v3464_v40 }
 0x334   :  { %1422 = vmatpush1.msra.mxu0 %v3469_v41  ;;  %1493 = vmatpush1.msra.mxu1 %v3474_v42 }
 0x335   :  { %1423 = vmatprep.subr.mxu0 %v3481_v43  ;;  %1494 = vmatprep.subr.mxu1 %v3486_v44 }
 0x336   :  { %1424 = vmatpush1.msra.mxu0 %v3493_v46  ;;  %1495 = vmatpush1.msra.mxu1 %v3498_v47 }
 0x337   :  { %1425 = vmatprep.subr.mxu0 %v3505_v48  ;;  %1496 = vmatprep.subr.mxu1 %v3510_v49 }
 0x338   :  { %1426 = vmatpush1.msra.mxu0 %v3517_v50  ;;  %1497 = vmatpush1.msra.mxu1 %v4245_v10 }
 0x339   :  { %1427 = vmatprep.subr.mxu0 %v4246_v63  ;;  %1498 = vmatprep.subr.mxu1 %v4247_v51  ;;  %v4268_v51 = vld [vmem:[#allocation34_spill] sm:$0xff] }
 0x33a   :  { %1428 = vmatpush1.msra.mxu0 %v4248_v52  ;;  %1499 = vmatpush1.msra.mxu1 %v4249_v6  ;;  %v4267_v52 = vld [vmem:[#allocation36_spill] sm:$0xff] }
 0x33b   :  { %1429 = vmatprep.subr.mxu0 %v4250_v7  ;;  %1500 = vmatprep.subr.mxu1 %v4251_v5 }
 0x33c   :  { %1430 = vmatpush1.msra.mxu0 %v4252_v36  ;;  %1501 = vmatpush1.msra.mxu1 %v4253_v61  ;;  %v4263_v61 = vld [vmem:[#allocation5_spill] sm:$0xff] }
 0x33d   :  { %1431 = vmatprep.subr.mxu0 %v4254_v58  ;;  %1502 = vmatprep.subr.mxu1 %v4255_v57  ;;  %v4264_v58 = vld [vmem:[#allocation6_spill] sm:$0xff] }
 0x33e   :  { %1432 = vmatpush1.msra.mxu0 %v4256_v54  ;;  %1503 = vmatpush1.msra.mxu1 %v4257_v56  ;;  %v4265_v54 = vld [vmem:[#allocation33_spill] sm:$0xff] }
 0x33f   :  { %1433 = vmatprep.subr.mxu0 %v4258_v3  ;;  %1504 = vmatprep.subr.mxu1 %v4259_v18  ;;  %v4266_v3 = vld [vmem:[#allocation35_spill] sm:$0xff] }
 0x340   :  { %1434 = vmatpush1.msra.mxu0 %v4260_v33  ;;  %1467 = vmatprep.mubr.f32.mxu0 %v4261_v8 }
 0x341   :  { %1505 = vmatpush1.msra.mxu1 %v4262_v53  ;;  %1538 = vmatprep.mubr.f32.mxu1 %v4261_v8 }
 0x342   :  { %1650 = vmatprep.subr.mxu0 %v4263_v61  ;;  %1721 = vmatprep.subr.mxu1 %v4264_v58 }
 0x3e1   :  { %v1222_v57 = vpop.f32.mrf.mxu0  ;;  %v1293_v18 = vpop.f32.mrf.mxu1 }
 0x3e2   :  { %v1298_v36 = vadd.f32 %v1222_v57, %v4265_v54  ;;  %v1300_v8 = vadd.f32 %v1293_v18, %v4268_v51  ;;  %v4273_v18 = vld [vmem:[#allocation11_spill] sm:$0xff] }
 0x3e3   :  { %v1224_v56 = vpop.f32.mrf.mxu0  ;;  %v1295_v6 = vpop.f32.mrf.mxu1 }
 0x3e4   :  { %v2357_v5 = vmul.f32 -1.442695, %v1298_v36  ;;  %v1299_v7 = vadd.f32 %v1224_v56, %v4266_v3  ;;  %v1301_v53 = vadd.f32 %v1295_v6, %v4267_v52 }
 0x3e6   :  { %2426 = vpow2.f32 %v2357_v5  ;;  %v2358_v33 = vmul.f32 -1.442695, %v1299_v7  ;;  %v2359_v63 = vmul.f32 -1.442695, %v1301_v53  ;;  %v4275_v53 = vld [vmem:[#allocation13_spill] sm:$0xff] }
 0x3e8   :  { %2428 = vpow2.f32 %v2358_v33 }
 0x3e9   :  { %2430 = vtanh.f32 %v1300_v8  ;;  %v4274_v8 = vld [vmem:[#allocation12_spill] sm:$0xff] }
 0x3ea   :  { %2432 = vpow2.f32 %v2359_v63  ;;  %v4271_v63 = vld [vmem:[#allocation9_spill] sm:$0xff] }
 0x3f3   :  { %v2427_v61 = vpop.eup %2426 }
 0x3f4   :  { %v1305_v10 = vadd.f32 1.0, %v2427_v61 }
 0x3f5   :  { %v2429_v58 = vpop.eup %2428 }
 0x3f6   :  { %2434 = vrcp.f32 %v1305_v10  ;;  %v1311_v57 = vadd.f32 1.0, %v2429_v58  ;;  %v2431_v36 = vpop.eup %2430  ;;  %v4270_v10 = vld [vmem:[#allocation8_spill] sm:$0xff]  ;;  %v4272_v58 = vld [vmem:[#allocation10_spill] sm:$0xff] }
 0x3f7   :  { %v2433_v54 = vpop.eup %2432 }
 0x3f8   :  { %2436 = vrcp.f32 %v1311_v57  ;;  %v1318_v3 = vadd.f32 1.0, %v2433_v54  ;;  %v4276_v57 = vld [vmem:[#allocation14_spill] sm:$0xff]  ;;  %v4278_v54 = vld [vmem:[#allocation16_spill] sm:$0xff] }
 0x3fa   :  { %2438 = vrcp.f32 %v1318_v3  ;;  %v4282_v3 = vld [vmem:[#allocation20_spill] sm:$0xff] }
 0x403   :  { %v2435_v5 = vpop.eup %2434 }
 0x404   :  { %v1323_v56 = vmul.f32 %v2435_v5, %v2431_v36  ;;  %v4277_v36 = vld [vmem:[#allocation15_spill] sm:$0xff]  ;;  %v4279_v5 = vld [vmem:[#allocation17_spill] sm:$0xff] }
 0x405   :  { %v2437_v7 = vpop.eup %2436 }
 0x406   :  { %v1322_v33 = vmul.f32 %v2437_v7, %v3633_v55  ;;  %v4269_v55 = vld [vmem:[#allocation7_spill] sm:$0xff] }
 0x407   :  { %v2439_v51 = vpop.eup %2438  ;;  %v4281_v7 = vld [vmem:[#allocation19_spill] sm:$0xff] }
 0x408   :  { %v3710_v52 = vadd.f32 %v1323_v56, %v1322_v33  ;;  %v4280_v56 = vld [vmem:[#allocation18_spill] sm:$0xff]  ;;  %v4283_v33 = vld [vmem:[#allocation21_spill] sm:$0xff] }
 0x40a   :  { %2440 = vtanh.f32 %v3710_v52 }
 0x417   :  { %v2441_v6 = vpop.eup %2440 }
 0x418   :  { %v1326_v61 = vmul.f32 %v2441_v6, %v2439_v51  ;;  %v4284_v51 = vld [vmem:[#allocation22_spill] sm:$0xff]  ;;  %v4285_v6 = vmov 0.0  }
 0x41a   :  { %2360 = vst [vmem:[%s4081_s4 + $0x18] sm:$0xff] %v1326_v61  ;;  %1468 = vmatmul.mubr.f32.vlgmr.msra.gmra.mxu0 %v1326_v61  ;;  %1539 = vmatmul.mubr.f32.vlgmr.msra.gmra.mxu1 %v1326_v61  ;;  %v4286_v61 = vld [vmem:[#allocation23_spill] sm:$0xff] }
 0x41b   :  { %1651 = vmatpush1.msra.mxu0 %v3257_v2  ;;  %1722 = vmatpush1.msra.mxu1 %v3262_v1 }
 0x41c   :  { %1652 = vmatprep.subr.mxu0 %v3269_v59  ;;  %1723 = vmatprep.subr.mxu1 %v3274_v0 }
 0x41d   :  { %1653 = vmatpush1.msra.mxu0 %v3281_v62  ;;  %1724 = vmatpush1.msra.mxu1 %v3286_v4 }
 0x41e   :  { %1654 = vmatprep.subr.mxu0 %v3293_v9  ;;  %1725 = vmatprep.subr.mxu1 %v3298_v27 }
 0x41f   :  { %1655 = vmatpush1.msra.mxu0 %v3305_v60  ;;  %1726 = vmatpush1.msra.mxu1 %v3310_v45 }
 0x420   :  { %1656 = vmatprep.subr.mxu0 %v3317_v11  ;;  %1727 = vmatprep.subr.mxu1 %v3322_v12 }
 0x421   :  { %1657 = vmatpush1.msra.mxu0 %v3329_v13  ;;  %1728 = vmatpush1.msra.mxu1 %v3334_v14 }
 0x422   :  { %1658 = vmatprep.subr.mxu0 %v3341_v15  ;;  %1729 = vmatprep.subr.mxu1 %v3346_v16 }
 0x423   :  { %1659 = vmatpush1.msra.mxu0 %v3353_v17  ;;  %1730 = vmatpush1.msra.mxu1 %v3358_v19 }
 0x424   :  { %1660 = vmatprep.subr.mxu0 %v3365_v20  ;;  %1731 = vmatprep.subr.mxu1 %v3370_v21 }
 0x425   :  { %1661 = vmatpush1.msra.mxu0 %v3377_v22  ;;  %1732 = vmatpush1.msra.mxu1 %v3382_v23 }
 0x426   :  { %1662 = vmatprep.subr.mxu0 %v3389_v24  ;;  %1733 = vmatprep.subr.mxu1 %v3394_v25 }
 0x427   :  { %1663 = vmatpush1.msra.mxu0 %v3401_v26  ;;  %1734 = vmatpush1.msra.mxu1 %v3406_v28 }
 0x428   :  { %1664 = vmatprep.subr.mxu0 %v3413_v29  ;;  %1735 = vmatprep.subr.mxu1 %v3418_v30 }
 0x429   :  { %1665 = vmatpush1.msra.mxu0 %v3423_v31  ;;  %1736 = vmatpush1.msra.mxu1 %v3430_v32 }
 0x42a   :  { %1666 = vmatprep.subr.mxu0 %v3435_v34  ;;  %1737 = vmatprep.subr.mxu1 %v3440_v35 }
 0x42b   :  { %1667 = vmatpush1.msra.mxu0 %v3447_v37  ;;  %1738 = vmatpush1.msra.mxu1 %v3452_v38 }
 0x42c   :  { %1668 = vmatprep.subr.mxu0 %v3457_v39  ;;  %1739 = vmatprep.subr.mxu1 %v3464_v40 }
 0x42d   :  { %1669 = vmatpush1.msra.mxu0 %v3469_v41  ;;  %1740 = vmatpush1.msra.mxu1 %v3474_v42 }
 0x42e   :  { %1670 = vmatprep.subr.mxu0 %v3481_v43  ;;  %1741 = vmatprep.subr.mxu1 %v3486_v44 }
 0x42f   :  { %1671 = vmatpush1.msra.mxu0 %v3493_v46  ;;  %1742 = vmatpush1.msra.mxu1 %v3498_v47 }
 0x430   :  { %1672 = vmatprep.subr.mxu0 %v3505_v48  ;;  %1743 = vmatprep.subr.mxu1 %v3510_v49 }
 0x431   :  { %1673 = vmatpush1.msra.mxu0 %v3517_v50  ;;  %1744 = vmatpush1.msra.mxu1 %v4269_v55 }
 0x432   :  { %1674 = vmatprep.subr.mxu0 %v4270_v10  ;;  %1745 = vmatprep.subr.mxu1 %v4271_v63  ;;  %v4292_v63 = vld [vmem:[#allocation38_spill] sm:$0xff] }
 0x433   :  { %1675 = vmatpush1.msra.mxu0 %v4272_v58  ;;  %1746 = vmatpush1.msra.mxu1 %v4273_v18  ;;  %v4291_v58 = vld [vmem:[#allocation40_spill] sm:$0xff] }
 0x434   :  { %1676 = vmatprep.subr.mxu0 %v4274_v8  ;;  %1747 = vmatprep.subr.mxu1 %v4275_v53 }
 0x435   :  { %1677 = vmatpush1.msra.mxu0 %v4276_v57  ;;  %1748 = vmatpush1.msra.mxu1 %v4277_v36  ;;  %v4287_v36 = vld [vmem:[#allocation5_spill] sm:$0xff] }
 0x436   :  { %1678 = vmatprep.subr.mxu0 %v4278_v54  ;;  %1749 = vmatprep.subr.mxu1 %v4279_v5  ;;  %v4288_v54 = vld [vmem:[#allocation6_spill] sm:$0xff] }
 0x437   :  { %1679 = vmatpush1.msra.mxu0 %v4280_v56  ;;  %1750 = vmatpush1.msra.mxu1 %v4281_v7  ;;  %v4289_v56 = vld [vmem:[#allocation37_spill] sm:$0xff] }
 0x438   :  { %1680 = vmatprep.subr.mxu0 %v4282_v3  ;;  %1751 = vmatprep.subr.mxu1 %v4283_v33  ;;  %v4290_v3 = vld [vmem:[#allocation39_spill] sm:$0xff] }
 0x439   :  { %1681 = vmatpush1.msra.mxu0 %v4284_v51  ;;  %1714 = vmatprep.mubr.f32.mxu0 %v4285_v6 }
 0x43a   :  { %1752 = vmatpush1.msra.mxu1 %v4286_v61  ;;  %1785 = vmatprep.mubr.f32.mxu1 %v4285_v6 }
 0x43b   :  { %1897 = vmatprep.subr.mxu0 %v4287_v36  ;;  %1968 = vmatprep.subr.mxu1 %v4288_v54 }
 0x4da   :  { %v1469_v5 = vpop.f32.mrf.mxu0  ;;  %v1540_v33 = vpop.f32.mrf.mxu1 }
 0x4db   :  { %v1545_v57 = vadd.f32 %v1469_v5, %v4289_v56  ;;  %v1547_v6 = vadd.f32 %v1540_v33, %v4292_v63 }
 0x4dc   :  { %v1471_v7 = vpop.f32.mrf.mxu0  ;;  %v1542_v18 = vpop.f32.mrf.mxu1 }
 0x4dd   :  { %v2361_v53 = vmul.f32 -1.442695, %v1545_v57  ;;  %v1546_v8 = vadd.f32 %v1471_v7, %v4290_v3  ;;  %v1548_v61 = vadd.f32 %v1542_v18, %v4291_v58 }
 0x4df   :  { %2442 = vpow2.f32 %v2361_v53  ;;  %v2362_v51 = vmul.f32 -1.442695, %v1546_v8  ;;  %v2363_v10 = vmul.f32 -1.442695, %v1548_v61  ;;  %v2143_v61 = vld [vmem:[%s4079_s3 + $0x1f8] sm:$0xff] }
 0x4e1   :  { %2444 = vpow2.f32 %v2362_v51 }
 0x4e2   :  { %2446 = vtanh.f32 %v1547_v6  ;;  %v2141_v6 = vld [vmem:[%s4079_s3 + $0x1e8] sm:$0xff] }
 0x4e3   :  { %2448 = vpow2.f32 %v2363_v10 }
 0x4ec   :  { %v2443_v36 = vpop.eup %2442 }
 0x4ed   :  { %v1552_v55 = vadd.f32 1.0, %v2443_v36  ;;  %v2140_v36 = vld [vmem:[%s4079_s3 + $0x1e0] sm:$0xff] }
 0x4ee   :  { %v2445_v54 = vpop.eup %2444 }
 0x4ef   :  { %2450 = vrcp.f32 %v1552_v55  ;;  %v1558_v5 = vadd.f32 1.0, %v2445_v54  ;;  %v2447_v57 = vpop.eup %2446  ;;  %v2142_v54 = vld [vmem:[%s4079_s3 + $0x1f0] sm:$0xff] }
 0x4f0   :  { %v2449_v56 = vpop.eup %2448 }
 0x4f1   :  { %2452 = vrcp.f32 %v1558_v5  ;;  %v1565_v3 = vadd.f32 1.0, %v2449_v56  ;;  %v2137_v5 = vld [vmem:[%s4079_s3 + $0x1c8] sm:$0xff]  ;;  %v2136_v56 = vld [vmem:[%s4079_s3 + $0x1c0] sm:$0xff] }
 0x4f3   :  { %2454 = vrcp.f32 %v1565_v3  ;;  %v2132_v3 = vld [vmem:[%s4079_s3 + $0x1a0] sm:$0xff] }
 0x4fc   :  { %v2451_v53 = vpop.eup %2450 }
 0x4fd   :  { %v1570_v7 = vmul.f32 %v2451_v53, %v2447_v57  ;;  %v2139_v57 = vld [vmem:[%s4079_s3 + $0x1d8] sm:$0xff]  ;;  %v2138_v53 = vld [vmem:[%s4079_s3 + $0x1d0] sm:$0xff] }
 0x4fe   :  { %v2453_v8 = vpop.eup %2452 }
 0x4ff   :  { %v1569_v51 = vmul.f32 %v2453_v8, %v3710_v52  ;;  %v2135_v8 = vld [vmem:[%s4079_s3 + $0x1b8] sm:$0xff] }
 0x500   :  { %v2455_v63 = vpop.eup %2454 }
 0x501   :  { %v3787_v58 = vadd.f32 %v1570_v7, %v1569_v51  ;;  %v2133_v7 = vld [vmem:[%s4079_s3 + $0x1a8] sm:$0xff]  ;;  %v2134_v51 = vld [vmem:[%s4079_s3 + $0x1b0] sm:$0xff] }
 0x503   :  { %2456 = vtanh.f32 %v3787_v58 }
 0x510   :  { %v2457_v18 = vpop.eup %2456 }
 0x511   :  { %v1573_v33 = vmul.f32 %v2457_v18, %v2455_v63  ;;  %v2131_v63 = vld [vmem:[%s4079_s3 + $0x198] sm:$0xff]  ;;  %v2128_v18 = vld [vmem:[%s4079_s3 + $0x180] sm:$0xff] }
 0x513   :  { %2364 = vst [vmem:[%s4081_s4 + $0x20] sm:$0xff] %v1573_v33  ;;  %1715 = vmatmul.mubr.f32.vlgmr.msra.gmra.mxu0 %v1573_v33  ;;  %1786 = vmatmul.mubr.f32.vlgmr.msra.gmra.mxu1 %v1573_v33  ;;  %v2130_v33 = vld [vmem:[%s4079_s3 + $0x190] sm:$0xff] }
 0x514   :  { %1898 = vmatpush1.msra.mxu0 %v3257_v2  ;;  %1969 = vmatpush1.msra.mxu1 %v3262_v1  ;;  %v4293_v2 = vld [vmem:[#allocation7_spill] sm:$0xff]  ;;  %v4294_v1 = vld [vmem:[#allocation8_spill] sm:$0xff] }
 0x515   :  { %1899 = vmatprep.subr.mxu0 %v3269_v59  ;;  %1970 = vmatprep.subr.mxu1 %v3274_v0  ;;  %v4295_v59 = vld [vmem:[#allocation9_spill] sm:$0xff]  ;;  %v4296_v0 = vld [vmem:[#allocation10_spill] sm:$0xff] }
 0x516   :  { %1900 = vmatpush1.msra.mxu0 %v3281_v62  ;;  %1971 = vmatpush1.msra.mxu1 %v3286_v4  ;;  %v4297_v62 = vld [vmem:[#allocation11_spill] sm:$0xff]  ;;  %v4298_v4 = vld [vmem:[#allocation12_spill] sm:$0xff] }
 0x517   :  { %1901 = vmatprep.subr.mxu0 %v3293_v9  ;;  %1972 = vmatprep.subr.mxu1 %v3298_v27  ;;  %v4299_v9 = vld [vmem:[#allocation13_spill] sm:$0xff]  ;;  %v4300_v27 = vld [vmem:[#allocation14_spill] sm:$0xff] }
 0x518   :  { %1902 = vmatpush1.msra.mxu0 %v3305_v60  ;;  %1973 = vmatpush1.msra.mxu1 %v3310_v45  ;;  %v4301_v60 = vld [vmem:[#allocation15_spill] sm:$0xff]  ;;  %v4302_v45 = vld [vmem:[#allocation16_spill] sm:$0xff] }
 0x519   :  { %1903 = vmatprep.subr.mxu0 %v3317_v11  ;;  %1974 = vmatprep.subr.mxu1 %v3322_v12  ;;  %v4303_v11 = vld [vmem:[#allocation17_spill] sm:$0xff]  ;;  %v4304_v12 = vld [vmem:[#allocation18_spill] sm:$0xff] }
 0x51a   :  { %1904 = vmatpush1.msra.mxu0 %v3329_v13  ;;  %1975 = vmatpush1.msra.mxu1 %v3334_v14  ;;  %v4305_v13 = vld [vmem:[#allocation19_spill] sm:$0xff]  ;;  %v4306_v14 = vld [vmem:[#allocation20_spill] sm:$0xff] }
 0x51b   :  { %1905 = vmatprep.subr.mxu0 %v3341_v15  ;;  %1976 = vmatprep.subr.mxu1 %v3346_v16  ;;  %v4307_v15 = vld [vmem:[#allocation21_spill] sm:$0xff]  ;;  %v4308_v16 = vld [vmem:[#allocation22_spill] sm:$0xff] }
 0x51c   :  { %1906 = vmatpush1.msra.mxu0 %v3353_v17  ;;  %1977 = vmatpush1.msra.mxu1 %v3358_v19  ;;  %v4309_v17 = vmov 0.0   ;;  %v4310_v19 = vld [vmem:[#allocation23_spill] sm:$0xff] }
 0x51d   :  { %1907 = vmatprep.subr.mxu0 %v3365_v20  ;;  %1978 = vmatprep.subr.mxu1 %v3370_v21  ;;  %v4311_v21 = vld [vmem:[#allocation41_spill] sm:$0xff] }
 0x51e   :  { %1908 = vmatpush1.msra.mxu0 %v3377_v22  ;;  %1979 = vmatpush1.msra.mxu1 %v3382_v23 }
 0x51f   :  { %1909 = vmatprep.subr.mxu0 %v3389_v24  ;;  %1980 = vmatprep.subr.mxu1 %v3394_v25  ;;  %v4312_v25 = vld [vmem:[#allocation43_spill] sm:$0xff] }
 0x520   :  { %1910 = vmatpush1.msra.mxu0 %v3401_v26  ;;  %1981 = vmatpush1.msra.mxu1 %v3406_v28 }
 0x521   :  { %1911 = vmatprep.subr.mxu0 %v3413_v29  ;;  %1982 = vmatprep.subr.mxu1 %v3418_v30 }
 0x522   :  { %1912 = vmatpush1.msra.mxu0 %v3423_v31  ;;  %1983 = vmatpush1.msra.mxu1 %v3430_v32  ;;  %v4313_v31 = vld [vmem:[#allocation44_spill] sm:$0xff] }
 0x523   :  { %1913 = vmatprep.subr.mxu0 %v3435_v34  ;;  %1984 = vmatprep.subr.mxu1 %v3440_v35  ;;  %v4314_v34 = vld [vmem:[#allocation42_spill] sm:$0xff] }
 0x524   :  { %1914 = vmatpush1.msra.mxu0 %v3447_v37  ;;  %1985 = vmatpush1.msra.mxu1 %v3452_v38 }
 0x525   :  { %1915 = vmatprep.subr.mxu0 %v3457_v39  ;;  %1986 = vmatprep.subr.mxu1 %v3464_v40 }
 0x526   :  { %1916 = vmatpush1.msra.mxu0 %v3469_v41  ;;  %1987 = vmatpush1.msra.mxu1 %v3474_v42 }
 0x527   :  { %1917 = vmatprep.subr.mxu0 %v3481_v43  ;;  %1988 = vmatprep.subr.mxu1 %v3486_v44 }
 0x528   :  { %1918 = vmatpush1.msra.mxu0 %v3493_v46  ;;  %1989 = vmatpush1.msra.mxu1 %v3498_v47 }
 0x529   :  { %1919 = vmatprep.subr.mxu0 %v3505_v48  ;;  %1990 = vmatprep.subr.mxu1 %v3510_v49 }
 0x52a   :  { %1920 = vmatpush1.msra.mxu0 %v3517_v50  ;;  %1991 = vmatpush1.msra.mxu1 %v4293_v2  ;;  %v2125_v2 = vld [vmem:[%s4079_s3 + $0x168] sm:$0xff] }
 0x52b   :  { %1921 = vmatprep.subr.mxu0 %v4294_v1  ;;  %1992 = vmatprep.subr.mxu1 %v4295_v59  ;;  %v2127_v1 = vld [vmem:[%s4079_s3 + $0x178] sm:$0xff]  ;;  %v2124_v59 = vld [vmem:[%s4079_s3 + $0x160] sm:$0xff] }
 0x52c   :  { %1922 = vmatpush1.msra.mxu0 %v4296_v0  ;;  %1993 = vmatpush1.msra.mxu1 %v4297_v62  ;;  %v2126_v0 = vld [vmem:[%s4079_s3 + $0x170] sm:$0xff]  ;;  %v2121_v62 = vld [vmem:[%s4079_s3 + $0x148] sm:$0xff] }
 0x52d   :  { %1923 = vmatprep.subr.mxu0 %v4298_v4  ;;  %1994 = vmatprep.subr.mxu1 %v4299_v9  ;;  %v2123_v4 = vld [vmem:[%s4079_s3 + $0x158] sm:$0xff]  ;;  %v2120_v9 = vld [vmem:[%s4079_s3 + $0x140] sm:$0xff] }
 0x52e   :  { %1924 = vmatpush1.msra.mxu0 %v4300_v27  ;;  %1995 = vmatpush1.msra.mxu1 %v4301_v60  ;;  %v2122_v27 = vld [vmem:[%s4079_s3 + $0x150] sm:$0xff]  ;;  %v2117_v60 = vld [vmem:[%s4079_s3 + $0x128] sm:$0xff] }
 0x52f   :  { %1925 = vmatprep.subr.mxu0 %v4302_v45  ;;  %1996 = vmatprep.subr.mxu1 %v4303_v11  ;;  %v2119_v45 = vld [vmem:[%s4079_s3 + $0x138] sm:$0xff]  ;;  %v2116_v11 = vld [vmem:[%s4079_s3 + $0x120] sm:$0xff] }
 0x530   :  { %1926 = vmatpush1.msra.mxu0 %v4304_v12  ;;  %1997 = vmatpush1.msra.mxu1 %v4305_v13  ;;  %v2118_v12 = vld [vmem:[%s4079_s3 + $0x130] sm:$0xff]  ;;  %v2113_v13 = vld [vmem:[%s4079_s3 + $0x108] sm:$0xff] }
 0x531   :  { %1927 = vmatprep.subr.mxu0 %v4306_v14  ;;  %1998 = vmatprep.subr.mxu1 %v4307_v15  ;;  %v2115_v14 = vld [vmem:[%s4079_s3 + $0x118] sm:$0xff]  ;;  %v2112_v15 = vld [vmem:[%s4079_s3 + $0x100] sm:$0xff] }
 0x532   :  { %1928 = vmatpush1.msra.mxu0 %v4308_v16  ;;  %1961 = vmatprep.mubr.f32.mxu0 %v4309_v17  ;;  %v2114_v16 = vld [vmem:[%s4079_s3 + $0x110] sm:$0xff] }
 0x533   :  { %1999 = vmatpush1.msra.mxu1 %v4310_v19  ;;  %2032 = vmatprep.mubr.f32.mxu1 %v4309_v17  ;;  %v2111_v19 = vld [vmem:[%s4079_s3 + $0xf8] sm:$0xff] }
 0x534   :  { %2144 = vmatprep.subr.mxu0 %v2141_v6  ;;  %2215 = vmatprep.subr.mxu1 %v2143_v61  ;;  %v2082_v6 = vld [vmem:[%s4079_s3 + $0x10] sm:$0xff] }
 0x5d3   :  { %v1716_v20 = vpop.f32.mrf.mxu0  ;;  %v1787_v28 = vpop.f32.mrf.mxu1 }
 0x5d4   :  { %v1792_v22 = vadd.f32 %v1716_v20, %v4311_v21  ;;  %v1794_v35 = vadd.f32 %v1787_v28, %v4314_v34  ;;  %v2108_v20 = vld [vmem:[%s4079_s3 + $0xe0] sm:$0xff]  ;;  %v2110_v21 = vld [vmem:[%s4079_s3 + $0xf0] sm:$0xff]  ;;  %v2103_v28 = vld [vmem:[%s4079_s3 + $0xb8] sm:$0xff] }
 0x5d5   :  { %v1718_v23 = vpop.f32.mrf.mxu0  ;;  %v1789_v30 = vpop.f32.mrf.mxu1  ;;  %v2096_v34 = vld [vmem:[%s4079_s3 + $0x80] sm:$0xff] }
 0x5d6   :  { %v2365_v24 = vmul.f32 -1.442695, %v1792_v22  ;;  %v1793_v26 = vadd.f32 %v1718_v23, %v4312_v25  ;;  %v1795_v32 = vadd.f32 %v1789_v30, %v4313_v31  ;;  %v2105_v22 = vld [vmem:[%s4079_s3 + $0xc8] sm:$0xff]  ;;  %v2107_v23 = vld [vmem:[%s4079_s3 + $0xd8] sm:$0xff]  ;;  %v2106_v25 = vld [vmem:[%s4079_s3 + $0xd0] sm:$0xff] }
 0x5d7   :  { %v2102_v30 = vld [vmem:[%s4079_s3 + $0xb0] sm:$0xff]  ;;  %v2097_v31 = vld [vmem:[%s4079_s3 + $0x88] sm:$0xff] }
 0x5d8   :  { %2458 = vpow2.f32 %v2365_v24  ;;  %v2366_v29 = vmul.f32 -1.442695, %v1793_v26  ;;  %v2367_v37 = vmul.f32 -1.442695, %v1795_v32  ;;  %v2104_v24 = vld [vmem:[%s4079_s3 + $0xc0] sm:$0xff]  ;;  %v2101_v26 = vld [vmem:[%s4079_s3 + $0xa8] sm:$0xff] }
 0x5d9   :  { %v2099_v32 = vld [vmem:[%s4079_s3 + $0x98] sm:$0xff] }
 0x5da   :  { %2460 = vpow2.f32 %v2366_v29  ;;  %v2100_v29 = vld [vmem:[%s4079_s3 + $0xa0] sm:$0xff] }
 0x5db   :  { %2462 = vtanh.f32 %v1794_v35  ;;  %v2098_v35 = vld [vmem:[%s4079_s3 + $0x90] sm:$0xff] }
 0x5dc   :  { %2464 = vpow2.f32 %v2367_v37  ;;  %v2093_v37 = vld [vmem:[%s4079_s3 + $0x68] sm:$0xff] }
 0x5e5   :  { %v2459_v38 = vpop.eup %2458 }
 0x5e6   :  { %v1799_v39 = vadd.f32 1.0, %v2459_v38  ;;  %v2095_v38 = vld [vmem:[%s4079_s3 + $0x78] sm:$0xff] }
 0x5e7   :  { %v2461_v40 = vpop.eup %2460 }
 0x5e8   :  { %2466 = vrcp.f32 %v1799_v39  ;;  %v1805_v41 = vadd.f32 1.0, %v2461_v40  ;;  %v2463_v42 = vpop.eup %2462  ;;  %v2092_v39 = vld [vmem:[%s4079_s3 + $0x60] sm:$0xff]  ;;  %v2094_v40 = vld [vmem:[%s4079_s3 + $0x70] sm:$0xff] }
 0x5e9   :  { %v2465_v43 = vpop.eup %2464 }
 0x5ea   :  { %2468 = vrcp.f32 %v1805_v41  ;;  %v1812_v48 = vadd.f32 1.0, %v2465_v43  ;;  %v2089_v41 = vld [vmem:[%s4079_s3 + $0x48] sm:$0xff]  ;;  %v2088_v43 = vld [vmem:[%s4079_s3 + $0x40] sm:$0xff] }
 0x5ec   :  { %2470 = vrcp.f32 %v1812_v48  ;;  %v2084_v48 = vld [vmem:[%s4079_s3 + $0x20] sm:$0xff] }
 0x5f5   :  { %v2467_v44 = vpop.eup %2466 }
 0x5f6   :  { %v1817_v46 = vmul.f32 %v2467_v44, %v2463_v42  ;;  %v2091_v42 = vld [vmem:[%s4079_s3 + $0x58] sm:$0xff]  ;;  %v2090_v44 = vld [vmem:[%s4079_s3 + $0x50] sm:$0xff] }
 0x5f7   :  { %v2469_v47 = vpop.eup %2468 }
 0x5f8   :  { %v1816_v49 = vmul.f32 %v2469_v47, %v3787_v58  ;;  %v2129_v58 = vld [vmem:[%s4079_s3 + $0x188] sm:$0xff]  ;;  %v2087_v47 = vld [vmem:[%s4079_s3 + $0x38] sm:$0xff] }
 0x5f9   :  { %v2471_v52 = vpop.eup %2470 }
 0x5fa   :  { %v3862_v50 = vadd.f32 %v1817_v46, %v1816_v49  ;;  %v2085_v46 = vld [vmem:[%s4079_s3 + $0x28] sm:$0xff]  ;;  %v2086_v49 = vld [vmem:[%s4079_s3 + $0x30] sm:$0xff] }
 0x5fc   :  { %2472 = vtanh.f32 %v3862_v50 }
 0x609   :  { %v2473_v55 = vpop.eup %2472 }
 0x60a   :  { %v1820_v10 = vmul.f32 %v2473_v55, %v2471_v52  ;;  %v2081_v52 = vld [vmem:[%s4079_s3 + $0x8] sm:$0xff]  ;;  %v2083_v55 = vld [vmem:[%s4079_s3 + $0x18] sm:$0xff] }
 0x60c   :  { %2368 = vst [vmem:[%s4081_s4 + $0x28] sm:$0xff] %v1820_v10  ;;  %1962 = vmatmul.mubr.f32.vlgmr.msra.gmra.mxu0 %v1820_v10  ;;  %2033 = vmatmul.mubr.f32.vlgmr.msra.gmra.mxu1 %v1820_v10  ;;  %v2080_v10 = vld [vmem:[%s4079_s3] sm:$0xff] }
 0x60d   :  { %2208 = vmatprep.mubr.f32.mxu0 %v4309_v17  ;;  %2279 = vmatprep.mubr.f32.mxu1 %v4309_v17  ;;  %v2109_v17 = vld [vmem:[%s4079_s3 + $0xe8] sm:$0xff] }
 0x60e   :  { %2145 = vmatpush1.msra.mxu0 %v2140_v36  ;;  %2216 = vmatpush1.msra.mxu1 %v2142_v54  ;;  %v4315_v36 = vld [vmem:[#allocation45_spill] sm:$0xff] }
 0x60f   :  { %2146 = vmatprep.subr.mxu0 %v2137_v5  ;;  %2217 = vmatprep.subr.mxu1 %v2139_v57 }
 0x610   :  { %2147 = vmatpush1.msra.mxu0 %v2136_v56  ;;  %2218 = vmatpush1.msra.mxu1 %v2138_v53  ;;  %v4316_v56 = vld [vmem:[#allocation47_spill] sm:$0xff] }
 0x611   :  { %2148 = vmatprep.subr.mxu0 %v2133_v7  ;;  %2219 = vmatprep.subr.mxu1 %v2135_v8 }
 0x612   :  { %2149 = vmatpush1.msra.mxu0 %v2132_v3  ;;  %2220 = vmatpush1.msra.mxu1 %v2134_v51  ;;  %v4317_v51 = vld [vmem:[#allocation48_spill] sm:$0xff] }
 0x613   :  { %2150 = vmatprep.subr.mxu0 %v2129_v58  ;;  %2221 = vmatprep.subr.mxu1 %v2131_v63  ;;  %v4318_v63 = vld [vmem:[#allocation46_spill] sm:$0xff] }
 0x614   :  { %2151 = vmatpush1.msra.mxu0 %v2128_v18  ;;  %2222 = vmatpush1.msra.mxu1 %v2130_v33 }
 0x615   :  { %2152 = vmatprep.subr.mxu0 %v2125_v2  ;;  %2223 = vmatprep.subr.mxu1 %v2127_v1 }
 0x616   :  { %2153 = vmatpush1.msra.mxu0 %v2124_v59  ;;  %2224 = vmatpush1.msra.mxu1 %v2126_v0 }
 0x617   :  { %2154 = vmatprep.subr.mxu0 %v2121_v62  ;;  %2225 = vmatprep.subr.mxu1 %v2123_v4 }
 0x618   :  { %2155 = vmatpush1.msra.mxu0 %v2120_v9  ;;  %2226 = vmatpush1.msra.mxu1 %v2122_v27 }
 0x619   :  { %2156 = vmatprep.subr.mxu0 %v2117_v60  ;;  %2227 = vmatprep.subr.mxu1 %v2119_v45 }
 0x61a   :  { %2157 = vmatpush1.msra.mxu0 %v2116_v11  ;;  %2228 = vmatpush1.msra.mxu1 %v2118_v12 }
 0x61b   :  { %2158 = vmatprep.subr.mxu0 %v2113_v13  ;;  %2229 = vmatprep.subr.mxu1 %v2115_v14 }
 0x61c   :  { %2159 = vmatpush1.msra.mxu0 %v2112_v15  ;;  %2230 = vmatpush1.msra.mxu1 %v2114_v16 }
 0x61d   :  { %2160 = vmatprep.subr.mxu0 %v2109_v17  ;;  %2231 = vmatprep.subr.mxu1 %v2111_v19  ;;  %v4319_v17 = vld [vmem:[#allocation49_spill] sm:$0xff] }
 0x61e   :  { %2161 = vmatpush1.msra.mxu0 %v2108_v20  ;;  %2232 = vmatpush1.msra.mxu1 %v2110_v21 }
 0x61f   :  { %2162 = vmatprep.subr.mxu0 %v2105_v22  ;;  %2233 = vmatprep.subr.mxu1 %v2107_v23  ;;  %v4320_v22 = vld [vmem:[#allocation51_spill] sm:$0xff] }
 0x620   :  { %2163 = vmatpush1.msra.mxu0 %v2104_v24  ;;  %2234 = vmatpush1.msra.mxu1 %v2106_v25 }
 0x621   :  { %2164 = vmatprep.subr.mxu0 %v2101_v26  ;;  %2235 = vmatprep.subr.mxu1 %v2103_v28  ;;  %v4321_v26 = vld [vmem:[#allocation52_spill] sm:$0xff] }
 0x622   :  { %2165 = vmatpush1.msra.mxu0 %v2100_v29  ;;  %2236 = vmatpush1.msra.mxu1 %v2102_v30  ;;  %v4322_v29 = vld [vmem:[#allocation50_spill] sm:$0xff] }
 0x623   :  { %2166 = vmatprep.subr.mxu0 %v2097_v31  ;;  %2237 = vmatprep.subr.mxu1 %v2099_v32 }
 0x624   :  { %2167 = vmatpush1.msra.mxu0 %v2096_v34  ;;  %2238 = vmatpush1.msra.mxu1 %v2098_v35 }
 0x625   :  { %2168 = vmatprep.subr.mxu0 %v2093_v37  ;;  %2239 = vmatprep.subr.mxu1 %v2095_v38 }
 0x626   :  { %2169 = vmatpush1.msra.mxu0 %v2092_v39  ;;  %2240 = vmatpush1.msra.mxu1 %v2094_v40 }
 0x627   :  { %2170 = vmatprep.subr.mxu0 %v2089_v41  ;;  %2241 = vmatprep.subr.mxu1 %v2091_v42 }
 0x628   :  { %2171 = vmatpush1.msra.mxu0 %v2088_v43  ;;  %2242 = vmatpush1.msra.mxu1 %v2090_v44 }
 0x629   :  { %2172 = vmatprep.subr.mxu0 %v2085_v46  ;;  %2243 = vmatprep.subr.mxu1 %v2087_v47 }
 0x62a   :  { %2173 = vmatpush1.msra.mxu0 %v2084_v48  ;;  %2244 = vmatpush1.msra.mxu1 %v2086_v49 }
 0x62b   :  { %2174 = vmatprep.subr.mxu0 %v2081_v52  ;;  %2245 = vmatprep.subr.mxu1 %v2083_v55 }
 0x62c   :  { %2175 = vmatpush1.msra.mxu0 %v2080_v10  ;;  %2246 = vmatpush1.msra.mxu1 %v2082_v6 }
 0x6cc   :  { %v1963_v61 = vpop.f32.mrf.mxu0  ;;  %v2034_v7 = vpop.f32.mrf.mxu1 }
 0x6cd   :  { %v2039_v54 = vadd.f32 %v1963_v61, %v4315_v36  ;;  %v2041_v18 = vadd.f32 %v2034_v7, %v4318_v63 }
 0x6ce   :  { %v1965_v5 = vpop.f32.mrf.mxu0  ;;  %v2036_v3 = vpop.f32.mrf.mxu1 }
 0x6cf   :  { %v2369_v57 = vmul.f32 -1.442695, %v2039_v54  ;;  %v2040_v53 = vadd.f32 %v1965_v5, %v4316_v56  ;;  %v2042_v58 = vadd.f32 %v2036_v3, %v4317_v51 }
 0x6d1   :  { %2474 = vpow2.f32 %v2369_v57  ;;  %v2370_v8 = vmul.f32 -1.442695, %v2040_v53  ;;  %v2371_v33 = vmul.f32 -1.442695, %v2042_v58 }
 0x6d3   :  { %2476 = vpow2.f32 %v2370_v8 }
 0x6d4   :  { %2478 = vtanh.f32 %v2041_v18 }
 0x6d5   :  { %2480 = vpow2.f32 %v2371_v33 }
 0x6de   :  { %v2475_v2 = vpop.eup %2474 }
 0x6df   :  { %v2046_v1 = vadd.f32 1.0, %v2475_v2 }
 0x6e0   :  { %v2477_v59 = vpop.eup %2476 }
 0x6e1   :  { %2482 = vrcp.f32 %v2046_v1  ;;  %v2052_v0 = vadd.f32 1.0, %v2477_v59  ;;  %v2479_v62 = vpop.eup %2478 }
 0x6e2   :  { %v2481_v4 = vpop.eup %2480 }
 0x6e3   :  { %2484 = vrcp.f32 %v2052_v0  ;;  %v2059_v45 = vadd.f32 1.0, %v2481_v4 }
 0x6e5   :  { %2486 = vrcp.f32 %v2059_v45 }
 0x6ee   :  { %v2483_v9 = vpop.eup %2482 }
 0x6ef   :  { %v2064_v27 = vmul.f32 %v2483_v9, %v2479_v62 }
 0x6f0   :  { %v2485_v60 = vpop.eup %2484 }
 0x6f1   :  { %v2063_v11 = vmul.f32 %v2485_v60, %v3862_v50 }
 0x6f2   :  { %v2487_v13 = vpop.eup %2486 }
 0x6f3   :  { %v2065_v12 = vadd.f32 %v2064_v27, %v2063_v11 }
 0x6f5   :  { %2488 = vtanh.f32 %v2065_v12 }
 0x702   :  { %v2489_v14 = vpop.eup %2488 }
 0x703   :  { %v2067_v15 = vmul.f32 %v2489_v14, %v2487_v13 }
 0x705   :  { %2372 = vst [vmem:[%s4081_s4 + $0x30] sm:$0xff] %v2067_v15  ;;  %2209 = vmatmul.mubr.f32.vlgmr.msra.gmra.mxu0 %v2067_v15  ;;  %2280 = vmatmul.mubr.f32.vlgmr.msra.gmra.mxu1 %v2067_v15 }
 0x7c5   :  { %v2210_v16 = vpop.f32.mrf.mxu0  ;;  %v2281_v50 = vpop.f32.mrf.mxu1 }
 0x7c6   :  { %v2286_v19 = vadd.f32 %v2210_v16, %v4319_v17  ;;  %v2288_v30 = vadd.f32 %v2281_v50, %v4322_v29 }
 0x7c7   :  { %v2212_v20 = vpop.f32.mrf.mxu0  ;;  %v2283_v25 = vpop.f32.mrf.mxu1 }
 0x7c8   :  { %v2373_v21 = vmul.f32 -1.442695, %v2286_v19  ;;  %v2287_v23 = vadd.f32 %v2212_v20, %v4320_v22  ;;  %v2289_v28 = vadd.f32 %v2283_v25, %v4321_v26 }
 0x7ca   :  { %2490 = vpow2.f32 %v2373_v21  ;;  %v2374_v24 = vmul.f32 -1.442695, %v2287_v23  ;;  %v2375_v31 = vmul.f32 -1.442695, %v2289_v28 }
 0x7cc   :  { %2492 = vpow2.f32 %v2374_v24 }
 0x7cd   :  { %2494 = vtanh.f32 %v2288_v30 }
 0x7ce   :  { %2496 = vpow2.f32 %v2375_v31 }
 0x7d7   :  { %v2491_v32 = vpop.eup %2490 }
 0x7d8   :  { %v2293_v34 = vadd.f32 1.0, %v2491_v32 }
 0x7d9   :  { %v2493_v35 = vpop.eup %2492 }
 0x7da   :  { %2498 = vrcp.f32 %v2293_v34  ;;  %v2299_v37 = vadd.f32 1.0, %v2493_v35  ;;  %v2495_v38 = vpop.eup %2494 }
 0x7db   :  { %v2497_v39 = vpop.eup %2496 }
 0x7dc   :  { %2500 = vrcp.f32 %v2299_v37  ;;  %v2306_v43 = vadd.f32 1.0, %v2497_v39 }
 0x7de   :  { %2502 = vrcp.f32 %v2306_v43 }
 0x7e7   :  { %v2499_v40 = vpop.eup %2498 }
 0x7e8   :  { %v2311_v41 = vmul.f32 %v2499_v40, %v2495_v38 }
 0x7e9   :  { %v2501_v42 = vpop.eup %2500 }
 0x7ea   :  { %v2310_v44 = vmul.f32 %v2501_v42, %v2065_v12 }
 0x7eb   :  { %v2503_v47 = vpop.eup %2502 }
 0x7ec   :  { %v2312_v46 = vadd.f32 %v2311_v41, %v2310_v44 }
 0x7ee   :  { %2504 = vtanh.f32 %v2312_v46 }
 0x7fb   :  { %v2505_v48 = vpop.eup %2504 }
 0x7fc   :  { %v2314_v49 = vmul.f32 %v2505_v48, %v2503_v47 }
 0x7fe   :  { %2376 = vst [vmem:[%s4081_s4 + $0x38] sm:$0xff] %v2314_v49 }

// kernel: lstm_model.3
= control target key start
LH: loop header
LB: loop body
LE: loop exit
PB: predicated region body
PF: predicated region fallthrough
CT: control target
= control target key end

     0   :  { %v4634_v3 = vmov 0.0   ;;  %s4627_s1 = inlined_call_operand.vmem [shape: f32[128,512], index: 1, kind: input, shape index: {}]   ;;  %s4628_s3 = inlined_call_operand.vmem [shape: f32[128,512], index: 3, kind: input, shape index: {}]   ;;  %s4629_s0 = inlined_call_operand.vmem [shape: f32[64,128], index: 0, kind: input, shape index: {}]   ;;  %s4630_s2 = inlined_call_operand.vmem [shape: f32[1,512], index: 2, kind: input, shape index: {}]   ;;  %s4631_s4 = inlined_call_operand.vmem [shape: f32[128,128], index: 4, kind: input, shape index: {}]   ;;  %s4632_s5 = inlined_call_operand.vmem [shape: f32[1,128], index: 5, kind: input, shape index: {}]   ;;  %s4633_s6 = inlined_call_operand.vmem [shape: f32[64,128], index: 6, kind: output, shape index: {}]  }
   0x1   :  { %v98_v0 = vld [vmem:[%s4627_s1 + $0x1e8] sm:$0xff]  ;;  %v97_v1 = vld [vmem:[%s4627_s1 + $0x1e0] sm:$0xff]  ;;  %187 = vmatprep.mubr.f32.mxu1 %v4634_v3  ;;  %517 = vmatprep.mubr.f32.mxu0 %v4634_v3 }
   0x2   :  { %v94_v2 = vld [vmem:[%s4627_s1 + $0x1c8] sm:$0xff]  ;;  %123 = vmatprep.subr.mxu1 %v98_v0  ;;  %v93_v5 = vld [vmem:[%s4627_s1 + $0x1c0] sm:$0xff] }
   0x3   :  { %v2783_v4 = vld [vmem:[%s4628_s3 + $0x1e8] sm:$0xff]  ;;  %v2791_v6 = vld [vmem:[%s4628_s3 + $0x1e0] sm:$0xff]  ;;  %124 = vmatpush1.msra.mxu1 %v97_v1  ;;  %v100_v1 = vld [vmem:[%s4627_s1 + $0x1f8] sm:$0xff] }
   0x4   :  { %453 = vmatprep.subr.mxu0 %v2783_v4  ;;  %v90_v7 = vld [vmem:[%s4627_s1 + $0x1a8] sm:$0xff]  ;;  %125 = vmatprep.subr.mxu1 %v94_v2  ;;  %v89_v9 = vld [vmem:[%s4627_s1 + $0x1a0] sm:$0xff]  ;;  %v99_v2 = vld [vmem:[%s4627_s1 + $0x1f0] sm:$0xff] }
   0x5   :  { %v2800_v8 = vld [vmem:[%s4628_s3 + $0x1c8] sm:$0xff]  ;;  %454 = vmatpush1.msra.mxu0 %v2791_v6  ;;  %v2809_v10 = vld [vmem:[%s4628_s3 + $0x1c0] sm:$0xff]  ;;  %126 = vmatpush1.msra.mxu1 %v93_v5 }
   0x6   :  { %v2814_v11 = vld [vmem:[%s4628_s3 + $0x1a8] sm:$0xff]  ;;  %455 = vmatprep.subr.mxu0 %v2800_v8  ;;  %v2823_v13 = vld [vmem:[%s4628_s3 + $0x1a0] sm:$0xff]  ;;  %127 = vmatprep.subr.mxu1 %v90_v7  ;;  %v96_v7 = vld [vmem:[%s4627_s1 + $0x1d8] sm:$0xff] }
   0x7   :  { %v86_v12 = vld [vmem:[%s4627_s1 + $0x188] sm:$0xff]  ;;  %456 = vmatpush1.msra.mxu0 %v2809_v10  ;;  %v85_v14 = vld [vmem:[%s4627_s1 + $0x180] sm:$0xff]  ;;  %128 = vmatpush1.msra.mxu1 %v89_v9  ;;  %v95_v9 = vld [vmem:[%s4627_s1 + $0x1d0] sm:$0xff] }
   0x8   :  { %v2832_v15 = vld [vmem:[%s4628_s3 + $0x188] sm:$0xff]  ;;  %457 = vmatprep.subr.mxu0 %v2814_v11  ;;  %v2841_v17 = vld [vmem:[%s4628_s3 + $0x180] sm:$0xff]  ;;  %129 = vmatprep.subr.mxu1 %v86_v12 }
   0x9   :  { %v82_v16 = vld [vmem:[%s4627_s1 + $0x168] sm:$0xff]  ;;  %458 = vmatpush1.msra.mxu0 %v2823_v13  ;;  %v81_v18 = vld [vmem:[%s4627_s1 + $0x160] sm:$0xff]  ;;  %130 = vmatpush1.msra.mxu1 %v85_v14  ;;  %v92_v14 = vld [vmem:[%s4627_s1 + $0x1b8] sm:$0xff] }
   0xa   :  { %v2850_v19 = vld [vmem:[%s4628_s3 + $0x168] sm:$0xff]  ;;  %459 = vmatprep.subr.mxu0 %v2832_v15  ;;  %v2859_v21 = vld [vmem:[%s4628_s3 + $0x160] sm:$0xff]  ;;  %131 = vmatprep.subr.mxu1 %v82_v16  ;;  %v91_v16 = vld [vmem:[%s4627_s1 + $0x1b0] sm:$0xff] }
   0xb   :  { %v78_v20 = vld [vmem:[%s4627_s1 + $0x148] sm:$0xff]  ;;  %460 = vmatpush1.msra.mxu0 %v2841_v17  ;;  %v77_v22 = vld [vmem:[%s4627_s1 + $0x140] sm:$0xff]  ;;  %132 = vmatpush1.msra.mxu1 %v81_v18  ;;  %v88_v18 = vld [vmem:[%s4627_s1 + $0x198] sm:$0xff] }
   0xc   :  { %v2868_v23 = vld [vmem:[%s4628_s3 + $0x148] sm:$0xff]  ;;  %461 = vmatprep.subr.mxu0 %v2850_v19  ;;  %v2877_v25 = vld [vmem:[%s4628_s3 + $0x140] sm:$0xff]  ;;  %133 = vmatprep.subr.mxu1 %v78_v20  ;;  %v87_v20 = vld [vmem:[%s4627_s1 + $0x190] sm:$0xff] }
   0xd   :  { %v74_v24 = vld [vmem:[%s4627_s1 + $0x128] sm:$0xff]  ;;  %462 = vmatpush1.msra.mxu0 %v2859_v21  ;;  %v73_v26 = vld [vmem:[%s4627_s1 + $0x120] sm:$0xff]  ;;  %134 = vmatpush1.msra.mxu1 %v77_v22  ;;  %v3101_v22 = vld [vmem:[%s4629_s0 + $0x10] sm:$0xff] }
   0xe   :  { %v2886_v27 = vld [vmem:[%s4628_s3 + $0x128] sm:$0xff]  ;;  %463 = vmatprep.subr.mxu0 %v2868_v23  ;;  %v2895_v29 = vld [vmem:[%s4628_s3 + $0x120] sm:$0xff]  ;;  %135 = vmatprep.subr.mxu1 %v74_v24  ;;  %v84_v24 = vld [vmem:[%s4627_s1 + $0x178] sm:$0xff] }
   0xf   :  { %v70_v28 = vld [vmem:[%s4627_s1 + $0x108] sm:$0xff]  ;;  %464 = vmatpush1.msra.mxu0 %v2877_v25  ;;  %v69_v30 = vld [vmem:[%s4627_s1 + $0x100] sm:$0xff]  ;;  %136 = vmatpush1.msra.mxu1 %v73_v26  ;;  %v83_v26 = vld [vmem:[%s4627_s1 + $0x170] sm:$0xff] }
  0x10   :  { %v2904_v31 = vld [vmem:[%s4628_s3 + $0x108] sm:$0xff]  ;;  %465 = vmatprep.subr.mxu0 %v2886_v27  ;;  %v2913_v33 = vld [vmem:[%s4628_s3 + $0x100] sm:$0xff]  ;;  %137 = vmatprep.subr.mxu1 %v70_v28  ;;  %v80_v28 = vld [vmem:[%s4627_s1 + $0x158] sm:$0xff] }
  0x11   :  { %v66_v32 = vld [vmem:[%s4627_s1 + $0xe8] sm:$0xff]  ;;  %466 = vmatpush1.msra.mxu0 %v2895_v29  ;;  %v65_v34 = vld [vmem:[%s4627_s1 + $0xe0] sm:$0xff]  ;;  %138 = vmatpush1.msra.mxu1 %v69_v30  ;;  %v79_v30 = vld [vmem:[%s4627_s1 + $0x150] sm:$0xff] }
  0x12   :  { %v2922_v35 = vld [vmem:[%s4628_s3 + $0xe8] sm:$0xff]  ;;  %467 = vmatprep.subr.mxu0 %v2904_v31  ;;  %v2931_v37 = vld [vmem:[%s4628_s3 + $0xe0] sm:$0xff]  ;;  %139 = vmatprep.subr.mxu1 %v66_v32  ;;  %v76_v32 = vld [vmem:[%s4627_s1 + $0x138] sm:$0xff] }
  0x13   :  { %v62_v36 = vld [vmem:[%s4627_s1 + $0xc8] sm:$0xff]  ;;  %468 = vmatpush1.msra.mxu0 %v2913_v33  ;;  %v61_v38 = vld [vmem:[%s4627_s1 + $0xc0] sm:$0xff]  ;;  %140 = vmatpush1.msra.mxu1 %v65_v34  ;;  %v72_v34 = vld [vmem:[%s4627_s1 + $0x118] sm:$0xff] }
  0x14   :  { %v2940_v39 = vld [vmem:[%s4628_s3 + $0xc8] sm:$0xff]  ;;  %469 = vmatprep.subr.mxu0 %v2922_v35  ;;  %v2949_v41 = vld [vmem:[%s4628_s3 + $0xc0] sm:$0xff]  ;;  %141 = vmatprep.subr.mxu1 %v62_v36  ;;  %v71_v36 = vld [vmem:[%s4627_s1 + $0x110] sm:$0xff] }
  0x15   :  { %v58_v40 = vld [vmem:[%s4627_s1 + $0xa8] sm:$0xff]  ;;  %470 = vmatpush1.msra.mxu0 %v2931_v37  ;;  %v57_v42 = vld [vmem:[%s4627_s1 + $0xa0] sm:$0xff]  ;;  %142 = vmatpush1.msra.mxu1 %v61_v38  ;;  %v68_v38 = vld [vmem:[%s4627_s1 + $0xf8] sm:$0xff] }
  0x16   :  { %v2958_v43 = vld [vmem:[%s4628_s3 + $0xa8] sm:$0xff]  ;;  %471 = vmatprep.subr.mxu0 %v2940_v39  ;;  %v2967_v45 = vld [vmem:[%s4628_s3 + $0xa0] sm:$0xff]  ;;  %143 = vmatprep.subr.mxu1 %v58_v40  ;;  %v64_v40 = vld [vmem:[%s4627_s1 + $0xd8] sm:$0xff] }
  0x17   :  { %v54_v44 = vld [vmem:[%s4627_s1 + $0x88] sm:$0xff]  ;;  %472 = vmatpush1.msra.mxu0 %v2949_v41  ;;  %v53_v46 = vld [vmem:[%s4627_s1 + $0x80] sm:$0xff]  ;;  %144 = vmatpush1.msra.mxu1 %v57_v42  ;;  %v63_v42 = vld [vmem:[%s4627_s1 + $0xd0] sm:$0xff] }
  0x18   :  { %v2976_v47 = vld [vmem:[%s4628_s3 + $0x88] sm:$0xff]  ;;  %473 = vmatprep.subr.mxu0 %v2958_v43  ;;  %v2985_v49 = vld [vmem:[%s4628_s3 + $0x80] sm:$0xff]  ;;  %145 = vmatprep.subr.mxu1 %v54_v44  ;;  %v60_v44 = vld [vmem:[%s4627_s1 + $0xb8] sm:$0xff] }
  0x19   :  { %v50_v48 = vld [vmem:[%s4627_s1 + $0x68] sm:$0xff]  ;;  %474 = vmatpush1.msra.mxu0 %v2967_v45  ;;  %v49_v50 = vld [vmem:[%s4627_s1 + $0x60] sm:$0xff]  ;;  %146 = vmatpush1.msra.mxu1 %v53_v46  ;;  %v56_v46 = vld [vmem:[%s4627_s1 + $0x98] sm:$0xff] }
  0x1a   :  { %v2994_v51 = vld [vmem:[%s4628_s3 + $0x68] sm:$0xff]  ;;  %475 = vmatprep.subr.mxu0 %v2976_v47  ;;  %v3003_v53 = vld [vmem:[%s4628_s3 + $0x60] sm:$0xff]  ;;  %147 = vmatprep.subr.mxu1 %v50_v48  ;;  %v55_v48 = vld [vmem:[%s4627_s1 + $0x90] sm:$0xff] }
  0x1b   :  { %v46_v52 = vld [vmem:[%s4627_s1 + $0x48] sm:$0xff]  ;;  %476 = vmatpush1.msra.mxu0 %v2985_v49  ;;  %v45_v54 = vld [vmem:[%s4627_s1 + $0x40] sm:$0xff]  ;;  %148 = vmatpush1.msra.mxu1 %v49_v50  ;;  %v52_v50 = vld [vmem:[%s4627_s1 + $0x78] sm:$0xff] }
  0x1c   :  { %v3012_v55 = vld [vmem:[%s4628_s3 + $0x48] sm:$0xff]  ;;  %477 = vmatprep.subr.mxu0 %v2994_v51  ;;  %v3021_v57 = vld [vmem:[%s4628_s3 + $0x40] sm:$0xff]  ;;  %149 = vmatprep.subr.mxu1 %v46_v52  ;;  %v48_v52 = vld [vmem:[%s4627_s1 + $0x58] sm:$0xff] }
  0x1d   :  { %v42_v56 = vld [vmem:[%s4627_s1 + $0x28] sm:$0xff]  ;;  %478 = vmatpush1.msra.mxu0 %v3003_v53  ;;  %v41_v58 = vld [vmem:[%s4627_s1 + $0x20] sm:$0xff]  ;;  %150 = vmatpush1.msra.mxu1 %v45_v54  ;;  %v47_v54 = vld [vmem:[%s4627_s1 + $0x50] sm:$0xff] }
  0x1e   :  { %v3030_v59 = vld [vmem:[%s4628_s3 + $0x28] sm:$0xff]  ;;  %479 = vmatprep.subr.mxu0 %v3012_v55  ;;  %v3039_v61 = vld [vmem:[%s4628_s3 + $0x20] sm:$0xff]  ;;  %151 = vmatprep.subr.mxu1 %v42_v56  ;;  %v44_v56 = vld [vmem:[%s4627_s1 + $0x38] sm:$0xff] }
  0x1f   :  { %v38_v60 = vld [vmem:[%s4627_s1 + $0x8] sm:$0xff]  ;;  %480 = vmatpush1.msra.mxu0 %v3021_v57  ;;  %v37_v62 = vld [vmem:[%s4627_s1] sm:$0xff]  ;;  %152 = vmatpush1.msra.mxu1 %v41_v58  ;;  %v40_v58 = vld [vmem:[%s4627_s1 + $0x18] sm:$0xff] }
  0x20   :  { %v3048_v63 = vld [vmem:[%s4628_s3 + $0x8] sm:$0xff]  ;;  %481 = vmatprep.subr.mxu0 %v3030_v59  ;;  %v3054_v0 = vld [vmem:[%s4629_s0] sm:$0xff]  ;;  %153 = vmatprep.subr.mxu1 %v38_v60  ;;  %v39_v60 = vld [vmem:[%s4627_s1 + $0x10] sm:$0xff] }
  0x21   :  { %482 = vmatpush1.msra.mxu0 %v3039_v61  ;;  %v3066_v5 = vld [vmem:[%s4628_s3] sm:$0xff]  ;;  %154 = vmatpush1.msra.mxu1 %v37_v62  ;;  %v3080_v12 = vld [vmem:[%s4629_s0 + $0x8] sm:$0xff]  ;;  %v3238_v62 = vld [vmem:[%s4628_s3 + $0x1d8] sm:$0xff] }
  0x22   :  { %483 = vmatprep.subr.mxu0 %v3048_v63  ;;  %188 = vmatmul.mubr.f32.vlgmr.msra.gmra.mxu1 %v3054_v0 }
  0x23   :  { %236 = vmatprep.subr.mxu1 %v100_v1  ;;  %484 = vmatpush1.msra.mxu0 %v3066_v5  ;;  %v3246_v1 = vld [vmem:[%s4628_s3 + $0x1d0] sm:$0xff] }
  0x24   :  { %237 = vmatpush1.msra.mxu1 %v99_v2  ;;  %518 = vmatmul.mubr.f32.vlgmr.msra.gmra.mxu0 %v4634_v3  ;;  %v3274_v2 = vld [vmem:[%s4628_s3 + $0x190] sm:$0xff] }
  0x25   :  { %238 = vmatprep.subr.mxu1 %v96_v7  ;;  %193 = vmatprep.mubr.f32.mxu1 %v4634_v3  ;;  %v3294_v7 = vld [vmem:[%s4628_s3 + $0x158] sm:$0xff] }
  0x26   :  { %239 = vmatpush1.msra.mxu1 %v95_v9  ;;  %699 = vmatprep.subr.mxu0 %v2783_v4  ;;  %v3122_v4 = vld [vmem:[%s4629_s0 + $0x18] sm:$0xff]  ;;  %v3302_v9 = vld [vmem:[%s4628_s3 + $0x150] sm:$0xff] }
  0x27   :  { %194 = vmatmul.mubr.f32.gmra.mxu1 %v3080_v12  ;;  %240 = vmatprep.subr.mxu1 %v92_v14  ;;  %v3330_v14 = vld [vmem:[%s4628_s3 + $0x110] sm:$0xff] }
  0x28   :  { %241 = vmatpush1.msra.mxu1 %v91_v16  ;;  %199 = vmatprep.mubr.f32.mxu1 %v4634_v3  ;;  %v3350_v16 = vld [vmem:[%s4628_s3 + $0xd8] sm:$0xff] }
  0x29   :  { %242 = vmatprep.subr.mxu1 %v88_v18  ;;  %700 = vmatpush1.msra.mxu0 %v2791_v6  ;;  %v75_v6 = vld [vmem:[%s4627_s1 + $0x130] sm:$0xff] }
  0x2a   :  { %243 = vmatpush1.msra.mxu1 %v87_v20  ;;  %701 = vmatprep.subr.mxu0 %v2800_v8  ;;  %v3143_v8 = vld [vmem:[%s4629_s0 + $0x20] sm:$0xff]  ;;  %v3358_v18 = vld [vmem:[%s4628_s3 + $0xd0] sm:$0xff]  ;;  %v3378_v20 = vld [vmem:[%s4628_s3 + $0x98] sm:$0xff] }
  0x2b   :  { %200 = vmatmul.mubr.f32.gmra.mxu1 %v3101_v22  ;;  %244 = vmatprep.subr.mxu1 %v84_v24  ;;  %v3406_v24 = vld [vmem:[%s4628_s3 + $0x58] sm:$0xff] }
  0x2c   :  { %245 = vmatpush1.msra.mxu1 %v83_v26  ;;  %205 = vmatprep.mubr.f32.mxu1 %v4634_v3  ;;  %v3414_v26 = vld [vmem:[%s4628_s3 + $0x50] sm:$0xff] }
  0x2d   :  { %246 = vmatprep.subr.mxu1 %v80_v28  ;;  %702 = vmatpush1.msra.mxu0 %v2809_v10  ;;  %v67_v10 = vld [vmem:[%s4627_s1 + $0xf0] sm:$0xff]  ;;  %v3434_v28 = vld [vmem:[%s4628_s3 + $0x18] sm:$0xff] }
  0x2e   :  { %247 = vmatpush1.msra.mxu1 %v79_v30  ;;  %703 = vmatprep.subr.mxu0 %v2814_v11  ;;  %v3164_v11 = vld [vmem:[%s4629_s0 + $0x28] sm:$0xff]  ;;  %v3442_v30 = vld [vmem:[%s4628_s3 + $0x10] sm:$0xff] }
  0x2f   :  { %206 = vmatmul.mubr.f32.gmra.mxu1 %v3122_v4  ;;  %248 = vmatprep.subr.mxu1 %v76_v32 }
  0x30   :  { %249 = vmatpush1.msra.mxu1 %v75_v6  ;;  %211 = vmatprep.mubr.f32.mxu1 %v4634_v3 }
  0x31   :  { %250 = vmatprep.subr.mxu1 %v72_v34  ;;  %704 = vmatpush1.msra.mxu0 %v2823_v13  ;;  %v59_v13 = vld [vmem:[%s4627_s1 + $0xb0] sm:$0xff] }
  0x32   :  { %251 = vmatpush1.msra.mxu1 %v71_v36  ;;  %705 = vmatprep.subr.mxu0 %v2832_v15  ;;  %v3185_v15 = vld [vmem:[%s4629_s0 + $0x30] sm:$0xff] }
  0x33   :  { %212 = vmatmul.mubr.f32.gmra.mxu1 %v3143_v8  ;;  %252 = vmatprep.subr.mxu1 %v68_v38 }
  0x34   :  { %253 = vmatpush1.msra.mxu1 %v67_v10  ;;  %217 = vmatprep.mubr.f32.mxu1 %v4634_v3 }
  0x35   :  { %254 = vmatprep.subr.mxu1 %v64_v40  ;;  %706 = vmatpush1.msra.mxu0 %v2841_v17  ;;  %v51_v17 = vld [vmem:[%s4627_s1 + $0x70] sm:$0xff] }
  0x36   :  { %255 = vmatpush1.msra.mxu1 %v63_v42  ;;  %707 = vmatprep.subr.mxu0 %v2850_v19  ;;  %v3206_v19 = vld [vmem:[%s4629_s0 + $0x38] sm:$0xff] }
  0x37   :  { %218 = vmatmul.mubr.f32.gmra.mxu1 %v3164_v11  ;;  %256 = vmatprep.subr.mxu1 %v60_v44 }
  0x38   :  { %257 = vmatpush1.msra.mxu1 %v59_v13  ;;  %223 = vmatprep.mubr.f32.mxu1 %v4634_v3 }
  0x39   :  { %258 = vmatprep.subr.mxu1 %v56_v46  ;;  %708 = vmatpush1.msra.mxu0 %v2859_v21  ;;  %v43_v21 = vld [vmem:[%s4627_s1 + $0x30] sm:$0xff] }
  0x3a   :  { %259 = vmatpush1.msra.mxu1 %v55_v48  ;;  %709 = vmatprep.subr.mxu0 %v2868_v23  ;;  %v3227_v23 = vld [vmem:[%s4628_s3 + $0x1f8] sm:$0xff] }
  0x3b   :  { %224 = vmatmul.mubr.f32.gmra.mxu1 %v3185_v15  ;;  %260 = vmatprep.subr.mxu1 %v52_v50 }
  0x3c   :  { %261 = vmatpush1.msra.mxu1 %v51_v17  ;;  %229 = vmatprep.mubr.f32.mxu1 %v4634_v3 }
  0x3d   :  { %262 = vmatprep.subr.mxu1 %v48_v52  ;;  %710 = vmatpush1.msra.mxu0 %v2877_v25  ;;  %v3232_v25 = vld [vmem:[%s4628_s3 + $0x1f0] sm:$0xff] }
  0x3e   :  { %263 = vmatpush1.msra.mxu1 %v47_v54  ;;  %711 = vmatprep.subr.mxu0 %v2886_v27  ;;  %v3253_v27 = vld [vmem:[%s4628_s3 + $0x1b8] sm:$0xff] }
  0x3f   :  { %230 = vmatmul.mubr.f32.gmra.mxu1 %v3206_v19  ;;  %264 = vmatprep.subr.mxu1 %v44_v56 }
  0x40   :  { %265 = vmatpush1.msra.mxu1 %v43_v21  ;;  %300 = vmatprep.mubr.f32.mxu1 %v4634_v3 }
  0x41   :  { %266 = vmatprep.subr.mxu1 %v40_v58  ;;  %712 = vmatpush1.msra.mxu0 %v2895_v29  ;;  %v3259_v29 = vld [vmem:[%s4628_s3 + $0x1b0] sm:$0xff] }
  0x42   :  { %267 = vmatpush1.msra.mxu1 %v39_v60  ;;  %713 = vmatprep.subr.mxu0 %v2904_v31  ;;  %v3281_v31 = vld [vmem:[%s4628_s3 + $0x178] sm:$0xff] }
  0x43   :  { %301 = vmatmul.mubr.f32.vlgmr.msra.gmra.mxu1 %v3054_v0  ;;  %524 = vmatprep.subr.mxu1 %v3227_v23  ;;  %v3266_v0 = vld [vmem:[%s4628_s3 + $0x198] sm:$0xff] }
  0x44   :  { %525 = vmatpush1.msra.mxu1 %v3232_v25  ;;  %306 = vmatprep.mubr.f32.mxu1 %v4634_v3 }
  0x45   :  { %526 = vmatprep.subr.mxu1 %v3238_v62  ;;  %714 = vmatpush1.msra.mxu0 %v2913_v33  ;;  %v3287_v33 = vld [vmem:[%s4628_s3 + $0x170] sm:$0xff] }
  0x46   :  { %527 = vmatpush1.msra.mxu1 %v3246_v1  ;;  %715 = vmatprep.subr.mxu0 %v2922_v35  ;;  %v3309_v35 = vld [vmem:[%s4628_s3 + $0x138] sm:$0xff] }
  0x47   :  { %307 = vmatmul.mubr.f32.gmra.mxu1 %v3080_v12  ;;  %528 = vmatprep.subr.mxu1 %v3253_v27  ;;  %v3322_v12 = vld [vmem:[%s4628_s3 + $0x118] sm:$0xff] }
  0x48   :  { %529 = vmatpush1.msra.mxu1 %v3259_v29  ;;  %312 = vmatprep.mubr.f32.mxu1 %v4634_v3 }
  0x49   :  { %530 = vmatprep.subr.mxu1 %v3266_v0  ;;  %716 = vmatpush1.msra.mxu0 %v2931_v37  ;;  %v3315_v37 = vld [vmem:[%s4628_s3 + $0x130] sm:$0xff] }
  0x4a   :  { %531 = vmatpush1.msra.mxu1 %v3274_v2  ;;  %717 = vmatprep.subr.mxu0 %v2940_v39  ;;  %v3337_v39 = vld [vmem:[%s4628_s3 + $0xf8] sm:$0xff] }
  0x4b   :  { %313 = vmatmul.mubr.f32.gmra.mxu1 %v3101_v22  ;;  %532 = vmatprep.subr.mxu1 %v3281_v31  ;;  %v3386_v22 = vld [vmem:[%s4628_s3 + $0x90] sm:$0xff] }
  0x4c   :  { %533 = vmatpush1.msra.mxu1 %v3287_v33  ;;  %318 = vmatprep.mubr.f32.mxu1 %v4634_v3 }
  0x4d   :  { %534 = vmatprep.subr.mxu1 %v3294_v7  ;;  %718 = vmatpush1.msra.mxu0 %v2949_v41  ;;  %v3343_v41 = vld [vmem:[%s4628_s3 + $0xf0] sm:$0xff] }
  0x4e   :  { %535 = vmatpush1.msra.mxu1 %v3302_v9  ;;  %719 = vmatprep.subr.mxu0 %v2958_v43  ;;  %v3365_v43 = vld [vmem:[%s4628_s3 + $0xb8] sm:$0xff] }
  0x4f   :  { %319 = vmatmul.mubr.f32.gmra.mxu1 %v3122_v4  ;;  %536 = vmatprep.subr.mxu1 %v3309_v35 }
  0x50   :  { %537 = vmatpush1.msra.mxu1 %v3315_v37  ;;  %324 = vmatprep.mubr.f32.mxu1 %v4634_v3 }
  0x51   :  { %538 = vmatprep.subr.mxu1 %v3322_v12  ;;  %720 = vmatpush1.msra.mxu0 %v2967_v45  ;;  %v3371_v45 = vld [vmem:[%s4628_s3 + $0xb0] sm:$0xff] }
  0x52   :  { %539 = vmatpush1.msra.mxu1 %v3330_v14  ;;  %721 = vmatprep.subr.mxu0 %v2976_v47  ;;  %v3393_v47 = vld [vmem:[%s4628_s3 + $0x78] sm:$0xff] }
  0x53   :  { %325 = vmatmul.mubr.f32.gmra.mxu1 %v3143_v8  ;;  %540 = vmatprep.subr.mxu1 %v3337_v39 }
  0x54   :  { %541 = vmatpush1.msra.mxu1 %v3343_v41  ;;  %330 = vmatprep.mubr.f32.mxu1 %v4634_v3 }
  0x55   :  { %542 = vmatprep.subr.mxu1 %v3350_v16  ;;  %722 = vmatpush1.msra.mxu0 %v2985_v49  ;;  %v3399_v49 = vld [vmem:[%s4628_s3 + $0x70] sm:$0xff] }
  0x56   :  { %543 = vmatpush1.msra.mxu1 %v3358_v18  ;;  %723 = vmatprep.subr.mxu0 %v2994_v51  ;;  %v3421_v51 = vld [vmem:[%s4628_s3 + $0x38] sm:$0xff] }
  0x57   :  { %331 = vmatmul.mubr.f32.gmra.mxu1 %v3164_v11  ;;  %544 = vmatprep.subr.mxu1 %v3365_v43 }
  0x58   :  { %545 = vmatpush1.msra.mxu1 %v3371_v45  ;;  %336 = vmatprep.mubr.f32.mxu1 %v4634_v3 }
  0x59   :  { %546 = vmatprep.subr.mxu1 %v3378_v20  ;;  %724 = vmatpush1.msra.mxu0 %v3003_v53  ;;  %v3427_v53 = vld [vmem:[%s4628_s3 + $0x30] sm:$0xff] }
  0x5a   :  { %547 = vmatpush1.msra.mxu1 %v3386_v22  ;;  %725 = vmatprep.subr.mxu0 %v3012_v55  ;;  %v103_v55 = vlaneseq }
  0x5b   :  { %337 = vmatmul.mubr.f32.gmra.mxu1 %v3185_v15  ;;  %548 = vmatprep.subr.mxu1 %v3393_v47 }
  0x5c   :  { %549 = vmatpush1.msra.mxu1 %v3399_v49  ;;  %342 = vmatprep.mubr.f32.mxu1 %v4634_v3 }
  0x5d   :  { %550 = vmatprep.subr.mxu1 %v3406_v24  ;;  %726 = vmatpush1.msra.mxu0 %v3021_v57  ;;  %v104_v57 = vshrl.u32 %v103_v55, 7 }
  0x5e   :  { %551 = vmatpush1.msra.mxu1 %v3414_v26  ;;  %727 = vmatprep.subr.mxu0 %v3030_v59 }
  0x5f   :  { %343 = vmatmul.mubr.f32.gmra.mxu1 %v3206_v19  ;;  %552 = vmatprep.subr.mxu1 %v3421_v51  ;;  %v105_v59 = vsub.s32 0, %v104_v57 }
  0x60   :  { %553 = vmatpush1.msra.mxu1 %v3427_v53  ;;  %588 = vmatprep.mubr.f32.mxu1 %v4634_v3 }
  0x61   :  { %554 = vmatprep.subr.mxu1 %v3434_v28  ;;  %728 = vmatpush1.msra.mxu0 %v3039_v61  ;;  %v101_v61 = vld [vmem:[%s4630_s2] sm:$0xf] }
  0x62   :  { %555 = vmatpush1.msra.mxu1 %v3442_v30  ;;  %729 = vmatprep.subr.mxu0 %v3048_v63  ;;  %v106_v32 = vrot.slane %v101_v61, %v105_v59 }
  0x63   :  { %589 = vmatmul.mubr.f32.vlgmr.msra.gmra.mxu1 %v4634_v3  ;;  %770 = vmatprep.subr.mxu1 %v3227_v23 }
  0x64   :  { %771 = vmatpush1.msra.mxu1 %v3232_v25  ;;  %730 = vmatpush1.msra.mxu0 %v3066_v5  ;;  %v109_v5 = vsub.s32 1, %v104_v57 }
  0x65   :  { %772 = vmatprep.subr.mxu1 %v3238_v62  ;;  %763 = vmatprep.mubr.f32.mxu0 %v4634_v3 }
  0x66   :  { %773 = vmatpush1.msra.mxu1 %v3246_v1  ;;  %834 = vmatprep.mubr.f32.mxu1 %v4634_v3  ;;  %v110_v34 = vrot.slane %v101_v61, %v109_v5 }
  0x67   :  { %774 = vmatprep.subr.mxu1 %v3253_v27 }
  0x68   :  { %775 = vmatpush1.msra.mxu1 %v3259_v29 }
  0x69   :  { %776 = vmatprep.subr.mxu1 %v3266_v0 }
  0x6a   :  { %777 = vmatpush1.msra.mxu1 %v3274_v2 }
  0x6b   :  { %778 = vmatprep.subr.mxu1 %v3281_v31 }
  0x6c   :  { %779 = vmatpush1.msra.mxu1 %v3287_v33 }
  0x6d   :  { %780 = vmatprep.subr.mxu1 %v3294_v7 }
  0x6e   :  { %781 = vmatpush1.msra.mxu1 %v3302_v9 }
  0x6f   :  { %782 = vmatprep.subr.mxu1 %v3309_v35 }
  0x70   :  { %783 = vmatpush1.msra.mxu1 %v3315_v37 }
  0x71   :  { %784 = vmatprep.subr.mxu1 %v3322_v12 }
  0x72   :  { %785 = vmatpush1.msra.mxu1 %v3330_v14 }
  0x73   :  { %786 = vmatprep.subr.mxu1 %v3337_v39 }
  0x74   :  { %787 = vmatpush1.msra.mxu1 %v3343_v41 }
  0x75   :  { %788 = vmatprep.subr.mxu1 %v3350_v16 }
  0x76   :  { %789 = vmatpush1.msra.mxu1 %v3358_v18 }
  0x77   :  { %790 = vmatprep.subr.mxu1 %v3365_v43 }
  0x78   :  { %791 = vmatpush1.msra.mxu1 %v3371_v45 }
  0x79   :  { %792 = vmatprep.subr.mxu1 %v3378_v20 }
  0x7a   :  { %793 = vmatpush1.msra.mxu1 %v3386_v22 }
  0x7b   :  { %794 = vmatprep.subr.mxu1 %v3393_v47 }
  0x7c   :  { %795 = vmatpush1.msra.mxu1 %v3399_v49 }
  0x7d   :  { %796 = vmatprep.subr.mxu1 %v3406_v24 }
  0x7e   :  { %797 = vmatpush1.msra.mxu1 %v3414_v26 }
  0x7f   :  { %798 = vmatprep.subr.mxu1 %v3421_v51 }
  0x80   :  { %799 = vmatpush1.msra.mxu1 %v3427_v53 }
  0x81   :  { %800 = vmatprep.subr.mxu1 %v3434_v28 }
  0x82   :  { %801 = vmatpush1.msra.mxu1 %v3442_v30 }
  0x83   :  { %1017 = vmatprep.subr.mxu1 %v3227_v23 }
  0xe2   :  { %v189_v63 = vpop.f32.mrf.mxu1 }
  0xe4   :  { %v191_v4 = vpop.f32.mrf.mxu1 }
  0xe7   :  { %v195_v6 = vpop.f32.mrf.mxu1 }
  0xe8   :  { %v3491_v36 = vadd.f32 %v195_v6, %v106_v32 }
  0xe9   :  { %v197_v8 = vpop.f32.mrf.mxu1 }
  0xea   :  { %v3493_v38 = vadd.f32 %v197_v8, %v110_v34  ;;  %v519_v8 = vpop.f32.mrf.mxu0 }
  0xeb   :  { %v201_v10 = vpop.f32.mrf.mxu1 }
  0xec   :  { %v3495_v40 = vadd.f32 %v201_v10, %v106_v32 }
  0xed   :  { %v203_v42 = vpop.f32.mrf.mxu1 }
  0xee   :  { %v3497_v11 = vadd.f32 %v203_v42, %v110_v34 }
  0xef   :  { %v207_v44 = vpop.f32.mrf.mxu1 }
  0xf0   :  { %v3499_v13 = vadd.f32 %v207_v44, %v106_v32  ;;  %v113_v44 = vsub.s32 2, %v104_v57 }
  0xf1   :  { %v209_v46 = vpop.f32.mrf.mxu1 }
  0xf2   :  { %4670 = vst [vmem:[#allocation6_spill] sm:$0xff] %v3499_v13  ;;  %v3501_v48 = vadd.f32 %v209_v46, %v110_v34 }
  0xf3   :  { %v213_v15 = vpop.f32.mrf.mxu1 }
  0xf4   :  { %4671 = vst [vmem:[#allocation7_spill] sm:$0xff] %v3501_v48  ;;  %v3503_v50 = vadd.f32 %v213_v15, %v106_v32  ;;  %v192_v15 = vadd.f32 %v191_v4, %v110_v34 }
  0xf5   :  { %v215_v17 = vpop.f32.mrf.mxu1 }
  0xf6   :  { %4672 = vst [vmem:[#allocation8_spill] sm:$0xff] %v3503_v50  ;;  %v3505_v52 = vadd.f32 %v215_v17, %v110_v34  ;;  %v117_v17 = vsub.s32 3, %v104_v57 }
  0xf7   :  { %v219_v54 = vpop.f32.mrf.mxu1 }
  0xf8   :  { %4673 = vst [vmem:[#allocation9_spill] sm:$0xff] %v3505_v52  ;;  %v3507_v19 = vadd.f32 %v219_v54, %v106_v32  ;;  %v190_v54 = vadd.f32 %v189_v63, %v106_v32 }
  0xf9   :  { %v221_v56 = vpop.f32.mrf.mxu1 }
  0xfa   :  { %4674 = vst [vmem:[#allocation10_spill] sm:$0xff] %v3507_v19  ;;  %v3509_v21 = vadd.f32 %v221_v56, %v110_v34  ;;  %v521_v56 = vpop.f32.mrf.mxu0  ;;  %v118_v19 = vrot.slane %v101_v61, %v117_v17 }
  0xfb   :  { %v225_v58 = vpop.f32.mrf.mxu1 }
  0xfc   :  { %4675 = vst [vmem:[#allocation11_spill] sm:$0xff] %v3509_v21  ;;  %v3511_v60 = vadd.f32 %v225_v58, %v106_v32  ;;  %v114_v21 = vrot.slane %v101_v61, %v113_v44 }
  0xfd   :  { %v227_v55 = vpop.f32.mrf.mxu1 }
  0xfe   :  { %4676 = vst [vmem:[#allocation12_spill] sm:$0xff] %v3511_v60  ;;  %v3513_v59 = vadd.f32 %v227_v55, %v110_v34  ;;  %v596_v60 = vadd.f32 %v521_v56, %v192_v15 }
  0xff   :  { %v231_v5 = vpop.f32.mrf.mxu1 }
 0x100   :  { %4677 = vst [vmem:[#allocation13_spill] sm:$0xff] %v3513_v59  ;;  %v3515_v6 = vadd.f32 %v231_v5, %v106_v32  ;;  %v595_v59 = vadd.f32 %v519_v8, %v190_v54 }
 0x101   :  { %v233_v10 = vpop.f32.mrf.mxu1 }
 0x102   :  { %4678 = vst [vmem:[#allocation14_spill] sm:$0xff] %v3515_v6  ;;  %v3517_v42 = vadd.f32 %v233_v10, %v110_v34  ;;  %v2512_v10 = vmul.f32 -1.442695, %v596_v60  ;;  %v2511_v50 = vmul.f32 -1.442695, %v595_v59 }
 0x103   :  { %v302_v46 = vpop.f32.mrf.mxu1 }
 0x104   :  { %4679 = vst [vmem:[#allocation15_spill] sm:$0xff] %v3517_v42  ;;  %2605 = vpow2.f32 %v2512_v10 }
 0x105   :  { %v304_v3 = vpop.f32.mrf.mxu1  ;;  %2607 = vpow2.f32 %v2511_v50 }
 0x107   :  { %v308_v58 = vpop.f32.mrf.mxu1 }
 0x108   :  { %v3519_v55 = vadd.f32 %v308_v58, %v114_v21 }
 0x109   :  { %v310_v5 = vpop.f32.mrf.mxu1 }
 0x10a   :  { %v3521_v6 = vadd.f32 %v310_v5, %v118_v19 }
 0x10b   :  { %v314_v52 = vpop.f32.mrf.mxu1 }
 0x10c   :  { %v3523_v42 = vadd.f32 %v314_v52, %v114_v21 }
 0x10d   :  { %v316_v4 = vpop.f32.mrf.mxu1 }
 0x10e   :  { %4680 = vst [vmem:[#allocation16_spill] sm:$0xff] %v3523_v42  ;;  %v3525_v57 = vadd.f32 %v316_v4, %v118_v19 }
 0x10f   :  { %v320_v63 = vpop.f32.mrf.mxu1 }
 0x110   :  { %v3527_v32 = vadd.f32 %v320_v63, %v114_v21 }
 0x111   :  { %v322_v61 = vpop.f32.mrf.mxu1  ;;  %v2606_v5 = vpop.eup %2605 }
 0x112   :  { %4681 = vst [vmem:[#allocation17_spill] sm:$0xff] %v3527_v32  ;;  %v3529_v34 = vadd.f32 %v322_v61, %v118_v19  ;;  %v2608_v10 = vpop.eup %2607  ;;  %v608_v61 = vadd.f32 1.0, %v2606_v5 }
 0x113   :  { %v326_v8 = vpop.f32.mrf.mxu1 }
 0x114   :  { %4682 = vst [vmem:[#allocation18_spill] sm:$0xff] %v3529_v34  ;;  %v3531_v44 = vadd.f32 %v326_v8, %v114_v21  ;;  %2609 = vrcp.f32 %v608_v61  ;;  %v3757_v61 = vld [vmem:[%s4628_s3 + $0x28] sm:$0xff] }
 0x115   :  { %v328_v15 = vpop.f32.mrf.mxu1  ;;  %4697 = vst [vmem:[#allocation32_spill] sm:$0xff] %v3757_v61 }
 0x116   :  { %4683 = vst [vmem:[#allocation19_spill] sm:$0xff] %v3531_v44  ;;  %v3533_v17 = vadd.f32 %v328_v15, %v118_v19  ;;  %v602_v15 = vadd.f32 1.0, %v2608_v10 }
 0x117   :  { %v332_v52 = vpop.f32.mrf.mxu1 }
 0x118   :  { %4684 = vst [vmem:[#allocation20_spill] sm:$0xff] %v3533_v17  ;;  %v3535_v60 = vadd.f32 %v332_v52, %v114_v21  ;;  %v303_v17 = vadd.f32 %v302_v46, %v114_v21  ;;  %2611 = vrcp.f32 %v602_v15  ;;  %v3769_v15 = vld [vmem:[%s4628_s3 + $0x8] sm:$0xff] }
 0x119   :  { %v334_v59 = vpop.f32.mrf.mxu1  ;;  %4699 = vst [vmem:[#allocation34_spill] sm:$0xff] %v3769_v15 }
 0x11a   :  { %4685 = vst [vmem:[#allocation21_spill] sm:$0xff] %v3535_v60  ;;  %v3537_v54 = vadd.f32 %v334_v59, %v118_v19  ;;  %v305_v59 = vadd.f32 %v304_v3, %v118_v19 }
 0x11b   :  { %v338_v56 = vpop.f32.mrf.mxu1 }
 0x11c   :  { %4686 = vst [vmem:[#allocation22_spill] sm:$0xff] %v3537_v54  ;;  %v3539_v58 = vadd.f32 %v338_v56, %v114_v21 }
 0x11d   :  { %v340_v50 = vpop.f32.mrf.mxu1 }
 0x11e   :  { %4687 = vst [vmem:[#allocation23_spill] sm:$0xff] %v3539_v58  ;;  %v3541_v4 = vadd.f32 %v340_v50, %v118_v19 }
 0x11f   :  { %v344_v63 = vpop.f32.mrf.mxu1 }
 0x120   :  { %4688 = vst [vmem:[#allocation24_spill] sm:$0xff] %v3541_v4  ;;  %v3543_v8 = vadd.f32 %v344_v63, %v114_v21 }
 0x121   :  { %v346_v44 = vpop.f32.mrf.mxu1  ;;  %v2610_v50 = vpop.eup %2609 }
 0x122   :  { %4689 = vst [vmem:[#allocation25_spill] sm:$0xff] %v3543_v8  ;;  %v3545_v52 = vadd.f32 %v346_v44, %v118_v19  ;;  %v619_v63 = vmul.f32 0.0, %v2610_v50 }
 0x123   :  { %v590_v60 = vpop.f32.mrf.mxu1 }
 0x124   :  { %4690 = vst [vmem:[#allocation26_spill] sm:$0xff] %v3545_v52  ;;  %v597_v54 = vadd.f32 %v590_v60, %v303_v17  ;;  %v3727_v17 = vld [vmem:[%s4628_s3 + $0x80] sm:$0xff]  ;;  %v3733_v60 = vld [vmem:[%s4628_s3 + $0x68] sm:$0xff] }
 0x125   :  { %v592_v56 = vpop.f32.mrf.mxu1  ;;  %v2612_v4 = vpop.eup %2611  ;;  %4693 = vst [vmem:[#allocation28_spill] sm:$0xff] %v3733_v60 }
 0x126   :  { %2613 = vtanh.f32 %v597_v54  ;;  %v598_v58 = vadd.f32 %v592_v56, %v305_v59  ;;  %v3739_v54 = vld [vmem:[%s4628_s3 + $0x60] sm:$0xff] }
 0x127   :  { %4694 = vst [vmem:[#allocation29_spill] sm:$0xff] %v3739_v54  ;;  %v3775_v59 = vld [vmem:[%s4628_s3] sm:$0xff] }
 0x128   :  { %v2513_v32 = vmul.f32 -1.442695, %v598_v58  ;;  %v3745_v58 = vld [vmem:[%s4628_s3 + $0x48] sm:$0xff]  ;;  %4700 = vst [vmem:[#allocation35_spill] sm:$0xff] %v3775_v59 }
 0x129   :  { %4695 = vst [vmem:[#allocation30_spill] sm:$0xff] %v3745_v58 }
 0x12a   :  { %2615 = vpow2.f32 %v2513_v32  ;;  %v4692_v32 = vmov 0.0  }
 0x133   :  { %v2614_v5 = vpop.eup %2613 }
 0x134   :  { %v620_v8 = vmul.f32 %v2614_v5, %v2612_v4  ;;  %v3751_v4 = vld [vmem:[%s4628_s3 + $0x40] sm:$0xff] }
 0x135   :  { %4696 = vst [vmem:[#allocation31_spill] sm:$0xff] %v3751_v4 }
 0x136   :  { %v3547_v10 = vadd.f32 %v620_v8, %v619_v63  ;;  %v3763_v8 = vld [vmem:[%s4628_s3 + $0x20] sm:$0xff] }
 0x137   :  { %v2616_v21 = vpop.eup %2615  ;;  %4698 = vst [vmem:[#allocation33_spill] sm:$0xff] %v3763_v8 }
 0x138   :  { %v615_v46 = vadd.f32 1.0, %v2616_v21  ;;  %2617 = vtanh.f32 %v3547_v10 }
 0x13a   :  { %2619 = vrcp.f32 %v615_v46 }
 0x145   :  { %v2618_v3 = vpop.eup %2617 }
 0x147   :  { %v2620_v19 = vpop.eup %2619 }
 0x148   :  { %v3550_v44 = vmul.f32 %v2620_v19, %v2618_v3 }
 0x14a   :  { %4691 = vst [vmem:[#allocation27_spill] sm:$0xff] %v3550_v44  ;;  %764 = vmatmul.mubr.f32.vlgmr.msra.gmra.mxu0 %v3550_v44  ;;  %835 = vmatmul.mubr.f32.vlgmr.msra.gmra.mxu1 %v3550_v44 }
 0x14b   :  { %1018 = vmatpush1.msra.mxu1 %v3232_v25  ;;  %1010 = vmatprep.mubr.f32.mxu0 %v4692_v32 }
 0x14c   :  { %1019 = vmatprep.subr.mxu1 %v3238_v62  ;;  %1081 = vmatprep.mubr.f32.mxu1 %v4692_v32 }
 0x14d   :  { %1020 = vmatpush1.msra.mxu1 %v3246_v1 }
 0x14e   :  { %1021 = vmatprep.subr.mxu1 %v3253_v27 }
 0x14f   :  { %1022 = vmatpush1.msra.mxu1 %v3259_v29 }
 0x150   :  { %1023 = vmatprep.subr.mxu1 %v3266_v0 }
 0x151   :  { %1024 = vmatpush1.msra.mxu1 %v3274_v2 }
 0x152   :  { %1025 = vmatprep.subr.mxu1 %v3281_v31 }
 0x153   :  { %1026 = vmatpush1.msra.mxu1 %v3287_v33 }
 0x154   :  { %1027 = vmatprep.subr.mxu1 %v3294_v7  ;;  %v3591_v7 = vld [vmem:[%s4628_s3 + $0x1e8] sm:$0xff] }
 0x155   :  { %1028 = vmatpush1.msra.mxu1 %v3302_v9  ;;  %946 = vmatprep.subr.mxu0 %v3591_v7  ;;  %v3597_v9 = vld [vmem:[%s4628_s3 + $0x1e0] sm:$0xff] }
 0x156   :  { %1029 = vmatprep.subr.mxu1 %v3309_v35  ;;  %947 = vmatpush1.msra.mxu0 %v3597_v9  ;;  %v3603_v35 = vld [vmem:[%s4628_s3 + $0x1c8] sm:$0xff] }
 0x157   :  { %1030 = vmatpush1.msra.mxu1 %v3315_v37  ;;  %948 = vmatprep.subr.mxu0 %v3603_v35  ;;  %v3615_v37 = vld [vmem:[%s4628_s3 + $0x1a8] sm:$0xff] }
 0x158   :  { %1031 = vmatprep.subr.mxu1 %v3322_v12  ;;  %v3621_v12 = vld [vmem:[%s4628_s3 + $0x1a0] sm:$0xff] }
 0x159   :  { %1032 = vmatpush1.msra.mxu1 %v3330_v14  ;;  %v3627_v14 = vld [vmem:[%s4628_s3 + $0x188] sm:$0xff] }
 0x15a   :  { %1033 = vmatprep.subr.mxu1 %v3337_v39  ;;  %v3633_v39 = vld [vmem:[%s4628_s3 + $0x180] sm:$0xff] }
 0x15b   :  { %1034 = vmatpush1.msra.mxu1 %v3343_v41  ;;  %v3639_v41 = vld [vmem:[%s4628_s3 + $0x168] sm:$0xff] }
 0x15c   :  { %1035 = vmatprep.subr.mxu1 %v3350_v16  ;;  %v3645_v16 = vld [vmem:[%s4628_s3 + $0x160] sm:$0xff] }
 0x15d   :  { %1036 = vmatpush1.msra.mxu1 %v3358_v18  ;;  %v3651_v18 = vld [vmem:[%s4628_s3 + $0x148] sm:$0xff] }
 0x15e   :  { %1037 = vmatprep.subr.mxu1 %v3365_v43  ;;  %v3657_v43 = vld [vmem:[%s4628_s3 + $0x140] sm:$0xff] }
 0x15f   :  { %1038 = vmatpush1.msra.mxu1 %v3371_v45  ;;  %v3663_v45 = vld [vmem:[%s4628_s3 + $0x128] sm:$0xff] }
 0x160   :  { %1039 = vmatprep.subr.mxu1 %v3378_v20  ;;  %v3669_v20 = vld [vmem:[%s4628_s3 + $0x120] sm:$0xff] }
 0x161   :  { %1040 = vmatpush1.msra.mxu1 %v3386_v22  ;;  %v3675_v22 = vld [vmem:[%s4628_s3 + $0x108] sm:$0xff] }
 0x162   :  { %1041 = vmatprep.subr.mxu1 %v3393_v47  ;;  %v3680_v47 = vld [vmem:[%s4628_s3 + $0x100] sm:$0xff] }
 0x163   :  { %1042 = vmatpush1.msra.mxu1 %v3399_v49  ;;  %v3685_v49 = vld [vmem:[%s4628_s3 + $0xe8] sm:$0xff] }
 0x164   :  { %1043 = vmatprep.subr.mxu1 %v3406_v24  ;;  %v3691_v24 = vld [vmem:[%s4628_s3 + $0xe0] sm:$0xff] }
 0x165   :  { %1044 = vmatpush1.msra.mxu1 %v3414_v26  ;;  %v3697_v26 = vld [vmem:[%s4628_s3 + $0xc8] sm:$0xff] }
 0x166   :  { %1045 = vmatprep.subr.mxu1 %v3421_v51  ;;  %v3703_v51 = vld [vmem:[%s4628_s3 + $0xc0] sm:$0xff] }
 0x167   :  { %1046 = vmatpush1.msra.mxu1 %v3427_v53  ;;  %v3709_v53 = vld [vmem:[%s4628_s3 + $0xa8] sm:$0xff] }
 0x168   :  { %1047 = vmatprep.subr.mxu1 %v3434_v28  ;;  %v3715_v28 = vld [vmem:[%s4628_s3 + $0xa0] sm:$0xff] }
 0x169   :  { %1048 = vmatpush1.msra.mxu1 %v3442_v30  ;;  %v3721_v30 = vld [vmem:[%s4628_s3 + $0x88] sm:$0xff] }
 0x16a   :  { %1264 = vmatprep.subr.mxu1 %v3227_v23  ;;  %v3609_v23 = vld [vmem:[%s4628_s3 + $0x1c0] sm:$0xff] }
 0x16b   :  { %949 = vmatpush1.msra.mxu0 %v3609_v23 }
 0x16c   :  { %950 = vmatprep.subr.mxu0 %v3615_v37 }
 0x16d   :  { %951 = vmatpush1.msra.mxu0 %v3621_v12 }
 0x16e   :  { %952 = vmatprep.subr.mxu0 %v3627_v14 }
 0x16f   :  { %953 = vmatpush1.msra.mxu0 %v3633_v39 }
 0x170   :  { %954 = vmatprep.subr.mxu0 %v3639_v41 }
 0x171   :  { %955 = vmatpush1.msra.mxu0 %v3645_v16 }
 0x172   :  { %956 = vmatprep.subr.mxu0 %v3651_v18 }
 0x173   :  { %957 = vmatpush1.msra.mxu0 %v3657_v43 }
 0x174   :  { %958 = vmatprep.subr.mxu0 %v3663_v45 }
 0x175   :  { %959 = vmatpush1.msra.mxu0 %v3669_v20 }
 0x176   :  { %960 = vmatprep.subr.mxu0 %v3675_v22 }
 0x177   :  { %961 = vmatpush1.msra.mxu0 %v3680_v47 }
 0x178   :  { %962 = vmatprep.subr.mxu0 %v3685_v49 }
 0x179   :  { %963 = vmatpush1.msra.mxu0 %v3691_v24 }
 0x17a   :  { %964 = vmatprep.subr.mxu0 %v3697_v26 }
 0x17b   :  { %965 = vmatpush1.msra.mxu0 %v3703_v51 }
 0x17c   :  { %966 = vmatprep.subr.mxu0 %v3709_v53 }
 0x17d   :  { %967 = vmatpush1.msra.mxu0 %v3715_v28 }
 0x17e   :  { %968 = vmatprep.subr.mxu0 %v3721_v30 }
 0x17f   :  { %969 = vmatpush1.msra.mxu0 %v3727_v17 }
 0x180   :  { %970 = vmatprep.subr.mxu0 %v3733_v60 }
 0x181   :  { %971 = vmatpush1.msra.mxu0 %v3739_v54 }
 0x182   :  { %972 = vmatprep.subr.mxu0 %v3745_v58 }
 0x183   :  { %973 = vmatpush1.msra.mxu0 %v3751_v4 }
 0x184   :  { %974 = vmatprep.subr.mxu0 %v3757_v61 }
 0x185   :  { %975 = vmatpush1.msra.mxu0 %v3763_v8 }
 0x186   :  { %976 = vmatprep.subr.mxu0 %v3769_v15 }
 0x187   :  { %977 = vmatpush1.msra.mxu0 %v3775_v59 }
 0x188   :  { %1193 = vmatprep.subr.mxu0 %v3591_v7 }
 0x20a   :  { %v765_v56 = vpop.f32.mrf.mxu0  ;;  %v836_v46 = vpop.f32.mrf.mxu1 }
 0x20b   :  { %v841_v50 = vadd.f32 %v765_v56, %v3491_v36  ;;  %v843_v44 = vadd.f32 %v836_v46, %v3519_v55  ;;  %v3921_v46 = vld [vmem:[%s4628_s3 + $0x78] sm:$0xff] }
 0x20c   :  { %v767_v5 = vpop.f32.mrf.mxu0  ;;  %v838_v19 = vpop.f32.mrf.mxu1  ;;  %4704 = vst [vmem:[#allocation39_spill] sm:$0xff] %v3921_v46 }
 0x20d   :  { %v2514_v63 = vmul.f32 -1.442695, %v841_v50  ;;  %v842_v21 = vadd.f32 %v767_v5, %v3493_v38  ;;  %v844_v52 = vadd.f32 %v838_v19, %v3521_v6  ;;  %v3927_v19 = vld [vmem:[%s4628_s3 + $0x70] sm:$0xff] }
 0x20e   :  { %4705 = vst [vmem:[#allocation40_spill] sm:$0xff] %v3927_v19 }
 0x20f   :  { %2621 = vpow2.f32 %v2514_v63  ;;  %v2515_v3 = vmul.f32 -1.442695, %v842_v21  ;;  %v2516_v34 = vmul.f32 -1.442695, %v844_v52 }
 0x211   :  { %2623 = vpow2.f32 %v2515_v3 }
 0x212   :  { %2625 = vtanh.f32 %v843_v44  ;;  %v3915_v44 = vld [vmem:[%s4628_s3 + $0x90] sm:$0xff] }
 0x213   :  { %2627 = vpow2.f32 %v2516_v34  ;;  %v3903_v34 = vld [vmem:[%s4628_s3 + $0xb0] sm:$0xff]  ;;  %4703 = vst [vmem:[#allocation38_spill] sm:$0xff] %v3915_v44 }
 0x21c   :  { %v2622_v48 = vpop.eup %2621 }
 0x21d   :  { %v848_v13 = vadd.f32 1.0, %v2622_v48 }
 0x21e   :  { %v2624_v42 = vpop.eup %2623 }
 0x21f   :  { %2629 = vrcp.f32 %v848_v13  ;;  %v854_v36 = vadd.f32 1.0, %v2624_v42  ;;  %v2626_v56 = vpop.eup %2625  ;;  %v3891_v13 = vld [vmem:[%s4628_s3 + $0xd0] sm:$0xff]  ;;  %v3897_v42 = vld [vmem:[%s4628_s3 + $0xb8] sm:$0xff] }
 0x220   :  { %v2628_v38 = vpop.eup %2627 }
 0x221   :  { %2631 = vrcp.f32 %v854_v36  ;;  %v861_v21 = vadd.f32 1.0, %v2628_v38  ;;  %v3933_v36 = vld [vmem:[%s4628_s3 + $0x58] sm:$0xff] }
 0x222   :  { %4706 = vst [vmem:[#allocation41_spill] sm:$0xff] %v3933_v36  ;;  %v3945_v38 = vld [vmem:[%s4628_s3 + $0x38] sm:$0xff] }
 0x223   :  { %2633 = vrcp.f32 %v861_v21  ;;  %4708 = vst [vmem:[#allocation43_spill] sm:$0xff] %v3945_v38 }
 0x22c   :  { %v2630_v50 = vpop.eup %2629 }
 0x22d   :  { %v866_v5 = vmul.f32 %v2630_v50, %v2626_v56  ;;  %v3939_v56 = vld [vmem:[%s4628_s3 + $0x50] sm:$0xff] }
 0x22e   :  { %v2632_v63 = vpop.eup %2631  ;;  %4707 = vst [vmem:[#allocation42_spill] sm:$0xff] %v3939_v56  ;;  %v3951_v50 = vld [vmem:[%s4628_s3 + $0x30] sm:$0xff] }
 0x22f   :  { %v865_v3 = vmul.f32 %v2632_v63, %v3547_v10  ;;  %v3909_v10 = vld [vmem:[%s4628_s3 + $0x98] sm:$0xff]  ;;  %4709 = vst [vmem:[#allocation44_spill] sm:$0xff] %v3951_v50  ;;  %v3963_v63 = vld [vmem:[%s4628_s3 + $0x10] sm:$0xff] }
 0x230   :  { %v2634_v48 = vpop.eup %2633  ;;  %4702 = vst [vmem:[#allocation37_spill] sm:$0xff] %v3909_v10  ;;  %4711 = vst [vmem:[#allocation46_spill] sm:$0xff] %v3963_v63 }
 0x231   :  { %v3786_v6 = vadd.f32 %v866_v5, %v865_v3  ;;  %v3957_v5 = vld [vmem:[%s4628_s3 + $0x18] sm:$0xff] }
 0x232   :  { %4710 = vst [vmem:[#allocation45_spill] sm:$0xff] %v3957_v5 }
 0x233   :  { %2635 = vtanh.f32 %v3786_v6 }
 0x240   :  { %v2636_v55 = vpop.eup %2635 }
 0x241   :  { %v3789_v52 = vmul.f32 %v2636_v55, %v2634_v48 }
 0x243   :  { %4701 = vst [vmem:[#allocation36_spill] sm:$0xff] %v3789_v52  ;;  %1011 = vmatmul.mubr.f32.vlgmr.msra.gmra.mxu0 %v3789_v52  ;;  %1082 = vmatmul.mubr.f32.vlgmr.msra.gmra.mxu1 %v3789_v52 }
 0x244   :  { %1194 = vmatpush1.msra.mxu0 %v3597_v9  ;;  %1265 = vmatpush1.msra.mxu1 %v3232_v25  ;;  %v3839_v25 = vld [vmem:[%s4628_s3 + $0x158] sm:$0xff] }
 0x245   :  { %1195 = vmatprep.subr.mxu0 %v3603_v35  ;;  %1266 = vmatprep.subr.mxu1 %v3238_v62  ;;  %v3845_v62 = vld [vmem:[%s4628_s3 + $0x150] sm:$0xff] }
 0x246   :  { %1196 = vmatpush1.msra.mxu0 %v3609_v23  ;;  %1267 = vmatpush1.msra.mxu1 %v3246_v1  ;;  %v3851_v1 = vld [vmem:[%s4628_s3 + $0x138] sm:$0xff] }
 0x247   :  { %1197 = vmatprep.subr.mxu0 %v3615_v37  ;;  %1268 = vmatprep.subr.mxu1 %v3253_v27  ;;  %v3857_v27 = vld [vmem:[%s4628_s3 + $0x130] sm:$0xff] }
 0x248   :  { %1198 = vmatpush1.msra.mxu0 %v3621_v12  ;;  %1269 = vmatpush1.msra.mxu1 %v3259_v29  ;;  %v3863_v29 = vld [vmem:[%s4628_s3 + $0x118] sm:$0xff] }
 0x249   :  { %1199 = vmatprep.subr.mxu0 %v3627_v14  ;;  %1270 = vmatprep.subr.mxu1 %v3266_v0  ;;  %v3868_v0 = vld [vmem:[%s4628_s3 + $0x110] sm:$0xff] }
 0x24a   :  { %1200 = vmatpush1.msra.mxu0 %v3633_v39  ;;  %1271 = vmatpush1.msra.mxu1 %v3274_v2  ;;  %v3873_v2 = vld [vmem:[%s4628_s3 + $0xf8] sm:$0xff] }
 0x24b   :  { %1201 = vmatprep.subr.mxu0 %v3639_v41  ;;  %1272 = vmatprep.subr.mxu1 %v3281_v31  ;;  %v3879_v31 = vld [vmem:[%s4628_s3 + $0xf0] sm:$0xff] }
 0x24c   :  { %1202 = vmatpush1.msra.mxu0 %v3645_v16  ;;  %1273 = vmatpush1.msra.mxu1 %v3287_v33  ;;  %v3885_v33 = vld [vmem:[%s4628_s3 + $0xd8] sm:$0xff] }
 0x24d   :  { %1203 = vmatprep.subr.mxu0 %v3651_v18  ;;  %1257 = vmatprep.mubr.f32.mxu0 %v4692_v32 }
 0x24e   :  { %1204 = vmatpush1.msra.mxu0 %v3657_v43  ;;  %1328 = vmatprep.mubr.f32.mxu1 %v4692_v32 }
 0x24f   :  { %1205 = vmatprep.subr.mxu0 %v3663_v45  ;;  %1274 = vmatprep.subr.mxu1 %v3839_v25 }
 0x250   :  { %1206 = vmatpush1.msra.mxu0 %v3669_v20  ;;  %1275 = vmatpush1.msra.mxu1 %v3845_v62 }
 0x251   :  { %1207 = vmatprep.subr.mxu0 %v3675_v22  ;;  %1276 = vmatprep.subr.mxu1 %v3851_v1 }
 0x252   :  { %1208 = vmatpush1.msra.mxu0 %v3680_v47  ;;  %1277 = vmatpush1.msra.mxu1 %v3857_v27 }
 0x253   :  { %1209 = vmatprep.subr.mxu0 %v3685_v49  ;;  %1278 = vmatprep.subr.mxu1 %v3863_v29 }
 0x254   :  { %1210 = vmatpush1.msra.mxu0 %v3691_v24  ;;  %1279 = vmatpush1.msra.mxu1 %v3868_v0 }
 0x255   :  { %1211 = vmatprep.subr.mxu0 %v3697_v26  ;;  %1280 = vmatprep.subr.mxu1 %v3873_v2 }
 0x256   :  { %1212 = vmatpush1.msra.mxu0 %v3703_v51  ;;  %1281 = vmatpush1.msra.mxu1 %v3879_v31 }
 0x257   :  { %1213 = vmatprep.subr.mxu0 %v3709_v53  ;;  %1282 = vmatprep.subr.mxu1 %v3885_v33 }
 0x258   :  { %1214 = vmatpush1.msra.mxu0 %v3715_v28  ;;  %1283 = vmatpush1.msra.mxu1 %v3891_v13 }
 0x259   :  { %1215 = vmatprep.subr.mxu0 %v3721_v30  ;;  %1284 = vmatprep.subr.mxu1 %v3897_v42 }
 0x25a   :  { %1216 = vmatpush1.msra.mxu0 %v3727_v17  ;;  %1285 = vmatpush1.msra.mxu1 %v3903_v34 }
 0x25b   :  { %1217 = vmatprep.subr.mxu0 %v3733_v60  ;;  %1286 = vmatprep.subr.mxu1 %v3909_v10 }
 0x25c   :  { %1218 = vmatpush1.msra.mxu0 %v3739_v54  ;;  %1287 = vmatpush1.msra.mxu1 %v3915_v44 }
 0x25d   :  { %1219 = vmatprep.subr.mxu0 %v3745_v58  ;;  %1288 = vmatprep.subr.mxu1 %v3921_v46  ;;  %v4712_v46 = vld [vmem:[#allocation16_spill] sm:$0xff] }
 0x25e   :  { %1220 = vmatpush1.msra.mxu0 %v3751_v4  ;;  %1289 = vmatpush1.msra.mxu1 %v3927_v19 }
 0x25f   :  { %1221 = vmatprep.subr.mxu0 %v3757_v61  ;;  %1290 = vmatprep.subr.mxu1 %v3933_v36 }
 0x260   :  { %1222 = vmatpush1.msra.mxu0 %v3763_v8  ;;  %1291 = vmatpush1.msra.mxu1 %v3939_v56 }
 0x261   :  { %1223 = vmatprep.subr.mxu0 %v3769_v15  ;;  %1292 = vmatprep.subr.mxu1 %v3945_v38 }
 0x262   :  { %1224 = vmatpush1.msra.mxu0 %v3775_v59  ;;  %1293 = vmatpush1.msra.mxu1 %v3951_v50 }
 0x263   :  { %1440 = vmatprep.subr.mxu0 %v3591_v7  ;;  %1294 = vmatprep.subr.mxu1 %v3957_v5 }
 0x264   :  { %1295 = vmatpush1.msra.mxu1 %v3963_v63 }
 0x303   :  { %v1012_v21 = vpop.f32.mrf.mxu0  ;;  %v1083_v38 = vpop.f32.mrf.mxu1 }
 0x304   :  { %v1088_v3 = vadd.f32 %v1012_v21, %v3495_v40  ;;  %v1090_v50 = vadd.f32 %v1083_v38, %v4712_v46  ;;  %v4041_v38 = vld [vmem:[%s4628_s3 + $0x1b8] sm:$0xff] }
 0x305   :  { %v1014_v48 = vpop.f32.mrf.mxu0  ;;  %v1085_v36 = vpop.f32.mrf.mxu1 }
 0x306   :  { %v2517_v55 = vmul.f32 -1.442695, %v1088_v3  ;;  %v1089_v52 = vadd.f32 %v1014_v48, %v3497_v11  ;;  %v1091_v19 = vadd.f32 %v1085_v36, %v3525_v57 }
 0x308   :  { %2637 = vpow2.f32 %v2517_v55  ;;  %v2518_v56 = vmul.f32 -1.442695, %v1089_v52  ;;  %v2519_v44 = vmul.f32 -1.442695, %v1091_v19 }
 0x30a   :  { %2639 = vpow2.f32 %v2518_v56 }
 0x30b   :  { %2641 = vtanh.f32 %v1090_v50  ;;  %v4047_v50 = vld [vmem:[%s4628_s3 + $0x1b0] sm:$0xff] }
 0x30c   :  { %2643 = vpow2.f32 %v2519_v44  ;;  %v4029_v44 = vld [vmem:[%s4628_s3 + $0x1d8] sm:$0xff] }
 0x315   :  { %v2638_v5 = vpop.eup %2637 }
 0x316   :  { %v1095_v10 = vadd.f32 1.0, %v2638_v5  ;;  %v4053_v5 = vld [vmem:[%s4628_s3 + $0x198] sm:$0xff] }
 0x317   :  { %v2640_v63 = vpop.eup %2639 }
 0x318   :  { %2645 = vrcp.f32 %v1095_v10  ;;  %v1101_v40 = vadd.f32 1.0, %v2640_v63  ;;  %v2642_v21 = vpop.eup %2641  ;;  %v4023_v10 = vld [vmem:[%s4628_s3 + $0x1f0] sm:$0xff] }
 0x319   :  { %v2644_v11 = vpop.eup %2643  ;;  %v4059_v63 = vld [vmem:[%s4628_s3 + $0x190] sm:$0xff] }
 0x31a   :  { %2647 = vrcp.f32 %v1101_v40  ;;  %v1108_v56 = vadd.f32 1.0, %v2644_v11  ;;  %v4065_v40 = vld [vmem:[%s4628_s3 + $0x178] sm:$0xff] }
 0x31b   :  { %v4715_v11 = vld [vmem:[#allocation37_spill] sm:$0xff] }
 0x31c   :  { %2649 = vrcp.f32 %v1108_v56  ;;  %v4719_v56 = vld [vmem:[#allocation41_spill] sm:$0xff] }
 0x325   :  { %v2646_v3 = vpop.eup %2645 }
 0x326   :  { %v1113_v48 = vmul.f32 %v2646_v3, %v2642_v21  ;;  %v4071_v21 = vld [vmem:[%s4628_s3 + $0x170] sm:$0xff]  ;;  %v4716_v3 = vld [vmem:[#allocation38_spill] sm:$0xff] }
 0x327   :  { %v2648_v52 = vpop.eup %2647 }
 0x328   :  { %v1112_v55 = vmul.f32 %v2648_v52, %v3786_v6  ;;  %v4017_v6 = vld [vmem:[%s4628_s3 + $0x1f8] sm:$0xff]  ;;  %v4718_v52 = vld [vmem:[#allocation40_spill] sm:$0xff] }
 0x329   :  { %v2650_v46 = vpop.eup %2649  ;;  %4714 = vst [vmem:[#allocation47_spill] sm:$0xff] %v4017_v6  ;;  %1511 = vmatprep.subr.mxu1 %v4017_v6 }
 0x32a   :  { %v3973_v57 = vadd.f32 %v1113_v48, %v1112_v55  ;;  %v4717_v48 = vld [vmem:[#allocation39_spill] sm:$0xff]  ;;  %v4720_v55 = vld [vmem:[#allocation42_spill] sm:$0xff] }
 0x32c   :  { %2651 = vtanh.f32 %v3973_v57 }
 0x339   :  { %v2652_v19 = vpop.eup %2651 }
 0x33a   :  { %v3976_v36 = vmul.f32 %v2652_v19, %v2650_v46  ;;  %v4721_v46 = vld [vmem:[#allocation43_spill] sm:$0xff]  ;;  %v4722_v19 = vld [vmem:[#allocation44_spill] sm:$0xff] }
 0x33c   :  { %4713 = vst [vmem:[#allocation16_spill] sm:$0xff] %v3976_v36  ;;  %1258 = vmatmul.mubr.f32.vlgmr.msra.gmra.mxu0 %v3976_v36  ;;  %1329 = vmatmul.mubr.f32.vlgmr.msra.gmra.mxu1 %v3976_v36  ;;  %v4723_v36 = vld [vmem:[#allocation45_spill] sm:$0xff] }
 0x33d   :  { %1441 = vmatpush1.msra.mxu0 %v3597_v9  ;;  %1504 = vmatprep.mubr.f32.mxu0 %v4692_v32 }
 0x33e   :  { %1442 = vmatprep.subr.mxu0 %v3603_v35  ;;  %1575 = vmatprep.mubr.f32.mxu1 %v4692_v32  ;;  %v4724_v32 = vld [vmem:[#allocation46_spill] sm:$0xff] }
 0x33f   :  { %1443 = vmatpush1.msra.mxu0 %v3609_v23  ;;  %1512 = vmatpush1.msra.mxu1 %v4023_v10 }
 0x340   :  { %1444 = vmatprep.subr.mxu0 %v3615_v37  ;;  %1513 = vmatprep.subr.mxu1 %v4029_v44 }
 0x341   :  { %1445 = vmatpush1.msra.mxu0 %v3621_v12 }
 0x342   :  { %1446 = vmatprep.subr.mxu0 %v3627_v14 }
 0x343   :  { %1447 = vmatpush1.msra.mxu0 %v3633_v39 }
 0x344   :  { %1448 = vmatprep.subr.mxu0 %v3639_v41 }
 0x345   :  { %1449 = vmatpush1.msra.mxu0 %v3645_v16 }
 0x346   :  { %1450 = vmatprep.subr.mxu0 %v3651_v18 }
 0x347   :  { %1451 = vmatpush1.msra.mxu0 %v3657_v43 }
 0x348   :  { %1452 = vmatprep.subr.mxu0 %v3663_v45 }
 0x349   :  { %1453 = vmatpush1.msra.mxu0 %v3669_v20 }
 0x34a   :  { %1454 = vmatprep.subr.mxu0 %v3675_v22 }
 0x34b   :  { %1455 = vmatpush1.msra.mxu0 %v3680_v47 }
 0x34c   :  { %1456 = vmatprep.subr.mxu0 %v3685_v49 }
 0x34d   :  { %1457 = vmatpush1.msra.mxu0 %v3691_v24 }
 0x34e   :  { %1458 = vmatprep.subr.mxu0 %v3697_v26 }
 0x34f   :  { %1459 = vmatpush1.msra.mxu0 %v3703_v51 }
 0x350   :  { %1460 = vmatprep.subr.mxu0 %v3709_v53 }
 0x351   :  { %1461 = vmatpush1.msra.mxu0 %v3715_v28 }
 0x352   :  { %1462 = vmatprep.subr.mxu0 %v3721_v30 }
 0x353   :  { %1463 = vmatpush1.msra.mxu0 %v3727_v17 }
 0x354   :  { %1464 = vmatprep.subr.mxu0 %v3733_v60 }
 0x355   :  { %1465 = vmatpush1.msra.mxu0 %v3739_v54  ;;  %v4727_v54 = vld [vmem:[#allocation18_spill] sm:$0xff] }
 0x356   :  { %1466 = vmatprep.subr.mxu0 %v3745_v58  ;;  %v4726_v58 = vld [vmem:[#allocation7_spill] sm:$0xff] }
 0x357   :  { %1467 = vmatpush1.msra.mxu0 %v3751_v4 }
 0x358   :  { %1468 = vmatprep.subr.mxu0 %v3757_v61 }
 0x359   :  { %1469 = vmatpush1.msra.mxu0 %v3763_v8 }
 0x35a   :  { %1470 = vmatprep.subr.mxu0 %v3769_v15  ;;  %v4725_v15 = vld [vmem:[#allocation6_spill] sm:$0xff] }
 0x35b   :  { %1471 = vmatpush1.msra.mxu0 %v3775_v59 }
 0x35c   :  { %1687 = vmatprep.subr.mxu0 %v3591_v7  ;;  %v4035_v7 = vld [vmem:[%s4628_s3 + $0x1d0] sm:$0xff] }
 0x35d   :  { %1514 = vmatpush1.msra.mxu1 %v4035_v7 }
 0x35e   :  { %1515 = vmatprep.subr.mxu1 %v4041_v38 }
 0x35f   :  { %1516 = vmatpush1.msra.mxu1 %v4047_v50 }
 0x360   :  { %1517 = vmatprep.subr.mxu1 %v4053_v5 }
 0x361   :  { %1518 = vmatpush1.msra.mxu1 %v4059_v63 }
 0x362   :  { %1519 = vmatprep.subr.mxu1 %v4065_v40 }
 0x363   :  { %1520 = vmatpush1.msra.mxu1 %v4071_v21 }
 0x364   :  { %1521 = vmatprep.subr.mxu1 %v3839_v25 }
 0x365   :  { %1522 = vmatpush1.msra.mxu1 %v3845_v62 }
 0x366   :  { %1523 = vmatprep.subr.mxu1 %v3851_v1 }
 0x367   :  { %1524 = vmatpush1.msra.mxu1 %v3857_v27 }
 0x368   :  { %1525 = vmatprep.subr.mxu1 %v3863_v29 }
 0x369   :  { %1526 = vmatpush1.msra.mxu1 %v3868_v0 }
 0x36a   :  { %1527 = vmatprep.subr.mxu1 %v3873_v2 }
 0x36b   :  { %1528 = vmatpush1.msra.mxu1 %v3879_v31 }
 0x36c   :  { %1529 = vmatprep.subr.mxu1 %v3885_v33 }
 0x36d   :  { %1530 = vmatpush1.msra.mxu1 %v3891_v13 }
 0x36e   :  { %1531 = vmatprep.subr.mxu1 %v3897_v42 }
 0x36f   :  { %1532 = vmatpush1.msra.mxu1 %v3903_v34 }
 0x370   :  { %1533 = vmatprep.subr.mxu1 %v4715_v11 }
 0x371   :  { %1534 = vmatpush1.msra.mxu1 %v4716_v3 }
 0x372   :  { %1535 = vmatprep.subr.mxu1 %v4717_v48  ;;  %v4728_v48 = vld [vmem:[#allocation17_spill] sm:$0xff] }
 0x373   :  { %1536 = vmatpush1.msra.mxu1 %v4718_v52 }
 0x374   :  { %1537 = vmatprep.subr.mxu1 %v4719_v56 }
 0x375   :  { %1538 = vmatpush1.msra.mxu1 %v4720_v55 }
 0x376   :  { %1539 = vmatprep.subr.mxu1 %v4721_v46 }
 0x377   :  { %1540 = vmatpush1.msra.mxu1 %v4722_v19 }
 0x378   :  { %1541 = vmatprep.subr.mxu1 %v4723_v36 }
 0x379   :  { %1542 = vmatpush1.msra.mxu1 %v4724_v32 }
 0x37a   :  { %1758 = vmatprep.subr.mxu1 %v4017_v6 }
 0x3fc   :  { %v1259_v59 = vpop.f32.mrf.mxu0  ;;  %v1330_v56 = vpop.f32.mrf.mxu1 }
 0x3fd   :  { %v1335_v8 = vadd.f32 %v1259_v59, %v4725_v15  ;;  %v1337_v36 = vadd.f32 %v1330_v56, %v4728_v48 }
 0x3fe   :  { %v1261_v61 = vpop.f32.mrf.mxu0  ;;  %v1332_v46 = vpop.f32.mrf.mxu1 }
 0x3ff   :  { %v2520_v4 = vmul.f32 -1.442695, %v1335_v8  ;;  %v1336_v52 = vadd.f32 %v1261_v61, %v4726_v58  ;;  %v1338_v19 = vadd.f32 %v1332_v46, %v4727_v54 }
 0x401   :  { %2653 = vpow2.f32 %v2520_v4  ;;  %v2521_v55 = vmul.f32 -1.442695, %v1336_v52  ;;  %v2522_v60 = vmul.f32 -1.442695, %v1338_v19  ;;  %v4750_v19 = vld [vmem:[#allocation20_spill] sm:$0xff] }
 0x403   :  { %2655 = vpow2.f32 %v2521_v55 }
 0x404   :  { %2657 = vtanh.f32 %v1337_v36 }
 0x405   :  { %2659 = vpow2.f32 %v2522_v60 }
 0x40e   :  { %v2654_v32 = vpop.eup %2653 }
 0x40f   :  { %v1342_v3 = vadd.f32 1.0, %v2654_v32 }
 0x410   :  { %v2656_v6 = vpop.eup %2655 }
 0x411   :  { %2661 = vrcp.f32 %v1342_v3  ;;  %v1348_v15 = vadd.f32 1.0, %v2656_v6  ;;  %v2658_v8 = vpop.eup %2657 }
 0x412   :  { %v2660_v58 = vpop.eup %2659 }
 0x413   :  { %2663 = vrcp.f32 %v1348_v15  ;;  %v1355_v52 = vadd.f32 1.0, %v2660_v58 }
 0x415   :  { %2665 = vrcp.f32 %v1355_v52 }
 0x41e   :  { %v2662_v4 = vpop.eup %2661 }
 0x41f   :  { %v1360_v61 = vmul.f32 %v2662_v4, %v2658_v8  ;;  %v4751_v8 = vld [vmem:[#allocation19_spill] sm:$0xff] }
 0x420   :  { %v2664_v59 = vpop.eup %2663 }
 0x421   :  { %v1359_v55 = vmul.f32 %v2664_v59, %v3973_v57  ;;  %v4749_v57 = vld [vmem:[#allocation9_spill] sm:$0xff] }
 0x422   :  { %v2666_v32 = vpop.eup %2665 }
 0x423   :  { %v4102_v54 = vadd.f32 %v1360_v61, %v1359_v55 }
 0x425   :  { %2667 = vtanh.f32 %v4102_v54 }
 0x432   :  { %v2668_v36 = vpop.eup %2667 }
 0x433   :  { %v4105_v48 = vmul.f32 %v2668_v36, %v2666_v32 }
 0x435   :  { %1505 = vmatmul.mubr.f32.vlgmr.msra.gmra.mxu0 %v4105_v48  ;;  %1576 = vmatmul.mubr.f32.vlgmr.msra.gmra.mxu1 %v4105_v48 }
 0x436   :  { %1688 = vmatpush1.msra.mxu0 %v3597_v9  ;;  %1759 = vmatpush1.msra.mxu1 %v4023_v10  ;;  %v4729_v9 = vld [vmem:[#allocation38_spill] sm:$0xff] }
 0x437   :  { %1689 = vmatprep.subr.mxu0 %v3603_v35  ;;  %1760 = vmatprep.subr.mxu1 %v4029_v44  ;;  %v4730_v35 = vld [vmem:[#allocation28_spill] sm:$0xff] }
 0x438   :  { %1690 = vmatpush1.msra.mxu0 %v3609_v23  ;;  %1761 = vmatpush1.msra.mxu1 %v4035_v7  ;;  %v4731_v23 = vld [vmem:[#allocation39_spill] sm:$0xff] }
 0x439   :  { %1691 = vmatprep.subr.mxu0 %v3615_v37  ;;  %1762 = vmatprep.subr.mxu1 %v4041_v38  ;;  %v4732_v37 = vld [vmem:[#allocation29_spill] sm:$0xff] }
 0x43a   :  { %1692 = vmatpush1.msra.mxu0 %v3621_v12  ;;  %1763 = vmatpush1.msra.mxu1 %v4047_v50  ;;  %v4733_v12 = vld [vmem:[#allocation40_spill] sm:$0xff] }
 0x43b   :  { %1693 = vmatprep.subr.mxu0 %v3627_v14  ;;  %1764 = vmatprep.subr.mxu1 %v4053_v5  ;;  %v4734_v14 = vld [vmem:[#allocation30_spill] sm:$0xff] }
 0x43c   :  { %1694 = vmatpush1.msra.mxu0 %v3633_v39  ;;  %1765 = vmatpush1.msra.mxu1 %v4059_v63  ;;  %v4735_v39 = vld [vmem:[#allocation41_spill] sm:$0xff] }
 0x43d   :  { %1695 = vmatprep.subr.mxu0 %v3639_v41  ;;  %1766 = vmatprep.subr.mxu1 %v4065_v40  ;;  %v4736_v41 = vld [vmem:[#allocation31_spill] sm:$0xff] }
 0x43e   :  { %1696 = vmatpush1.msra.mxu0 %v3645_v16  ;;  %1767 = vmatpush1.msra.mxu1 %v4071_v21  ;;  %v4737_v16 = vld [vmem:[#allocation42_spill] sm:$0xff] }
 0x43f   :  { %1697 = vmatprep.subr.mxu0 %v3651_v18  ;;  %1768 = vmatprep.subr.mxu1 %v3839_v25  ;;  %v4738_v18 = vld [vmem:[#allocation32_spill] sm:$0xff] }
 0x440   :  { %1698 = vmatpush1.msra.mxu0 %v3657_v43  ;;  %1769 = vmatpush1.msra.mxu1 %v3845_v62  ;;  %v4739_v43 = vld [vmem:[#allocation43_spill] sm:$0xff] }
 0x441   :  { %1699 = vmatprep.subr.mxu0 %v3663_v45  ;;  %1770 = vmatprep.subr.mxu1 %v3851_v1  ;;  %v4740_v45 = vld [vmem:[#allocation33_spill] sm:$0xff] }
 0x442   :  { %1700 = vmatpush1.msra.mxu0 %v3669_v20  ;;  %1771 = vmatpush1.msra.mxu1 %v3857_v27  ;;  %v4741_v20 = vld [vmem:[#allocation44_spill] sm:$0xff] }
 0x443   :  { %1701 = vmatprep.subr.mxu0 %v3675_v22  ;;  %1772 = vmatprep.subr.mxu1 %v3863_v29  ;;  %v4742_v22 = vld [vmem:[#allocation34_spill] sm:$0xff] }
 0x444   :  { %1702 = vmatpush1.msra.mxu0 %v3680_v47  ;;  %1773 = vmatpush1.msra.mxu1 %v3868_v0  ;;  %v4743_v47 = vld [vmem:[#allocation45_spill] sm:$0xff] }
 0x445   :  { %1703 = vmatprep.subr.mxu0 %v3685_v49  ;;  %1774 = vmatprep.subr.mxu1 %v3873_v2  ;;  %v4744_v49 = vld [vmem:[#allocation35_spill] sm:$0xff] }
 0x446   :  { %1704 = vmatpush1.msra.mxu0 %v3691_v24  ;;  %1775 = vmatpush1.msra.mxu1 %v3879_v31  ;;  %v4745_v24 = vmov 0.0  }
 0x447   :  { %1705 = vmatprep.subr.mxu0 %v3697_v26  ;;  %1776 = vmatprep.subr.mxu1 %v3885_v33  ;;  %v4746_v26 = vld [vmem:[#allocation46_spill] sm:$0xff] }
 0x448   :  { %1706 = vmatpush1.msra.mxu0 %v3703_v51  ;;  %1777 = vmatpush1.msra.mxu1 %v3891_v13  ;;  %v4747_v51 = vld [vmem:[#allocation47_spill] sm:$0xff] }
 0x449   :  { %1707 = vmatprep.subr.mxu0 %v3709_v53  ;;  %1778 = vmatprep.subr.mxu1 %v3897_v42 }
 0x44a   :  { %1708 = vmatpush1.msra.mxu0 %v3715_v28  ;;  %1779 = vmatpush1.msra.mxu1 %v3903_v34  ;;  %v4748_v28 = vld [vmem:[#allocation8_spill] sm:$0xff] }
 0x44b   :  { %1709 = vmatprep.subr.mxu0 %v3721_v30  ;;  %1780 = vmatprep.subr.mxu1 %v4715_v11 }
 0x44c   :  { %1710 = vmatpush1.msra.mxu0 %v3727_v17  ;;  %1781 = vmatpush1.msra.mxu1 %v4729_v9 }
 0x44d   :  { %1711 = vmatprep.subr.mxu0 %v4730_v35  ;;  %1782 = vmatprep.subr.mxu1 %v4731_v23 }
 0x44e   :  { %1712 = vmatpush1.msra.mxu0 %v4732_v37  ;;  %1783 = vmatpush1.msra.mxu1 %v4733_v12 }
 0x44f   :  { %1713 = vmatprep.subr.mxu0 %v4734_v14  ;;  %1784 = vmatprep.subr.mxu1 %v4735_v39 }
 0x450   :  { %1714 = vmatpush1.msra.mxu0 %v4736_v41  ;;  %1785 = vmatpush1.msra.mxu1 %v4737_v16 }
 0x451   :  { %1715 = vmatprep.subr.mxu0 %v4738_v18  ;;  %1786 = vmatprep.subr.mxu1 %v4739_v43 }
 0x452   :  { %1716 = vmatpush1.msra.mxu0 %v4740_v45  ;;  %1787 = vmatpush1.msra.mxu1 %v4741_v20 }
 0x453   :  { %1717 = vmatprep.subr.mxu0 %v4742_v22  ;;  %1788 = vmatprep.subr.mxu1 %v4743_v47 }
 0x454   :  { %1718 = vmatpush1.msra.mxu0 %v4744_v49  ;;  %1751 = vmatprep.mubr.f32.mxu0 %v4745_v24 }
 0x455   :  { %1789 = vmatpush1.msra.mxu1 %v4746_v26  ;;  %1822 = vmatprep.mubr.f32.mxu1 %v4745_v24 }
 0x456   :  { %2005 = vmatprep.subr.mxu1 %v4747_v51 }
 0x4f5   :  { %v1506_v53 = vpop.f32.mrf.mxu0  ;;  %v1577_v3 = vpop.f32.mrf.mxu1 }
 0x4f6   :  { %v1582_v30 = vadd.f32 %v1506_v53, %v4748_v28  ;;  %v1584_v58 = vadd.f32 %v1577_v3, %v4751_v8  ;;  %v4365_v28 = vld [vmem:[%s4628_s3 + $0x68] sm:$0xff] }
 0x4f7   :  { %v1508_v17 = vpop.f32.mrf.mxu0  ;;  %v1579_v46 = vpop.f32.mrf.mxu1  ;;  %v4401_v3 = vld [vmem:[%s4628_s3 + $0x8] sm:$0xff] }
 0x4f8   :  { %v2523_v60 = vmul.f32 -1.442695, %v1582_v30  ;;  %v1583_v6 = vadd.f32 %v1508_v17, %v4749_v57  ;;  %v1585_v15 = vadd.f32 %v1579_v46, %v4750_v19  ;;  %v4371_v30 = vld [vmem:[%s4628_s3 + $0x60] sm:$0xff]  ;;  %v4377_v17 = vld [vmem:[%s4628_s3 + $0x48] sm:$0xff] }
 0x4f9   :  { %v4389_v57 = vld [vmem:[%s4628_s3 + $0x28] sm:$0xff]  ;;  %v4752_v19 = vld [vmem:[#allocation10_spill] sm:$0xff] }
 0x4fa   :  { %2669 = vpow2.f32 %v2523_v60  ;;  %v2524_v56 = vmul.f32 -1.442695, %v1583_v6  ;;  %v2525_v4 = vmul.f32 -1.442695, %v1585_v15  ;;  %v4383_v60 = vld [vmem:[%s4628_s3 + $0x40] sm:$0xff] }
 0x4fb   :  { %v4395_v6 = vld [vmem:[%s4628_s3 + $0x20] sm:$0xff] }
 0x4fc   :  { %2671 = vpow2.f32 %v2524_v56  ;;  %v4407_v56 = vld [vmem:[%s4628_s3] sm:$0xff] }
 0x4fd   :  { %2673 = vtanh.f32 %v1584_v58 }
 0x4fe   :  { %2675 = vpow2.f32 %v2525_v4  ;;  %v4753_v4 = vld [vmem:[#allocation11_spill] sm:$0xff] }
 0x507   :  { %v2670_v61 = vpop.eup %2669 }
 0x508   :  { %v1589_v59 = vadd.f32 1.0, %v2670_v61 }
 0x509   :  { %v2672_v52 = vpop.eup %2671 }
 0x50a   :  { %2677 = vrcp.f32 %v1589_v59  ;;  %v1595_v55 = vadd.f32 1.0, %v2672_v52  ;;  %v2674_v32 = vpop.eup %2673 }
 0x50b   :  { %v2676_v36 = vpop.eup %2675 }
 0x50c   :  { %2679 = vrcp.f32 %v1595_v55  ;;  %v1602_v41 = vadd.f32 1.0, %v2676_v36 }
 0x50e   :  { %2681 = vrcp.f32 %v1602_v41 }
 0x517   :  { %v2678_v35 = vpop.eup %2677 }
 0x518   :  { %v1607_v37 = vmul.f32 %v2678_v35, %v2674_v32  ;;  %v4754_v32 = vld [vmem:[#allocation22_spill] sm:$0xff]  ;;  %v4755_v35 = vld [vmem:[#allocation21_spill] sm:$0xff] }
 0x519   :  { %v2680_v14 = vpop.eup %2679 }
 0x51a   :  { %v1606_v18 = vmul.f32 %v2680_v14, %v4102_v54  ;;  %v4301_v54 = vld [vmem:[%s4628_s3 + $0x120] sm:$0xff] }
 0x51b   :  { %v2682_v22 = vpop.eup %2681 }
 0x51c   :  { %v4179_v45 = vadd.f32 %v1607_v37, %v1606_v18 }
 0x51e   :  { %2683 = vtanh.f32 %v4179_v45 }
 0x52b   :  { %v2684_v49 = vpop.eup %2683 }
 0x52c   :  { %v4182_v53 = vmul.f32 %v2684_v49, %v2682_v22 }
 0x52e   :  { %1752 = vmatmul.mubr.f32.vlgmr.msra.gmra.mxu0 %v4182_v53  ;;  %1823 = vmatmul.mubr.f32.vlgmr.msra.gmra.mxu1 %v4182_v53 }
 0x52f   :  { %2006 = vmatpush1.msra.mxu1 %v4023_v10  ;;  %1998 = vmatprep.mubr.f32.mxu0 %v4745_v24 }
 0x530   :  { %2007 = vmatprep.subr.mxu1 %v4029_v44  ;;  %2069 = vmatprep.mubr.f32.mxu1 %v4745_v24 }
 0x531   :  { %2008 = vmatpush1.msra.mxu1 %v4035_v7 }
 0x532   :  { %2009 = vmatprep.subr.mxu1 %v4041_v38 }
 0x533   :  { %2010 = vmatpush1.msra.mxu1 %v4047_v50 }
 0x534   :  { %2011 = vmatprep.subr.mxu1 %v4053_v5 }
 0x535   :  { %2012 = vmatpush1.msra.mxu1 %v4059_v63 }
 0x536   :  { %2013 = vmatprep.subr.mxu1 %v4065_v40 }
 0x537   :  { %2014 = vmatpush1.msra.mxu1 %v4071_v21 }
 0x538   :  { %2015 = vmatprep.subr.mxu1 %v3839_v25  ;;  %v4223_v25 = vld [vmem:[%s4628_s3 + $0x1e8] sm:$0xff] }
 0x539   :  { %2016 = vmatpush1.msra.mxu1 %v3845_v62  ;;  %1934 = vmatprep.subr.mxu0 %v4223_v25  ;;  %v4229_v62 = vld [vmem:[%s4628_s3 + $0x1e0] sm:$0xff] }
 0x53a   :  { %2017 = vmatprep.subr.mxu1 %v3851_v1  ;;  %1935 = vmatpush1.msra.mxu0 %v4229_v62  ;;  %v4235_v1 = vld [vmem:[%s4628_s3 + $0x1c8] sm:$0xff] }
 0x53b   :  { %2018 = vmatpush1.msra.mxu1 %v3857_v27  ;;  %1936 = vmatprep.subr.mxu0 %v4235_v1  ;;  %v4241_v27 = vld [vmem:[%s4628_s3 + $0x1c0] sm:$0xff] }
 0x53c   :  { %2019 = vmatprep.subr.mxu1 %v3863_v29  ;;  %1937 = vmatpush1.msra.mxu0 %v4241_v27  ;;  %v4247_v29 = vld [vmem:[%s4628_s3 + $0x1a8] sm:$0xff] }
 0x53d   :  { %2020 = vmatpush1.msra.mxu1 %v3868_v0  ;;  %1938 = vmatprep.subr.mxu0 %v4247_v29  ;;  %v4253_v0 = vld [vmem:[%s4628_s3 + $0x1a0] sm:$0xff] }
 0x53e   :  { %2021 = vmatprep.subr.mxu1 %v3873_v2  ;;  %1939 = vmatpush1.msra.mxu0 %v4253_v0  ;;  %v4259_v2 = vld [vmem:[%s4628_s3 + $0x188] sm:$0xff] }
 0x53f   :  { %2022 = vmatpush1.msra.mxu1 %v3879_v31  ;;  %1940 = vmatprep.subr.mxu0 %v4259_v2  ;;  %v4265_v31 = vld [vmem:[%s4628_s3 + $0x180] sm:$0xff] }
 0x540   :  { %2023 = vmatprep.subr.mxu1 %v3885_v33  ;;  %1941 = vmatpush1.msra.mxu0 %v4265_v31  ;;  %v4271_v33 = vld [vmem:[%s4628_s3 + $0x168] sm:$0xff] }
 0x541   :  { %2024 = vmatpush1.msra.mxu1 %v3891_v13  ;;  %1942 = vmatprep.subr.mxu0 %v4271_v33  ;;  %v4277_v13 = vld [vmem:[%s4628_s3 + $0x160] sm:$0xff] }
 0x542   :  { %2025 = vmatprep.subr.mxu1 %v3897_v42  ;;  %1943 = vmatpush1.msra.mxu0 %v4277_v13  ;;  %v4283_v42 = vld [vmem:[%s4628_s3 + $0x148] sm:$0xff] }
 0x543   :  { %2026 = vmatpush1.msra.mxu1 %v3903_v34  ;;  %1944 = vmatprep.subr.mxu0 %v4283_v42  ;;  %v4289_v34 = vld [vmem:[%s4628_s3 + $0x140] sm:$0xff] }
 0x544   :  { %2027 = vmatprep.subr.mxu1 %v4715_v11  ;;  %1945 = vmatpush1.msra.mxu0 %v4289_v34  ;;  %v4295_v11 = vld [vmem:[%s4628_s3 + $0x128] sm:$0xff] }
 0x545   :  { %2028 = vmatpush1.msra.mxu1 %v4729_v9  ;;  %1946 = vmatprep.subr.mxu0 %v4295_v11  ;;  %v4307_v9 = vld [vmem:[%s4628_s3 + $0x108] sm:$0xff] }
 0x546   :  { %2029 = vmatprep.subr.mxu1 %v4731_v23  ;;  %1947 = vmatpush1.msra.mxu0 %v4301_v54  ;;  %v4312_v23 = vld [vmem:[%s4628_s3 + $0x100] sm:$0xff] }
 0x547   :  { %2030 = vmatpush1.msra.mxu1 %v4733_v12  ;;  %v4317_v12 = vld [vmem:[%s4628_s3 + $0xe8] sm:$0xff]  ;;  %1948 = vmatprep.subr.mxu0 %v4307_v9 }
 0x548   :  { %2031 = vmatprep.subr.mxu1 %v4735_v39  ;;  %v4323_v39 = vld [vmem:[%s4628_s3 + $0xe0] sm:$0xff]  ;;  %1949 = vmatpush1.msra.mxu0 %v4312_v23 }
 0x549   :  { %2032 = vmatpush1.msra.mxu1 %v4737_v16  ;;  %v4329_v16 = vld [vmem:[%s4628_s3 + $0xc8] sm:$0xff]  ;;  %1950 = vmatprep.subr.mxu0 %v4317_v12 }
 0x54a   :  { %2033 = vmatprep.subr.mxu1 %v4739_v43  ;;  %v4335_v43 = vld [vmem:[%s4628_s3 + $0xc0] sm:$0xff]  ;;  %1951 = vmatpush1.msra.mxu0 %v4323_v39 }
 0x54b   :  { %2034 = vmatpush1.msra.mxu1 %v4741_v20  ;;  %v4341_v20 = vld [vmem:[%s4628_s3 + $0xa8] sm:$0xff]  ;;  %1952 = vmatprep.subr.mxu0 %v4329_v16 }
 0x54c   :  { %2035 = vmatprep.subr.mxu1 %v4743_v47  ;;  %v4347_v47 = vld [vmem:[%s4628_s3 + $0xa0] sm:$0xff]  ;;  %1953 = vmatpush1.msra.mxu0 %v4335_v43 }
 0x54d   :  { %2036 = vmatpush1.msra.mxu1 %v4746_v26  ;;  %v4353_v26 = vld [vmem:[%s4628_s3 + $0x88] sm:$0xff]  ;;  %1954 = vmatprep.subr.mxu0 %v4341_v20 }
 0x54e   :  { %2252 = vmatprep.subr.mxu1 %v4747_v51  ;;  %v4359_v51 = vld [vmem:[%s4628_s3 + $0x80] sm:$0xff]  ;;  %1955 = vmatpush1.msra.mxu0 %v4347_v47 }
 0x54f   :  { %1956 = vmatprep.subr.mxu0 %v4353_v26 }
 0x550   :  { %1957 = vmatpush1.msra.mxu0 %v4359_v51 }
 0x551   :  { %1958 = vmatprep.subr.mxu0 %v4365_v28 }
 0x552   :  { %1959 = vmatpush1.msra.mxu0 %v4371_v30 }
 0x553   :  { %1960 = vmatprep.subr.mxu0 %v4377_v17 }
 0x554   :  { %1961 = vmatpush1.msra.mxu0 %v4383_v60 }
 0x555   :  { %1962 = vmatprep.subr.mxu0 %v4389_v57 }
 0x556   :  { %1963 = vmatpush1.msra.mxu0 %v4395_v6 }
 0x557   :  { %1964 = vmatprep.subr.mxu0 %v4401_v3 }
 0x558   :  { %1965 = vmatpush1.msra.mxu0 %v4407_v56 }
 0x559   :  { %2181 = vmatprep.subr.mxu0 %v4223_v25 }
 0x5ee   :  { %v1753_v46 = vpop.f32.mrf.mxu0  ;;  %v1824_v59 = vpop.f32.mrf.mxu1 }
 0x5ef   :  { %v1829_v15 = vadd.f32 %v1753_v46, %v4752_v19  ;;  %v1831_v37 = vadd.f32 %v1824_v59, %v4755_v35 }
 0x5f0   :  { %v1755_v8 = vpop.f32.mrf.mxu0  ;;  %v1826_v55 = vpop.f32.mrf.mxu1 }
 0x5f1   :  { %v2526_v58 = vmul.f32 -1.442695, %v1829_v15  ;;  %v1830_v61 = vadd.f32 %v1755_v8, %v4753_v4  ;;  %v1832_v36 = vadd.f32 %v1826_v55, %v4754_v32 }
 0x5f3   :  { %2685 = vpow2.f32 %v2526_v58  ;;  %v2527_v52 = vmul.f32 -1.442695, %v1830_v61  ;;  %v2528_v14 = vmul.f32 -1.442695, %v1832_v36 }
 0x5f5   :  { %2687 = vpow2.f32 %v2527_v52 }
 0x5f6   :  { %2689 = vtanh.f32 %v1831_v37 }
 0x5f7   :  { %2691 = vpow2.f32 %v2528_v14 }
 0x600   :  { %v2686_v41 = vpop.eup %2685 }
 0x601   :  { %v1836_v18 = vadd.f32 1.0, %v2686_v41 }
 0x602   :  { %v2688_v22 = vpop.eup %2687 }
 0x603   :  { %2693 = vrcp.f32 %v1836_v18  ;;  %v1842_v49 = vadd.f32 1.0, %v2688_v22  ;;  %v2690_v25 = vpop.eup %2689 }
 0x604   :  { %v2692_v46 = vpop.eup %2691 }
 0x605   :  { %2695 = vrcp.f32 %v1842_v49  ;;  %v1849_v58 = vadd.f32 1.0, %v2692_v46 }
 0x607   :  { %2697 = vrcp.f32 %v1849_v58  ;;  %v2376_v58 = vld [vmem:[%s4631_s4 + $0x60] sm:$0xff] }
 0x610   :  { %v2694_v19 = vpop.eup %2693 }
 0x611   :  { %v1854_v15 = vmul.f32 %v2694_v19, %v2690_v25  ;;  %v2378_v19 = vld [vmem:[%s4631_s4 + $0x70] sm:$0xff] }
 0x612   :  { %v2696_v8 = vpop.eup %2695 }
 0x613   :  { %v1853_v4 = vmul.f32 %v2696_v8, %v4179_v45  ;;  %v2140_v45 = vld [vmem:[%s4628_s3 + $0xb8] sm:$0xff]  ;;  %v2377_v8 = vld [vmem:[%s4631_s4 + $0x68] sm:$0xff] }
 0x614   :  { %v2698_v59 = vpop.eup %2697 }
 0x615   :  { %v4418_v61 = vadd.f32 %v1854_v15, %v1853_v4  ;;  %v4760_v15 = vld [vmem:[#allocation27_spill] sm:$0xff]  ;;  %v2375_v4 = vld [vmem:[%s4631_s4 + $0x58] sm:$0xff] }
 0x617   :  { %2699 = vtanh.f32 %v4418_v61 }
 0x624   :  { %v2700_v52 = vpop.eup %2699 }
 0x625   :  { %v4421_v55 = vmul.f32 %v2700_v52, %v2698_v59  ;;  %v2373_v59 = vld [vmem:[%s4631_s4 + $0x48] sm:$0xff]  ;;  %v2372_v52 = vld [vmem:[%s4631_s4 + $0x40] sm:$0xff] }
 0x627   :  { %1999 = vmatmul.mubr.f32.vlgmr.msra.gmra.mxu0 %v4421_v55  ;;  %2070 = vmatmul.mubr.f32.vlgmr.msra.gmra.mxu1 %v4421_v55 }
 0x628   :  { %2182 = vmatpush1.msra.mxu0 %v4229_v62  ;;  %2253 = vmatpush1.msra.mxu1 %v4023_v10  ;;  %v2160_v10 = vld [vmem:[%s4628_s3 + $0x158] sm:$0xff]  ;;  %v2139_v62 = vld [vmem:[%s4628_s3 + $0xb0] sm:$0xff] }
 0x629   :  { %2183 = vmatprep.subr.mxu0 %v4235_v1  ;;  %2254 = vmatprep.subr.mxu1 %v4029_v44  ;;  %v2159_v44 = vld [vmem:[%s4628_s3 + $0x150] sm:$0xff]  ;;  %v2136_v1 = vld [vmem:[%s4628_s3 + $0x98] sm:$0xff] }
 0x62a   :  { %2184 = vmatpush1.msra.mxu0 %v4241_v27  ;;  %2255 = vmatpush1.msra.mxu1 %v4035_v7  ;;  %v2156_v7 = vld [vmem:[%s4628_s3 + $0x138] sm:$0xff] }
 0x62b   :  { %2185 = vmatprep.subr.mxu0 %v4247_v29  ;;  %2256 = vmatprep.subr.mxu1 %v4041_v38  ;;  %v2155_v38 = vld [vmem:[%s4628_s3 + $0x130] sm:$0xff]  ;;  %v2379_v27 = vld [vmem:[%s4631_s4 + $0x78] sm:$0xff] }
 0x62c   :  { %2186 = vmatpush1.msra.mxu0 %v4253_v0  ;;  %2257 = vmatpush1.msra.mxu1 %v4047_v50  ;;  %v2152_v50 = vld [vmem:[%s4628_s3 + $0x118] sm:$0xff]  ;;  %v2135_v29 = vld [vmem:[%s4628_s3 + $0x90] sm:$0xff] }
 0x62d   :  { %2187 = vmatprep.subr.mxu0 %v4259_v2  ;;  %2258 = vmatprep.subr.mxu1 %v4053_v5  ;;  %v2151_v5 = vld [vmem:[%s4628_s3 + $0x110] sm:$0xff]  ;;  %v2132_v0 = vld [vmem:[%s4628_s3 + $0x78] sm:$0xff] }
 0x62e   :  { %2188 = vmatpush1.msra.mxu0 %v4265_v31  ;;  %2259 = vmatpush1.msra.mxu1 %v4059_v63  ;;  %v2148_v63 = vld [vmem:[%s4628_s3 + $0xf8] sm:$0xff]  ;;  %v2131_v2 = vld [vmem:[%s4628_s3 + $0x70] sm:$0xff] }
 0x62f   :  { %2189 = vmatprep.subr.mxu0 %v4271_v33  ;;  %2260 = vmatprep.subr.mxu1 %v4065_v40  ;;  %v2147_v40 = vld [vmem:[%s4628_s3 + $0xf0] sm:$0xff]  ;;  %v2128_v31 = vld [vmem:[%s4628_s3 + $0x58] sm:$0xff] }
 0x630   :  { %2190 = vmatpush1.msra.mxu0 %v4277_v13  ;;  %2261 = vmatpush1.msra.mxu1 %v4071_v21  ;;  %v2144_v21 = vld [vmem:[%s4628_s3 + $0xd8] sm:$0xff]  ;;  %v2127_v33 = vld [vmem:[%s4628_s3 + $0x50] sm:$0xff] }
 0x631   :  { %2191 = vmatprep.subr.mxu0 %v4283_v42  ;;  %2245 = vmatprep.mubr.f32.mxu0 %v4745_v24  ;;  %v2124_v13 = vld [vmem:[%s4628_s3 + $0x38] sm:$0xff]  ;;  %v2123_v42 = vld [vmem:[%s4628_s3 + $0x30] sm:$0xff] }
 0x632   :  { %2192 = vmatpush1.msra.mxu0 %v4289_v34  ;;  %2316 = vmatprep.mubr.f32.mxu1 %v4745_v24  ;;  %v2143_v24 = vld [vmem:[%s4628_s3 + $0xd0] sm:$0xff]  ;;  %v2120_v34 = vld [vmem:[%s4628_s3 + $0x18] sm:$0xff] }
 0x633   :  { %2193 = vmatprep.subr.mxu0 %v4295_v11  ;;  %2262 = vmatprep.subr.mxu1 %v2160_v10  ;;  %v2119_v11 = vld [vmem:[%s4628_s3 + $0x10] sm:$0xff]  ;;  %v2371_v10 = vld [vmem:[%s4631_s4 + $0x38] sm:$0xff] }
 0x634   :  { %2194 = vmatpush1.msra.mxu0 %v4301_v54  ;;  %2263 = vmatpush1.msra.mxu1 %v2159_v44  ;;  %v2370_v44 = vld [vmem:[%s4631_s4 + $0x30] sm:$0xff] }
 0x635   :  { %2195 = vmatprep.subr.mxu0 %v4307_v9  ;;  %2264 = vmatprep.subr.mxu1 %v2156_v7  ;;  %v4756_v9 = vld [vmem:[#allocation12_spill] sm:$0xff]  ;;  %v2369_v7 = vld [vmem:[%s4631_s4 + $0x28] sm:$0xff] }
 0x636   :  { %2196 = vmatpush1.msra.mxu0 %v4312_v23  ;;  %2265 = vmatpush1.msra.mxu1 %v2155_v38  ;;  %v2368_v38 = vld [vmem:[%s4631_s4 + $0x20] sm:$0xff] }
 0x637   :  { %2197 = vmatprep.subr.mxu0 %v4317_v12  ;;  %2266 = vmatprep.subr.mxu1 %v2152_v50  ;;  %v2367_v50 = vld [vmem:[%s4631_s4 + $0x18] sm:$0xff] }
 0x638   :  { %2198 = vmatpush1.msra.mxu0 %v4323_v39  ;;  %2267 = vmatpush1.msra.mxu1 %v2151_v5  ;;  %v2366_v5 = vld [vmem:[%s4631_s4 + $0x10] sm:$0xff] }
 0x639   :  { %2199 = vmatprep.subr.mxu0 %v4329_v16  ;;  %2268 = vmatprep.subr.mxu1 %v2148_v63  ;;  %v4757_v16 = vld [vmem:[#allocation13_spill] sm:$0xff]  ;;  %v2365_v63 = vld [vmem:[%s4631_s4 + $0x8] sm:$0xff] }
 0x63a   :  { %2200 = vmatpush1.msra.mxu0 %v4335_v43  ;;  %2269 = vmatpush1.msra.mxu1 %v2147_v40  ;;  %v2364_v40 = vld [vmem:[%s4631_s4] sm:$0xff] }
 0x63b   :  { %2201 = vmatprep.subr.mxu0 %v4341_v20  ;;  %2270 = vmatprep.subr.mxu1 %v2144_v21  ;;  %v4761_v21 = vld [vmem:[#allocation36_spill] sm:$0xff] }
 0x63c   :  { %2202 = vmatpush1.msra.mxu0 %v4347_v47  ;;  %2271 = vmatpush1.msra.mxu1 %v2143_v24  ;;  %v4762_v24 = vld [vmem:[#allocation16_spill] sm:$0xff] }
 0x63d   :  { %2203 = vmatprep.subr.mxu0 %v4353_v26  ;;  %2272 = vmatprep.subr.mxu1 %v2140_v45 }
 0x63e   :  { %2204 = vmatpush1.msra.mxu0 %v4359_v51  ;;  %2273 = vmatpush1.msra.mxu1 %v2139_v62  ;;  %v4758_v51 = vld [vmem:[#allocation24_spill] sm:$0xff]  ;;  %v4763_v62 = vld [vmem:[#allocation14_spill] sm:$0xff] }
 0x63f   :  { %2205 = vmatprep.subr.mxu0 %v4365_v28  ;;  %2274 = vmatprep.subr.mxu1 %v2136_v1 }
 0x640   :  { %2206 = vmatpush1.msra.mxu0 %v4371_v30  ;;  %2275 = vmatpush1.msra.mxu1 %v2135_v29  ;;  %v4759_v30 = vld [vmem:[#allocation23_spill] sm:$0xff] }
 0x641   :  { %2207 = vmatprep.subr.mxu0 %v4377_v17  ;;  %2276 = vmatprep.subr.mxu1 %v2132_v0  ;;  %v4764_v0 = vld [vmem:[#allocation15_spill] sm:$0xff] }
 0x642   :  { %2208 = vmatpush1.msra.mxu0 %v4383_v60  ;;  %2277 = vmatpush1.msra.mxu1 %v2131_v2 }
 0x643   :  { %2209 = vmatprep.subr.mxu0 %v4389_v57  ;;  %2278 = vmatprep.subr.mxu1 %v2128_v31 }
 0x644   :  { %2210 = vmatpush1.msra.mxu0 %v4395_v6  ;;  %2279 = vmatpush1.msra.mxu1 %v2127_v33 }
 0x645   :  { %2211 = vmatprep.subr.mxu0 %v4401_v3  ;;  %2280 = vmatprep.subr.mxu1 %v2124_v13 }
 0x646   :  { %2212 = vmatpush1.msra.mxu0 %v4407_v56  ;;  %2281 = vmatpush1.msra.mxu1 %v2123_v42  ;;  %v4765_v42 = vld [vmem:[#allocation26_spill] sm:$0xff] }
 0x647   :  { %2560 = vmatprep.subr.mxu0 %v2379_v27  ;;  %2282 = vmatprep.subr.mxu1 %v2120_v34 }
 0x648   :  { %2283 = vmatpush1.msra.mxu1 %v2119_v11 }
 0x6e7   :  { %v2000_v54 = vpop.f32.mrf.mxu0  ;;  %v2071_v20 = vpop.f32.mrf.mxu1 }
 0x6e8   :  { %v2076_v23 = vadd.f32 %v2000_v54, %v4756_v9  ;;  %v2078_v17 = vadd.f32 %v2071_v20, %v4759_v30 }
 0x6e9   :  { %v2002_v12 = vpop.f32.mrf.mxu0  ;;  %v2073_v26 = vpop.f32.mrf.mxu1 }
 0x6ea   :  { %v2529_v39 = vmul.f32 -1.442695, %v2076_v23  ;;  %v2077_v43 = vadd.f32 %v2002_v12, %v4757_v16  ;;  %v2079_v28 = vadd.f32 %v2073_v26, %v4758_v51  ;;  %v2535_v12 = vld [vmem:[%s4632_s5] ss:$0 sm:$0xff] }
 0x6ec   :  { %2701 = vpow2.f32 %v2529_v39  ;;  %v2530_v47 = vmul.f32 -1.442695, %v2077_v43  ;;  %v2531_v60 = vmul.f32 -1.442695, %v2079_v28 }
 0x6ee   :  { %2703 = vpow2.f32 %v2530_v47 }
 0x6ef   :  { %2705 = vtanh.f32 %v2078_v17 }
 0x6f0   :  { %2707 = vpow2.f32 %v2531_v60 }
 0x6f9   :  { %v2702_v57 = vpop.eup %2701 }
 0x6fa   :  { %v2083_v6 = vadd.f32 1.0, %v2702_v57 }
 0x6fb   :  { %v2704_v3 = vpop.eup %2703 }
 0x6fc   :  { %2709 = vrcp.f32 %v2083_v6  ;;  %v2089_v56 = vadd.f32 1.0, %v2704_v3  ;;  %v2706_v32 = vpop.eup %2705 }
 0x6fd   :  { %v2708_v36 = vpop.eup %2707 }
 0x6fe   :  { %2711 = vrcp.f32 %v2089_v56  ;;  %v2096_v41 = vadd.f32 1.0, %v2708_v36 }
 0x700   :  { %2713 = vrcp.f32 %v2096_v41 }
 0x709   :  { %v2710_v35 = vpop.eup %2709 }
 0x70a   :  { %v2101_v37 = vmul.f32 %v2710_v35, %v2706_v32 }
 0x70b   :  { %v2712_v14 = vpop.eup %2711 }
 0x70c   :  { %v2100_v18 = vmul.f32 %v2712_v14, %v4418_v61  ;;  %v2374_v61 = vld [vmem:[%s4631_s4 + $0x50] sm:$0xff] }
 0x70d   :  { %v2714_v49 = vpop.eup %2713 }
 0x70e   :  { %v4541_v22 = vadd.f32 %v2101_v37, %v2100_v18 }
 0x710   :  { %2715 = vtanh.f32 %v4541_v22 }
 0x71d   :  { %v2716_v25 = vpop.eup %2715 }
 0x71e   :  { %v2104_v46 = vmul.f32 %v2716_v25, %v2714_v49 }
 0x720   :  { %2246 = vmatmul.mubr.f32.vlgmr.msra.gmra.mxu0 %v2104_v46  ;;  %2317 = vmatmul.mubr.f32.vlgmr.msra.gmra.mxu1 %v2104_v46 }
 0x721   :  { %2561 = vmatpush3.msra.mxu0 %v2379_v27  ;;  %2592 = vmatprep.mubr.f32.mxu0 %v4760_v15 }
 0x722   :  { %2562 = vmatprep.subr.mxu0 %v2378_v19 }
 0x723   :  { %2563 = vmatpush3.msra.mxu0 %v2378_v19 }
 0x724   :  { %2564 = vmatprep.subr.mxu0 %v2377_v8 }
 0x725   :  { %2565 = vmatpush3.msra.mxu0 %v2377_v8 }
 0x726   :  { %2566 = vmatprep.subr.mxu0 %v2376_v58 }
 0x727   :  { %2567 = vmatpush3.msra.mxu0 %v2376_v58 }
 0x728   :  { %2568 = vmatprep.subr.mxu0 %v2375_v4 }
 0x729   :  { %2569 = vmatpush3.msra.mxu0 %v2375_v4 }
 0x72a   :  { %2570 = vmatprep.subr.mxu0 %v2374_v61 }
 0x72b   :  { %2571 = vmatpush3.msra.mxu0 %v2374_v61 }
 0x72c   :  { %2572 = vmatprep.subr.mxu0 %v2373_v59 }
 0x72d   :  { %2573 = vmatpush3.msra.mxu0 %v2373_v59 }
 0x72e   :  { %2574 = vmatprep.subr.mxu0 %v2372_v52 }
 0x72f   :  { %2575 = vmatpush3.msra.mxu0 %v2372_v52 }
 0x730   :  { %2576 = vmatprep.subr.mxu0 %v2371_v10 }
 0x731   :  { %2577 = vmatpush3.msra.mxu0 %v2371_v10 }
 0x732   :  { %2578 = vmatprep.subr.mxu0 %v2370_v44 }
 0x733   :  { %2579 = vmatpush3.msra.mxu0 %v2370_v44 }
 0x734   :  { %2580 = vmatprep.subr.mxu0 %v2369_v7 }
 0x735   :  { %2581 = vmatpush3.msra.mxu0 %v2369_v7 }
 0x736   :  { %2582 = vmatprep.subr.mxu0 %v2368_v38 }
 0x737   :  { %2583 = vmatpush3.msra.mxu0 %v2368_v38 }
 0x738   :  { %2584 = vmatprep.subr.mxu0 %v2367_v50 }
 0x739   :  { %2585 = vmatpush3.msra.mxu0 %v2367_v50 }
 0x73a   :  { %2586 = vmatprep.subr.mxu0 %v2366_v5 }
 0x73b   :  { %2587 = vmatpush3.msra.mxu0 %v2366_v5 }
 0x73c   :  { %2588 = vmatprep.subr.mxu0 %v2365_v63 }
 0x73d   :  { %2589 = vmatpush3.msra.mxu0 %v2365_v63 }
 0x73e   :  { %2590 = vmatprep.subr.mxu0 %v2364_v40 }
 0x73f   :  { %2591 = vmatpush3.msra.mxu0 %v2364_v40 }
 0x740   :  { %2593 = vmatmul.mubr.f32.vlgmr.msra.gmra.mxu0 %v4761_v21 }
 0x741   :  { %2595 = vmatprep.mubr.f32.mxu0 %v4762_v24 }
 0x744   :  { %2596 = vmatmul.mubr.f32.gmra.mxu0 %v4105_v48  ;;  %v4766_v48 = vld [vmem:[#allocation25_spill] sm:$0xff] }
 0x745   :  { %2598 = vmatprep.mubr.f32.mxu0 %v4182_v53 }
 0x748   :  { %2599 = vmatmul.mubr.f32.gmra.mxu0 %v4421_v55 }
 0x749   :  { %2601 = vmatprep.mubr.f32.mxu0 %v2104_v46 }
 0x7e0   :  { %v2247_v45 = vpop.f32.mrf.mxu0  ;;  %v2318_v31 = vpop.f32.mrf.mxu1 }
 0x7e1   :  { %v2323_v1 = vadd.f32 %v2247_v45, %v4763_v62  ;;  %v2325_v11 = vadd.f32 %v2318_v31, %v4766_v48 }
 0x7e2   :  { %v2249_v27 = vpop.f32.mrf.mxu0  ;;  %v2320_v13 = vpop.f32.mrf.mxu1 }
 0x7e3   :  { %v2532_v29 = vmul.f32 -1.442695, %v2323_v1  ;;  %v2324_v2 = vadd.f32 %v2249_v27, %v4764_v0  ;;  %v2326_v34 = vadd.f32 %v2320_v13, %v4765_v42 }
 0x7e5   :  { %2717 = vpow2.f32 %v2532_v29  ;;  %v2533_v33 = vmul.f32 -1.442695, %v2324_v2  ;;  %v2534_v53 = vmul.f32 -1.442695, %v2326_v34 }
 0x7e7   :  { %2719 = vpow2.f32 %v2533_v33 }
 0x7e8   :  { %2721 = vtanh.f32 %v2325_v11 }
 0x7e9   :  { %2723 = vpow2.f32 %v2534_v53 }
 0x7f2   :  { %v2718_v54 = vpop.eup %2717 }
 0x7f3   :  { %v2330_v55 = vadd.f32 1.0, %v2718_v54 }
 0x7f4   :  { %v2720_v9 = vpop.eup %2719 }
 0x7f5   :  { %2725 = vrcp.f32 %v2330_v55  ;;  %v2336_v23 = vadd.f32 1.0, %v2720_v9  ;;  %v2722_v39 = vpop.eup %2721 }
 0x7f6   :  { %v2724_v43 = vpop.eup %2723 }
 0x7f7   :  { %2727 = vrcp.f32 %v2336_v23  ;;  %v2343_v17 = vadd.f32 1.0, %v2724_v43 }
 0x7f9   :  { %2729 = vrcp.f32 %v2343_v17 }
 0x800   :  { %v2594_v16 = vpop.f32.mrf.mxu0 }
 0x801   :  { %v2459_v20 = vadd.f32 %v2594_v16, %v2535_v12 }
 0x802   :  { %v2726_v47 = vpop.eup %2725  ;;  %v2453_v26 = vpop.f32.mrf.mxu0 }
 0x803   :  { %v2348_v51 = vmul.f32 %v2726_v47, %v2722_v39  ;;  %2493 = vst [vmem:[%s4633_s6 + $0x8] sm:$0xff] %v2459_v20  ;;  %v2454_v28 = vadd.f32 %v2535_v12, %v2453_v26 }
 0x804   :  { %v2728_v30 = vpop.eup %2727  ;;  %v2597_v60 = vpop.f32.mrf.mxu0 }
 0x805   :  { %v2347_v57 = vmul.f32 %v2728_v30, %v4541_v22  ;;  %2492 = vst [vmem:[%s4633_s6] sm:$0xff] %v2454_v28  ;;  %v2469_v6 = vadd.f32 %v2597_v60, %v2535_v12 }
 0x806   :  { %v2463_v3 = vpop.f32.mrf.mxu0  ;;  %v2730_v41 = vpop.eup %2729 }
 0x807   :  { %2495 = vst [vmem:[%s4633_s6 + $0x18] sm:$0xff] %v2469_v6  ;;  %v2464_v56 = vadd.f32 %v2535_v12, %v2463_v3  ;;  %v2349_v32 = vadd.f32 %v2348_v51, %v2347_v57 }
 0x808   :  { %v2600_v36 = vpop.f32.mrf.mxu0 }
 0x809   :  { %2494 = vst [vmem:[%s4633_s6 + $0x10] sm:$0xff] %v2464_v56  ;;  %v2479_v35 = vadd.f32 %v2600_v36, %v2535_v12  ;;  %2731 = vtanh.f32 %v2349_v32 }
 0x80a   :  { %v2473_v37 = vpop.f32.mrf.mxu0 }
 0x80b   :  { %2497 = vst [vmem:[%s4633_s6 + $0x28] sm:$0xff] %v2479_v35  ;;  %v2474_v14 = vadd.f32 %v2535_v12, %v2473_v37 }
 0x80d   :  { %2496 = vst [vmem:[%s4633_s6 + $0x20] sm:$0xff] %v2474_v14 }
 0x816   :  { %v2732_v18 = vpop.eup %2731 }
 0x817   :  { %v2351_v22 = vmul.f32 %v2732_v18, %v2730_v41 }
 0x819   :  { %2602 = vmatmul.mubr.f32.gmra.mxu0 %v2351_v22 }
 0x8d9   :  { %v2603_v49 = vpop.f32.mrf.mxu0 }
 0x8da   :  { %v2489_v25 = vadd.f32 %v2603_v49, %v2535_v12 }
 0x8db   :  { %v2483_v46 = vpop.f32.mrf.mxu0 }
 0x8dc   :  { %2499 = vst [vmem:[%s4633_s6 + $0x38] sm:$0xff] %v2489_v25  ;;  %v2484_v19 = vadd.f32 %v2535_v12, %v2483_v46 }
 0x8de   :  { %2498 = vst [vmem:[%s4633_s6 + $0x30] sm:$0xff] %v2484_v19 }

</bundles_post_ra>
